<compile_context>
chip_gen: v5e
topology: v5e:2x2
jax: 0.10.0
libtpu: 0.0.40
codegen_flags: <defaults>
</compile_context>

<pallas_src>
import functools

import jax
import jax.numpy as jnp
from jax.experimental import pallas as pl
from jax.experimental.pallas import tpu as pltpu

LN_EPS = 1e-5
NEG_INF = -1e30  # large finite negative: exp() underflows to 0, never NaNs


def _layernorm(x, gamma, beta):
    mu = jnp.mean(x, axis=-1, keepdims=True)
    var = jnp.mean((x - mu) ** 2, axis=-1, keepdims=True)
    return (x - mu) * jax.lax.rsqrt(var + LN_EPS) * gamma + beta


def block_kernel(x_ref, wqkv_ref, wproj_ref, bproj_ref,
                 ln1_g_ref, ln1_b_ref, ln2_g_ref, ln2_b_ref,
                 w1_ref, b1_ref, w2_ref, b2_ref, out_ref,
                 *, n_head, head_size):
    bb, T, C = x_ref.shape
    nhh = n_head * head_size
    bf16 = jnp.bfloat16

    x = x_ref[...].astype(jnp.float32).reshape(bb * T, C)

    # ---------------- x = x + sa(ln1(x)) ----------------
    xn = _layernorm(x, ln1_g_ref[0], ln1_b_ref[0])

    # Single fused QKV matmul (bf16 inputs, f32 accumulation).  The attention
    # scale C**-0.5 is pre-folded into the Q columns of wqkv by the wrapper.
    qkv = jnp.dot(xn.astype(bf16), wqkv_ref[...],
                  preferred_element_type=jnp.float32)          # (bb*T, 3*NH*hs)
    qkv16 = qkv.astype(bf16)                                   # cast once, reuse

    # Causal mask built once per grid step, folded into jnp.where.
    causal = (jax.lax.broadcasted_iota(jnp.int32, (1, T, T), 1)
              >= jax.lax.broadcasted_iota(jnp.int32, (1, T, T), 2))

    head_outs = []
    for h in range(n_head):            # static unroll; NH == 1 for this module
        q = qkv16[:, h * head_size:(h + 1) * head_size].reshape(bb, T, head_size)
        k = qkv16[:, nhh + h * head_size: nhh + (h + 1) * head_size].reshape(
            bb, T, head_size)
        v = qkv16[:, 2 * nhh + h * head_size: 2 * nhh + (h + 1) * head_size].reshape(
            bb, T, head_size)

        s = jnp.einsum('bqd,bkd->bqk', q, k, preferred_element_type=jnp.float32)
        s = jnp.where(causal, s, NEG_INF)            # masked_fill(tril==0, -inf)
        s = s - jnp.max(s, axis=-1, keepdims=True)
        p = jnp.exp(s)
        p = p * pl.reciprocal(jnp.sum(p, axis=-1, keepdims=True), approx=True)
        o = jnp.einsum('bqk,bkd->bqd', p.astype(bf16), v,
                       preferred_element_type=jnp.float32)
        head_outs.append(o.reshape(bb * T, head_size))

    cat = head_outs[0] if n_head == 1 else jnp.concatenate(head_outs, axis=-1)
    sa = jnp.dot(cat.astype(bf16), wproj_ref[...],
                 preferred_element_type=jnp.float32) + bproj_ref[0]
    x1 = x + sa

    # ---------------- x = x + ffwd(ln2(x)) ----------------
    xn2 = _layernorm(x1, ln2_g_ref[0], ln2_b_ref[0])
    h1 = jnp.maximum(
        jnp.dot(xn2.astype(bf16), w1_ref[...],
                preferred_element_type=jnp.float32) + b1_ref[0], 0.0)
    ff = jnp.dot(h1.astype(bf16), w2_ref[...],
                 preferred_element_type=jnp.float32) + b2_ref[0]

    out_ref[...] = (x1 + ff).reshape(bb, T, C).astype(out_ref.dtype)


# ---------------------------------------------------------------------------
# Generation-aware sizing
# ---------------------------------------------------------------------------
_GEN_CFG = {
    #       act budget,   min MXU rows, vmem cap,   vmem floor (default scoped)
    "v5e": (10 << 20, 128, 96 << 20, 16 << 20),
    "v6e": (22 << 20, 256, 96 << 20, 32 << 20),
    "v7x": (14 << 20, 256, 48 << 20, 32 << 20),
}


def _tpu_generation():
    try:
        kind = jax.devices()[0].device_kind.lower()
    except Exception:
        return "v6e"
    if "v5 lite" in kind or "v5e" in kind or "v5lite" in kind:
        return "v5e"
    if "v7" in kind or "tpu7" in kind:
        return "v7x"
    return "v6e"


def _per_batch_vmem_bytes(T, C, H, n_head, hs):
    """f32 activations + bf16 temporaries + double-buffered x/out tiles, per batch elem."""
    f32, bf16 = 4, 2
    nhh = n_head * hs
    act_f32 = 6 * T * C + 3 * T * nhh + 2 * n_head * T * T + T * H
    act_bf16 = 4 * T * C + 3 * T * nhh + T * H
    pipe = 2 * 2 * T * C                      # double-buffered x and out tiles
    return f32 * (act_f32 + pipe) + bf16 * act_bf16


def _pick_batch_block(B, T, C, H, n_head, hs, gen):
    budget, min_rows, _, _ = _GEN_CFG[gen]
    per_b = _per_batch_vmem_bytes(T, C, H, n_head, hs)
    bb = max(1, min(B, budget // max(per_b, 1)))
    # Lower bound: keep bb*T >= min_rows (MXU M-dim) whenever B allows it.  The
    # raise only triggers at small T, where the per-element footprint is tiny.
    bb = max(bb, min(B, pl.cdiv(min_rows, T)))
    # v7x has 2 TensorCores: keep at least 2 parallel grid steps when possible.
    if gen == "v7x" and B > 1:
        bb = max(1, min(bb, B // 2))
    while B % bb:
        bb -= 1
    return bb


def _vmem_limit_bytes(bb, T, C, H, n_head, hs, gen, weight_buffers):
    _, _, cap, floor = _GEN_CFG[gen]
    nhh = n_head * hs
    weight_bytes = 2 * (C * 3 * nhh + nhh * C + C * H + H * C) * weight_buffers
    small_bytes = 4 * (6 * C + H) * 2                 # biases + LN params
    est = bb * _per_batch_vmem_bytes(T, C, H, n_head, hs) + weight_bytes + small_bytes
    limit = int(est * 1.5) + (4 << 20)
    return max(floor, min(cap, limit))


def _const_index_map(ndim):
    zeros = (0,) * ndim
    return lambda b: zeros


# ---------------------------------------------------------------------------
# Wrapper
# ---------------------------------------------------------------------------
def prepare_block_params(params):
    """One-time weight fusion / bf16 cast (hoisted out of the per-call path)."""
    n_head, n_embd, hs = params["wq"].shape
    scale = n_embd ** -0.5                 # Head.forward: C ** (-0.5), C = n_embd

    def heads_to_cols(w):                  # (NH, C, hs) -> (C, NH*hs)
        return jnp.transpose(w, (1, 0, 2)).reshape(n_embd, n_head * hs)

    bf16 = jnp.bfloat16
    wqkv = jnp.concatenate(
        [heads_to_cols(params["wq"]) * scale,   # fold attention scale into Q
         heads_to_cols(params["wk"]),
         heads_to_cols(params["wv"])], axis=1).astype(bf16)    # (C, 3*NH*hs)

    prepared = dict(params)
    prepared.update(
        wqkv=wqkv,
        wproj16=params["wproj"].astype(bf16),
        w1_16=params["w1"].astype(bf16),
        w2_16=params["w2"].astype(bf16),
        n_head=int(n_head),
        head_size=int(hs),
    )
    return prepared


def block_forward(x, params):
    if "wqkv" not in params:               # allow raw params; prefer pre-prepared
        params = prepare_block_params(params)

    B, T, C = x.shape
    n_head, hs = params["n_head"], params["head_size"]
    H = params["w1"].shape[1]              # 4 * n_embd
    assert n_head * hs == C, "reference Block requires n_head*head_size == n_embd"

    gen = _tpu_generation()
    bb = _pick_batch_block(B, T, C, H, n_head, hs, gen)
    grid = (B // bb,)
    kernel = functools.partial(block_kernel, n_head=n_head, head_size=hs)

    # Advisory cost estimate for XLA scheduling.
    flops = (2 * B * T * C * 3 * n_head * hs        # fused QKV
             + 4 * B * n_head * T * T * hs          # q@k.T and p@v
             + 2 * B * T * n_head * hs * C          # proj
             + 4 * B * T * C * H)                   # FFN (two matmuls)
    transcendentals = B * n_head * T * T            # exp in softmax
    bytes_accessed = (2 * x.size * x.dtype.itemsize
                      + (params["wqkv"].size + params["wproj16"].size
                         + params["w1_16"].size + params["w2_16"].size) * 2
                      + (params["bproj"].size + params["b1"].size
                         + params["b2"].size + 4 * C) * 4)
    cost = pl.CostEstimate(flops=flops, transcendentals=transcendentals,
                           bytes_accessed=bytes_accessed)

    operands = (x, params["wqkv"], params["wproj16"], params["bproj"],
                params["ln1_g"], params["ln1_b"], params["ln2_g"], params["ln2_b"],
                params["w1_16"], params["b1"], params["w2_16"], params["b2"])

    def make_call(single_buffer_weights, alias_x):
        wbuf = 1 if single_buffer_weights else 2

        def wspec(shape):
            idx = _const_index_map(len(shape))
            if single_buffer_weights:
                # Grid-invariant weights: one resident copy, no double buffer.
                return pl.BlockSpec(shape, idx, pipeline_mode=pl.Buffered(1))
            return pl.BlockSpec(shape, idx)

        in_specs = [
            pl.BlockSpec((bb, T, C), lambda b: (b, 0, 0)),            # x
            wspec((C, 3 * n_head * hs)),                              # wqkv (bf16)
            wspec((n_head * hs, C)),                                  # wproj (bf16)
            wspec((1, C)),                                            # bproj
            wspec((1, C)), wspec((1, C)),                             # ln1 g / b
            wspec((1, C)), wspec((1, C)),                             # ln2 g / b
            wspec((C, H)), wspec((1, H)),                             # w1 (bf16), b1
            wspec((H, C)), wspec((1, C)),                             # w2 (bf16), b2
        ]
        vmem_limit = _vmem_limit_bytes(bb, T, C, H, n_head, hs, gen, wbuf)
        return pl.pallas_call(
            kernel,
            out_shape=jax.ShapeDtypeStruct((B, T, C), x.dtype),
            grid=grid,
            in_specs=in_specs,
            out_specs=pl.BlockSpec((bb, T, C), lambda b: (b, 0, 0)),
            compiler_params=pltpu.CompilerParams(
                dimension_semantics=("parallel",),
                vmem_limit_bytes=vmem_limit),
            cost_estimate=cost,
            input_output_aliases=({0: 0} if alias_x else {}),
        )

    # Primary: single-buffered invariant weights + x->out aliasing.
    # Fallback: conservative config, in case this jax build rejects either.
    try:
        return make_call(True, True)(*operands)
    except Exception:
        return make_call(False, False)(*operands)


# ---------------------------------------------------------------------------
# Pure-JAX reference + demo
# ---------------------------------------------------------------------------
def block_ref(x, p):
    """Pure-JAX f32 reference mirroring the PyTorch forward (eval mode)."""
    def ln(y, g, b):
        mu = y.mean(-1, keepdims=True)
        var = ((y - mu) ** 2).mean(-1, keepdims=True)
        return (y - mu) / jnp.sqrt(var + LN_EPS) * g + b

    B, T, C = x.shape
    xn = ln(x, p["ln1_g"][0], p["ln1_b"][0])
    mask = jnp.tril(jnp.ones((T, T), dtype=bool))
    outs = []
    for h in range(p["wq"].shape[0]):
        q = xn @ p["wq"][h]
        k = xn @ p["wk"][h]
        v = xn @ p["wv"][h]
        wei = q @ jnp.swapaxes(k, -1, -2) * C ** -0.5
        wei = jnp.where(mask, wei, -jnp.inf)
        wei = jax.nn.softmax(wei, axis=-1)
        outs.append(wei @ v)
    cat = jnp.concatenate(outs, axis=-1)
    x1 = x + cat @ p["wproj"] + p["bproj"][0]
    xn2 = ln(x1, p["ln2_g"][0], p["ln2_b"][0])
    ff = jnp.maximum(xn2 @ p["w1"] + p["b1"][0], 0.0) @ p["w2"] + p["b2"][0]
    return x1 + ff


def init_params(key, n_embd, n_head):
    head_size = n_embd            # as in Block.__init__ (requires n_head == 1)
    H = 4 * n_embd
    ks = jax.random.split(key, 10)
    s = 0.02
    return {
        "wq": s * jax.random.normal(ks[0], (n_head, n_embd, head_size), jnp.float32),
        "wk": s * jax.random.normal(ks[1], (n_head, n_embd, head_size), jnp.float32),
        "wv": s * jax.random.normal(ks[2], (n_head, n_embd, head_size), jnp.float32),
        "wproj": s * jax.random.normal(ks[3], (n_head * head_size, n_embd), jnp.float32),
        "bproj": s * jax.random.normal(ks[4], (1, n_embd), jnp.float32),
        "ln1_g": jnp.ones((1, n_embd), jnp.float32),
        "ln1_b": jnp.zeros((1, n_embd), jnp.float32),
        "ln2_g": jnp.ones((1, n_embd), jnp.float32),
        "ln2_b": jnp.zeros((1, n_embd), jnp.float32),
        "w1": s * jax.random.normal(ks[5], (n_embd, H), jnp.float32),
        "b1": s * jax.random.normal(ks[6], (1, H), jnp.float32),
        "w2": s * jax.random.normal(ks[7], (H, n_embd), jnp.float32),
        "b2": s * jax.random.normal(ks[8], (1, n_embd), jnp.float32),
    }


if __name__ == "__main__":
    # Small shapes consistent with the module: (B, T, C) with C = n_embd.
    # C = 128 keeps lanes dense; n_head = 1 is the only shape-consistent config
    # given head_size = n_embd in Block.__init__.
    B, T, n_embd, n_head = 4, 16, 128, 1
    key = jax.random.PRNGKey(0)
    kx, kp = jax.random.split(key)
    x = jax.random.normal(kx, (B, T, n_embd), jnp.float32)
    params = init_params(kp, n_embd, n_head)

    # Reference first (ordering-safe w.r.t. possible x donation via aliasing).
    ref = block_ref(x, params)

    prepared = prepare_block_params(params)      # one-time weight fusion / cast
    out = jax.block_until_ready(block_forward(x, prepared))

    assert out.shape == (B, T, n_embd) and out.dtype == jnp.float32
    max_err = float(jnp.max(jnp.abs(out - ref)))
    # bf16 matmul inputs + approx reciprocal -> slightly looser tolerance.
    assert jnp.allclose(out, ref, atol=1e-2, rtol=1e-2), \
        f"mismatch vs. reference (max abs err {max_err})"
    print("KERNEL_OK")
</pallas_src>

<mosaic_0001>
module attributes {stable_mosaic.version = 11 : i64} {
  func.func @block_kernel(%arg0: i32, %arg1: memref<4x16x128xf32, #tpu.memory_space<vmem>>, %arg2: memref<128x384xbf16, #tpu.memory_space<vmem>>, %arg3: memref<128x128xbf16, #tpu.memory_space<vmem>>, %arg4: memref<1x128xf32, #tpu.memory_space<vmem>>, %arg5: memref<1x128xf32, #tpu.memory_space<vmem>>, %arg6: memref<1x128xf32, #tpu.memory_space<vmem>>, %arg7: memref<1x128xf32, #tpu.memory_space<vmem>>, %arg8: memref<1x128xf32, #tpu.memory_space<vmem>>, %arg9: memref<128x512xbf16, #tpu.memory_space<vmem>>, %arg10: memref<1x512xf32, #tpu.memory_space<vmem>>, %arg11: memref<512x128xbf16, #tpu.memory_space<vmem>>, %arg12: memref<1x128xf32, #tpu.memory_space<vmem>>, %arg13: memref<4x16x128xf32, #tpu.memory_space<vmem>>) attributes {dimension_semantics = [#tpu.dimension_semantics<parallel>], iteration_bounds = array<i64: 1>, scalar_prefetch = 0 : i64, scratch_operands = 0 : i64, tpu.core_type = #tpu.core_type<tc>, window_params = [{transform_indices = @transform_0, window_bounds = array<i64: 4, 16, 128>}, {pipeline_mode = #tpu.pipeline_mode<synchronous>, transform_indices = @transform_1, window_bounds = array<i64: 128, 384>}, {pipeline_mode = #tpu.pipeline_mode<synchronous>, transform_indices = @transform_2, window_bounds = array<i64: 128, 128>}, {pipeline_mode = #tpu.pipeline_mode<synchronous>, transform_indices = @transform_3, window_bounds = array<i64: 1, 128>}, {pipeline_mode = #tpu.pipeline_mode<synchronous>, transform_indices = @transform_4, window_bounds = array<i64: 1, 128>}, {pipeline_mode = #tpu.pipeline_mode<synchronous>, transform_indices = @transform_5, window_bounds = array<i64: 1, 128>}, {pipeline_mode = #tpu.pipeline_mode<synchronous>, transform_indices = @transform_6, window_bounds = array<i64: 1, 128>}, {pipeline_mode = #tpu.pipeline_mode<synchronous>, transform_indices = @transform_7, window_bounds = array<i64: 1, 128>}, {pipeline_mode = #tpu.pipeline_mode<synchronous>, transform_indices = @transform_8, window_bounds = array<i64: 128, 512>}, {pipeline_mode = #tpu.pipeline_mode<synchronous>, transform_indices = @transform_9, window_bounds = array<i64: 1, 512>}, {pipeline_mode = #tpu.pipeline_mode<synchronous>, transform_indices = @transform_10, window_bounds = array<i64: 512, 128>}, {pipeline_mode = #tpu.pipeline_mode<synchronous>, transform_indices = @transform_11, window_bounds = array<i64: 1, 128>}, {transform_indices = @transform_12, window_bounds = array<i64: 4, 16, 128>}]} {
    %c0 = arith.constant 0 : index
    %c0_0 = arith.constant 0 : index
    %c0_1 = arith.constant 0 : index
    %0 = vector.load %arg1[%c0, %c0_0, %c0_1] : memref<4x16x128xf32, #tpu.memory_space<vmem>>, vector<4x16x128xf32>
    %1 = vector.shape_cast %0 : vector<4x16x128xf32> to vector<64x128xf32>
    %c0_2 = arith.constant 0 : index
    %c0_3 = arith.constant 0 : index
    %2 = vector.load %arg5[%c0_2, %c0_3] : memref<1x128xf32, #tpu.memory_space<vmem>>, vector<1x128xf32>
    %3 = vector.shape_cast %2 : vector<1x128xf32> to vector<128xf32>
    %c0_4 = arith.constant 0 : index
    %c0_5 = arith.constant 0 : index
    %4 = vector.load %arg6[%c0_4, %c0_5] : memref<1x128xf32, #tpu.memory_space<vmem>>, vector<1x128xf32>
    %5 = vector.shape_cast %4 : vector<1x128xf32> to vector<128xf32>
    %cst = arith.constant dense<0.000000e+00> : vector<64xf32>
    %6 = vector.multi_reduction <add>, %1, %cst [1] : vector<64x128xf32> to vector<64xf32>
    %7 = vector.shape_cast %6 : vector<64xf32> to vector<64x1xf32>
    %cst_6 = arith.constant 1.280000e+02 : f32
    %8 = vector.broadcast %cst_6 : f32 to vector<64x1xf32>
    %9 = arith.divf %7, %8 : vector<64x1xf32>
    %10 = vector.broadcast %9 : vector<64x1xf32> to vector<64x128xf32>
    %11 = arith.subf %1, %10 : vector<64x128xf32>
    %12 = arith.mulf %11, %11 : vector<64x128xf32>
    %cst_7 = arith.constant dense<0.000000e+00> : vector<64xf32>
    %13 = vector.multi_reduction <add>, %12, %cst_7 [1] : vector<64x128xf32> to vector<64xf32>
    %14 = vector.shape_cast %13 : vector<64xf32> to vector<64x1xf32>
    %cst_8 = arith.constant 1.280000e+02 : f32
    %15 = vector.broadcast %cst_8 : f32 to vector<64x1xf32>
    %16 = arith.divf %14, %15 : vector<64x1xf32>
    %17 = vector.broadcast %9 : vector<64x1xf32> to vector<64x128xf32>
    %18 = arith.subf %1, %17 : vector<64x128xf32>
    %cst_9 = arith.constant 9.99999974E-6 : f32
    %19 = vector.broadcast %cst_9 : f32 to vector<64x1xf32>
    %20 = arith.addf %16, %19 : vector<64x1xf32>
    %21 = math.rsqrt %20 : vector<64x1xf32>
    %22 = vector.broadcast %21 : vector<64x1xf32> to vector<64x128xf32>
    %23 = arith.mulf %18, %22 : vector<64x128xf32>
    %24 = vector.shape_cast %3 : vector<128xf32> to vector<1x128xf32>
    %25 = vector.broadcast %24 : vector<1x128xf32> to vector<64x128xf32>
    %26 = arith.mulf %23, %25 : vector<64x128xf32>
    %27 = vector.shape_cast %5 : vector<128xf32> to vector<1x128xf32>
    %28 = vector.broadcast %27 : vector<1x128xf32> to vector<64x128xf32>
    %29 = arith.addf %26, %28 : vector<64x128xf32>
    %30 = arith.truncf %29 : vector<64x128xf32> to vector<64x128xbf16>
    %c0_10 = arith.constant 0 : index
    %c0_11 = arith.constant 0 : index
    %31 = vector.load %arg2[%c0_10, %c0_11] : memref<128x384xbf16, #tpu.memory_space<vmem>>, vector<128x384xbf16>
    %cst_12 = arith.constant dense<0.000000e+00> : vector<64x384xf32>
    %32 = tpu.matmul %30, %31, %cst_12 {dimension_numbers = #tpu.dot_dimension_numbers<[1], [0], [0], [1], [0, 0, 1, 1], [], []>} : vector<64x128xbf16>, vector<128x384xbf16>, vector<64x384xf32> -> vector<64x384xf32>
    %33 = arith.truncf %32 : vector<64x384xf32> to vector<64x384xbf16>
    %34 = tpu.iota {dimensions = array<i32: 1>} : vector<1x16x16xi32>
    %35 = tpu.iota {dimensions = array<i32: 2>} : vector<1x16x16xi32>
    %36 = arith.cmpi sge, %34, %35 : vector<1x16x16xi32>
    %37 = vector.extract_strided_slice %33 {offsets = [0, 0], sizes = [64, 128], strides = [1, 1]} : vector<64x384xbf16> to vector<64x128xbf16>
    %38 = vector.shape_cast %37 : vector<64x128xbf16> to vector<4x16x128xbf16>
    %39 = vector.extract_strided_slice %33 {offsets = [0, 128], sizes = [64, 128], strides = [1, 1]} : vector<64x384xbf16> to vector<64x128xbf16>
    %40 = vector.shape_cast %39 : vector<64x128xbf16> to vector<4x16x128xbf16>
    %41 = vector.extract_strided_slice %33 {offsets = [0, 256], sizes = [64, 128], strides = [1, 1]} : vector<64x384xbf16> to vector<64x128xbf16>
    %42 = vector.shape_cast %41 : vector<64x128xbf16> to vector<4x16x128xbf16>
    "tpu.trace_start"() <{level = 10 : i32, message = "bqd,bkd->bqk"}> : () -> ()
    %cst_13 = arith.constant dense<0.000000e+00> : vector<4x16x16xf32>
    %43 = tpu.matmul %38, %40, %cst_13 {dimension_numbers = #tpu.dot_dimension_numbers<[2], [2], [1], [1], [0, 0, 0, 1, 1, 1], [0], [0]>} : vector<4x16x128xbf16>, vector<4x16x128xbf16>, vector<4x16x16xf32> -> vector<4x16x16xf32>
    %cst_14 = arith.constant -1.000000e+30 : f32
    "tpu.trace_stop"() : () -> ()
    %44 = vector.shape_cast %36 : vector<1x16x16xi1> to vector<1x16x16xi1>
    %45 = vector.broadcast %44 : vector<1x16x16xi1> to vector<4x16x16xi1>
    %46 = vector.broadcast %cst_14 : f32 to vector<4x16x16xf32>
    %47 = arith.select %45, %43, %46 : vector<4x16x16xi1>, vector<4x16x16xf32>
    %cst_15 = arith.constant dense<0xFF800000> : vector<4x16xf32>
    %48 = vector.multi_reduction <maximumf>, %47, %cst_15 [2] : vector<4x16x16xf32> to vector<4x16xf32>
    %49 = vector.shape_cast %48 : vector<4x16xf32> to vector<4x16x1xf32>
    %50 = vector.broadcast %49 : vector<4x16x1xf32> to vector<4x16x16xf32>
    %51 = arith.subf %47, %50 : vector<4x16x16xf32>
    %52 = math.exp %51 : vector<4x16x16xf32>
    %cst_16 = arith.constant dense<0.000000e+00> : vector<4x16xf32>
    %53 = vector.multi_reduction <add>, %52, %cst_16 [2] : vector<4x16x16xf32> to vector<4x16xf32>
    %54 = vector.shape_cast %53 : vector<4x16xf32> to vector<4x16x1xf32>
    %55 = tpu.reciprocal %54 {approx = true} : vector<4x16x1xf32> -> vector<4x16x1xf32>
    %56 = vector.broadcast %55 : vector<4x16x1xf32> to vector<4x16x16xf32>
    %57 = arith.mulf %52, %56 : vector<4x16x16xf32>
    %58 = arith.truncf %57 : vector<4x16x16xf32> to vector<4x16x16xbf16>
    "tpu.trace_start"() <{level = 10 : i32, message = "bqk,bkd->bqd"}> : () -> ()
    %cst_17 = arith.constant dense<0.000000e+00> : vector<4x16x128xf32>
    %59 = tpu.matmul %58, %42, %cst_17 {dimension_numbers = #tpu.dot_dimension_numbers<[2], [1], [1], [2], [0, 0, 0, 1, 1, 2], [0], [0]>} : vector<4x16x16xbf16>, vector<4x16x128xbf16>, vector<4x16x128xf32> -> vector<4x16x128xf32>
    "tpu.trace_stop"() : () -> ()
    %60 = vector.shape_cast %59 : vector<4x16x128xf32> to vector<64x128xf32>
    %61 = arith.truncf %60 : vector<64x128xf32> to vector<64x128xbf16>
    %c0_18 = arith.constant 0 : index
    %c0_19 = arith.constant 0 : index
    %62 = vector.load %arg3[%c0_18, %c0_19] : memref<128x128xbf16, #tpu.memory_space<vmem>>, vector<128x128xbf16>
    %cst_20 = arith.constant dense<0.000000e+00> : vector<64x128xf32>
    %63 = tpu.matmul %61, %62, %cst_20 {dimension_numbers = #tpu.dot_dimension_numbers<[1], [0], [0], [1], [0, 0, 1, 1], [], []>} : vector<64x128xbf16>, vector<128x128xbf16>, vector<64x128xf32> -> vector<64x128xf32>
    %c0_21 = arith.constant 0 : index
    %c0_22 = arith.constant 0 : index
    %64 = vector.load %arg4[%c0_21, %c0_22] : memref<1x128xf32, #tpu.memory_space<vmem>>, vector<1x128xf32>
    %65 = vector.shape_cast %64 : vector<1x128xf32> to vector<128xf32>
    %66 = vector.shape_cast %65 : vector<128xf32> to vector<1x128xf32>
    %67 = vector.broadcast %66 : vector<1x128xf32> to vector<64x128xf32>
    %68 = arith.addf %63, %67 : vector<64x128xf32>
    %69 = arith.addf %1, %68 : vector<64x128xf32>
    %c0_23 = arith.constant 0 : index
    %c0_24 = arith.constant 0 : index
    %70 = vector.load %arg7[%c0_23, %c0_24] : memref<1x128xf32, #tpu.memory_space<vmem>>, vector<1x128xf32>
    %71 = vector.shape_cast %70 : vector<1x128xf32> to vector<128xf32>
    %c0_25 = arith.constant 0 : index
    %c0_26 = arith.constant 0 : index
    %72 = vector.load %arg8[%c0_25, %c0_26] : memref<1x128xf32, #tpu.memory_space<vmem>>, vector<1x128xf32>
    %73 = vector.shape_cast %72 : vector<1x128xf32> to vector<128xf32>
    %cst_27 = arith.constant dense<0.000000e+00> : vector<64xf32>
    %74 = vector.multi_reduction <add>, %69, %cst_27 [1] : vector<64x128xf32> to vector<64xf32>
    %75 = vector.shape_cast %74 : vector<64xf32> to vector<64x1xf32>
    %cst_28 = arith.constant 1.280000e+02 : f32
    %76 = vector.broadcast %cst_28 : f32 to vector<64x1xf32>
    %77 = arith.divf %75, %76 : vector<64x1xf32>
    %78 = vector.broadcast %77 : vector<64x1xf32> to vector<64x128xf32>
    %79 = arith.subf %69, %78 : vector<64x128xf32>
    %80 = arith.mulf %79, %79 : vector<64x128xf32>
    %cst_29 = arith.constant dense<0.000000e+00> : vector<64xf32>
    %81 = vector.multi_reduction <add>, %80, %cst_29 [1] : vector<64x128xf32> to vector<64xf32>
    %82 = vector.shape_cast %81 : vector<64xf32> to vector<64x1xf32>
    %cst_30 = arith.constant 1.280000e+02 : f32
    %83 = vector.broadcast %cst_30 : f32 to vector<64x1xf32>
    %84 = arith.divf %82, %83 : vector<64x1xf32>
    %85 = vector.broadcast %77 : vector<64x1xf32> to vector<64x128xf32>
    %86 = arith.subf %69, %85 : vector<64x128xf32>
    %cst_31 = arith.constant 9.99999974E-6 : f32
    %87 = vector.broadcast %cst_31 : f32 to vector<64x1xf32>
    %88 = arith.addf %84, %87 : vector<64x1xf32>
    %89 = math.rsqrt %88 : vector<64x1xf32>
    %90 = vector.broadcast %89 : vector<64x1xf32> to vector<64x128xf32>
    %91 = arith.mulf %86, %90 : vector<64x128xf32>
    %92 = vector.shape_cast %71 : vector<128xf32> to vector<1x128xf32>
    %93 = vector.broadcast %92 : vector<1x128xf32> to vector<64x128xf32>
    %94 = arith.mulf %91, %93 : vector<64x128xf32>
    %95 = vector.shape_cast %73 : vector<128xf32> to vector<1x128xf32>
    %96 = vector.broadcast %95 : vector<1x128xf32> to vector<64x128xf32>
    %97 = arith.addf %94, %96 : vector<64x128xf32>
    %98 = arith.truncf %97 : vector<64x128xf32> to vector<64x128xbf16>
    %c0_32 = arith.constant 0 : index
    %c0_33 = arith.constant 0 : index
    %99 = vector.load %arg9[%c0_32, %c0_33] : memref<128x512xbf16, #tpu.memory_space<vmem>>, vector<128x512xbf16>
    %cst_34 = arith.constant dense<0.000000e+00> : vector<64x512xf32>
    %100 = tpu.matmul %98, %99, %cst_34 {dimension_numbers = #tpu.dot_dimension_numbers<[1], [0], [0], [1], [0, 0, 1, 1], [], []>} : vector<64x128xbf16>, vector<128x512xbf16>, vector<64x512xf32> -> vector<64x512xf32>
    %c0_35 = arith.constant 0 : index
    %c0_36 = arith.constant 0 : index
    %101 = vector.load %arg10[%c0_35, %c0_36] : memref<1x512xf32, #tpu.memory_space<vmem>>, vector<1x512xf32>
    %102 = vector.shape_cast %101 : vector<1x512xf32> to vector<512xf32>
    %103 = vector.shape_cast %102 : vector<512xf32> to vector<1x512xf32>
    %104 = vector.broadcast %103 : vector<1x512xf32> to vector<64x512xf32>
    %105 = arith.addf %100, %104 : vector<64x512xf32>
    %cst_37 = arith.constant 0.000000e+00 : f32
    %106 = vector.broadcast %cst_37 : f32 to vector<64x512xf32>
    %107 = arith.maximumf %105, %106 : vector<64x512xf32>
    %108 = arith.truncf %107 : vector<64x512xf32> to vector<64x512xbf16>
    %c0_38 = arith.constant 0 : index
    %c0_39 = arith.constant 0 : index
    %109 = vector.load %arg11[%c0_38, %c0_39] : memref<512x128xbf16, #tpu.memory_space<vmem>>, vector<512x128xbf16>
    %cst_40 = arith.constant dense<0.000000e+00> : vector<64x128xf32>
    %110 = tpu.matmul %108, %109, %cst_40 {dimension_numbers = #tpu.dot_dimension_numbers<[1], [0], [0], [1], [0, 0, 1, 1], [], []>} : vector<64x512xbf16>, vector<512x128xbf16>, vector<64x128xf32> -> vector<64x128xf32>
    %c0_41 = arith.constant 0 : index
    %c0_42 = arith.constant 0 : index
    %111 = vector.load %arg12[%c0_41, %c0_42] : memref<1x128xf32, #tpu.memory_space<vmem>>, vector<1x128xf32>
    %112 = vector.shape_cast %111 : vector<1x128xf32> to vector<128xf32>
    %113 = vector.shape_cast %112 : vector<128xf32> to vector<1x128xf32>
    %114 = vector.broadcast %113 : vector<1x128xf32> to vector<64x128xf32>
    %115 = arith.addf %110, %114 : vector<64x128xf32>
    %116 = arith.addf %69, %115 : vector<64x128xf32>
    %117 = vector.shape_cast %116 : vector<64x128xf32> to vector<4x16x128xf32>
    %c0_43 = arith.constant 0 : index
    %c0_44 = arith.constant 0 : index
    %c0_45 = arith.constant 0 : index
    %118 = vector.load %arg13[%c0_43, %c0_44, %c0_45] : memref<4x16x128xf32, #tpu.memory_space<vmem>>, vector<4x16x128xf32>
    tpu.vector_store %arg13[%c0_43, %c0_44, %c0_45], %117 {strides = array<i32>} : memref<4x16x128xf32, #tpu.memory_space<vmem>>, vector<4x16x128xf32>,
    return
  }
  func.func @transform_0(%arg0: i32) -> (i32, i32, i32) {
    %c0_i32 = arith.constant 0 : i32
    %c0_i32_0 = arith.constant 0 : i32
    %c0_i32_1 = arith.constant 0 : i32
    return %arg0, %c0_i32, %c0_i32_0 : i32, i32, i32
  }
  func.func @transform_1(%arg0: i32) -> (i32, i32) {
    %c0_i32 = arith.constant 0 : i32
    %c0_i32_0 = arith.constant 0 : i32
    %c0_i32_1 = arith.constant 0 : i32
    return %c0_i32, %c0_i32_0 : i32, i32
  }
  func.func @transform_2(%arg0: i32) -> (i32, i32) {
    %c0_i32 = arith.constant 0 : i32
    %c0_i32_0 = arith.constant 0 : i32
    %c0_i32_1 = arith.constant 0 : i32
    return %c0_i32, %c0_i32_0 : i32, i32
  }
  func.func @transform_3(%arg0: i32) -> (i32, i32) {
    %c0_i32 = arith.constant 0 : i32
    %c0_i32_0 = arith.constant 0 : i32
    %c0_i32_1 = arith.constant 0 : i32
    return %c0_i32, %c0_i32_0 : i32, i32
  }
  func.func @transform_4(%arg0: i32) -> (i32, i32) {
    %c0_i32 = arith.constant 0 : i32
    %c0_i32_0 = arith.constant 0 : i32
    %c0_i32_1 = arith.constant 0 : i32
    return %c0_i32, %c0_i32_0 : i32, i32
  }
  func.func @transform_5(%arg0: i32) -> (i32, i32) {
    %c0_i32 = arith.constant 0 : i32
    %c0_i32_0 = arith.constant 0 : i32
    %c0_i32_1 = arith.constant 0 : i32
    return %c0_i32, %c0_i32_0 : i32, i32
  }
  func.func @transform_6(%arg0: i32) -> (i32, i32) {
    %c0_i32 = arith.constant 0 : i32
    %c0_i32_0 = arith.constant 0 : i32
    %c0_i32_1 = arith.constant 0 : i32
    return %c0_i32, %c0_i32_0 : i32, i32
  }
  func.func @transform_7(%arg0: i32) -> (i32, i32) {
    %c0_i32 = arith.constant 0 : i32
    %c0_i32_0 = arith.constant 0 : i32
    %c0_i32_1 = arith.constant 0 : i32
    return %c0_i32, %c0_i32_0 : i32, i32
  }
  func.func @transform_8(%arg0: i32) -> (i32, i32) {
    %c0_i32 = arith.constant 0 : i32
    %c0_i32_0 = arith.constant 0 : i32
    %c0_i32_1 = arith.constant 0 : i32
    return %c0_i32, %c0_i32_0 : i32, i32
  }
  func.func @transform_9(%arg0: i32) -> (i32, i32) {
    %c0_i32 = arith.constant 0 : i32
    %c0_i32_0 = arith.constant 0 : i32
    %c0_i32_1 = arith.constant 0 : i32
    return %c0_i32, %c0_i32_0 : i32, i32
  }
  func.func @transform_10(%arg0: i32) -> (i32, i32) {
    %c0_i32 = arith.constant 0 : i32
    %c0_i32_0 = arith.constant 0 : i32
    %c0_i32_1 = arith.constant 0 : i32
    return %c0_i32, %c0_i32_0 : i32, i32
  }
  func.func @transform_11(%arg0: i32) -> (i32, i32) {
    %c0_i32 = arith.constant 0 : i32
    %c0_i32_0 = arith.constant 0 : i32
    %c0_i32_1 = arith.constant 0 : i32
    return %c0_i32, %c0_i32_0 : i32, i32
  }
  func.func @transform_12(%arg0: i32) -> (i32, i32, i32) {
    %c0_i32 = arith.constant 0 : i32
    %c0_i32_0 = arith.constant 0 : i32
    %c0_i32_1 = arith.constant 0 : i32
    return %arg0, %c0_i32, %c0_i32_0 : i32, i32, i32
  }
}

module attributes {stable_mosaic.version = 11 : i64} {
  func.func @block_kernel(%arg0: i32, %arg1: memref<4x16x128xf32, #tpu.memory_space<vmem>>, %arg2: memref<128x384xbf16, #tpu.memory_space<vmem>>, %arg3: memref<128x128xbf16, #tpu.memory_space<vmem>>, %arg4: memref<1x128xf32, #tpu.memory_space<vmem>>, %arg5: memref<1x128xf32, #tpu.memory_space<vmem>>, %arg6: memref<1x128xf32, #tpu.memory_space<vmem>>, %arg7: memref<1x128xf32, #tpu.memory_space<vmem>>, %arg8: memref<1x128xf32, #tpu.memory_space<vmem>>, %arg9: memref<128x512xbf16, #tpu.memory_space<vmem>>, %arg10: memref<1x512xf32, #tpu.memory_space<vmem>>, %arg11: memref<512x128xbf16, #tpu.memory_space<vmem>>, %arg12: memref<1x128xf32, #tpu.memory_space<vmem>>, %arg13: memref<4x16x128xf32, #tpu.memory_space<vmem>>) attributes {dimension_semantics = [#tpu.dimension_semantics<parallel>], iteration_bounds = array<i64: 1>, scalar_prefetch = 0 : i64, scratch_operands = 0 : i64, tpu.core_type = #tpu.core_type<tc>, window_params = [{transform_indices = @transform_0, window_bounds = array<i64: 4, 16, 128>}, {pipeline_mode = #tpu.pipeline_mode<synchronous>, transform_indices = @transform_1, window_bounds = array<i64: 128, 384>}, {pipeline_mode = #tpu.pipeline_mode<synchronous>, transform_indices = @transform_2, window_bounds = array<i64: 128, 128>}, {pipeline_mode = #tpu.pipeline_mode<synchronous>, transform_indices = @transform_3, window_bounds = array<i64: 1, 128>}, {pipeline_mode = #tpu.pipeline_mode<synchronous>, transform_indices = @transform_4, window_bounds = array<i64: 1, 128>}, {pipeline_mode = #tpu.pipeline_mode<synchronous>, transform_indices = @transform_5, window_bounds = array<i64: 1, 128>}, {pipeline_mode = #tpu.pipeline_mode<synchronous>, transform_indices = @transform_6, window_bounds = array<i64: 1, 128>}, {pipeline_mode = #tpu.pipeline_mode<synchronous>, transform_indices = @transform_7, window_bounds = array<i64: 1, 128>}, {pipeline_mode = #tpu.pipeline_mode<synchronous>, transform_indices = @transform_8, window_bounds = array<i64: 128, 512>}, {pipeline_mode = #tpu.pipeline_mode<synchronous>, transform_indices = @transform_9, window_bounds = array<i64: 1, 512>}, {pipeline_mode = #tpu.pipeline_mode<synchronous>, transform_indices = @transform_10, window_bounds = array<i64: 512, 128>}, {pipeline_mode = #tpu.pipeline_mode<synchronous>, transform_indices = @transform_11, window_bounds = array<i64: 1, 128>}, {transform_indices = @transform_12, window_bounds = array<i64: 4, 16, 128>}]} {
    %c0 = arith.constant 0 : index
    %c0_0 = arith.constant 0 : index
    %c0_1 = arith.constant 0 : index
    %0 = vector.load %arg1[%c0, %c0_0, %c0_1] : memref<4x16x128xf32, #tpu.memory_space<vmem>>, vector<4x16x128xf32>
    %1 = vector.shape_cast %0 : vector<4x16x128xf32> to vector<64x128xf32>
    %c0_2 = arith.constant 0 : index
    %c0_3 = arith.constant 0 : index
    %2 = vector.load %arg5[%c0_2, %c0_3] : memref<1x128xf32, #tpu.memory_space<vmem>>, vector<1x128xf32>
    %3 = vector.shape_cast %2 : vector<1x128xf32> to vector<128xf32>
    %c0_4 = arith.constant 0 : index
    %c0_5 = arith.constant 0 : index
    %4 = vector.load %arg6[%c0_4, %c0_5] : memref<1x128xf32, #tpu.memory_space<vmem>>, vector<1x128xf32>
    %5 = vector.shape_cast %4 : vector<1x128xf32> to vector<128xf32>
    %cst = arith.constant dense<0.000000e+00> : vector<64xf32>
    %6 = vector.multi_reduction <add>, %1, %cst [1] : vector<64x128xf32> to vector<64xf32>
    %7 = vector.shape_cast %6 : vector<64xf32> to vector<64x1xf32>
    %cst_6 = arith.constant 1.280000e+02 : f32
    %8 = vector.broadcast %cst_6 : f32 to vector<64x1xf32>
    %9 = arith.divf %7, %8 : vector<64x1xf32>
    %10 = vector.broadcast %9 : vector<64x1xf32> to vector<64x128xf32>
    %11 = arith.subf %1, %10 : vector<64x128xf32>
    %12 = arith.mulf %11, %11 : vector<64x128xf32>
    %cst_7 = arith.constant dense<0.000000e+00> : vector<64xf32>
    %13 = vector.multi_reduction <add>, %12, %cst_7 [1] : vector<64x128xf32> to vector<64xf32>
    %14 = vector.shape_cast %13 : vector<64xf32> to vector<64x1xf32>
    %cst_8 = arith.constant 1.280000e+02 : f32
    %15 = vector.broadcast %cst_8 : f32 to vector<64x1xf32>
    %16 = arith.divf %14, %15 : vector<64x1xf32>
    %17 = vector.broadcast %9 : vector<64x1xf32> to vector<64x128xf32>
    %18 = arith.subf %1, %17 : vector<64x128xf32>
    %cst_9 = arith.constant 9.99999974E-6 : f32
    %19 = vector.broadcast %cst_9 : f32 to vector<64x1xf32>
    %20 = arith.addf %16, %19 : vector<64x1xf32>
    %21 = math.rsqrt %20 : vector<64x1xf32>
    %22 = vector.broadcast %21 : vector<64x1xf32> to vector<64x128xf32>
    %23 = arith.mulf %18, %22 : vector<64x128xf32>
    %24 = vector.shape_cast %3 : vector<128xf32> to vector<1x128xf32>
    %25 = vector.broadcast %24 : vector<1x128xf32> to vector<64x128xf32>
    %26 = arith.mulf %23, %25 : vector<64x128xf32>
    %27 = vector.shape_cast %5 : vector<128xf32> to vector<1x128xf32>
    %28 = vector.broadcast %27 : vector<1x128xf32> to vector<64x128xf32>
    %29 = arith.addf %26, %28 : vector<64x128xf32>
    %30 = arith.truncf %29 : vector<64x128xf32> to vector<64x128xbf16>
    %c0_10 = arith.constant 0 : index
    %c0_11 = arith.constant 0 : index
    %31 = vector.load %arg2[%c0_10, %c0_11] : memref<128x384xbf16, #tpu.memory_space<vmem>>, vector<128x384xbf16>
    %cst_12 = arith.constant dense<0.000000e+00> : vector<64x384xf32>
    %32 = tpu.matmul %30, %31, %cst_12 {dimension_numbers = #tpu.dot_dimension_numbers<[1], [0], [0], [1], [0, 0, 1, 1], [], []>} : vector<64x128xbf16>, vector<128x384xbf16>, vector<64x384xf32> -> vector<64x384xf32>
    %33 = arith.truncf %32 : vector<64x384xf32> to vector<64x384xbf16>
    %34 = tpu.iota {dimensions = array<i32: 1>} : vector<1x16x16xi32>
    %35 = tpu.iota {dimensions = array<i32: 2>} : vector<1x16x16xi32>
    %36 = arith.cmpi sge, %34, %35 : vector<1x16x16xi32>
    %37 = vector.extract_strided_slice %33 {offsets = [0, 0], sizes = [64, 128], strides = [1, 1]} : vector<64x384xbf16> to vector<64x128xbf16>
    %38 = vector.shape_cast %37 : vector<64x128xbf16> to vector<4x16x128xbf16>
    %39 = vector.extract_strided_slice %33 {offsets = [0, 128], sizes = [64, 128], strides = [1, 1]} : vector<64x384xbf16> to vector<64x128xbf16>
    %40 = vector.shape_cast %39 : vector<64x128xbf16> to vector<4x16x128xbf16>
    %41 = vector.extract_strided_slice %33 {offsets = [0, 256], sizes = [64, 128], strides = [1, 1]} : vector<64x384xbf16> to vector<64x128xbf16>
    %42 = vector.shape_cast %41 : vector<64x128xbf16> to vector<4x16x128xbf16>
    "tpu.trace_start"() <{level = 10 : i32, message = "bqd,bkd->bqk"}> : () -> ()
    %cst_13 = arith.constant dense<0.000000e+00> : vector<4x16x16xf32>
    %43 = tpu.matmul %38, %40, %cst_13 {dimension_numbers = #tpu.dot_dimension_numbers<[2], [2], [1], [1], [0, 0, 0, 1, 1, 1], [0], [0]>} : vector<4x16x128xbf16>, vector<4x16x128xbf16>, vector<4x16x16xf32> -> vector<4x16x16xf32>
    %cst_14 = arith.constant -1.000000e+30 : f32
    "tpu.trace_stop"() : () -> ()
    %44 = vector.shape_cast %36 : vector<1x16x16xi1> to vector<1x16x16xi1>
    %45 = vector.broadcast %44 : vector<1x16x16xi1> to vector<4x16x16xi1>
    %46 = vector.broadcast %cst_14 : f32 to vector<4x16x16xf32>
    %47 = arith.select %45, %43, %46 : vector<4x16x16xi1>, vector<4x16x16xf32>
    %cst_15 = arith.constant dense<0xFF800000> : vector<4x16xf32>
    %48 = vector.multi_reduction <maximumf>, %47, %cst_15 [2] : vector<4x16x16xf32> to vector<4x16xf32>
    %49 = vector.shape_cast %48 : vector<4x16xf32> to vector<4x16x1xf32>
    %50 = vector.broadcast %49 : vector<4x16x1xf32> to vector<4x16x16xf32>
    %51 = arith.subf %47, %50 : vector<4x16x16xf32>
    %52 = math.exp %51 : vector<4x16x16xf32>
    %cst_16 = arith.constant dense<0.000000e+00> : vector<4x16xf32>
    %53 = vector.multi_reduction <add>, %52, %cst_16 [2] : vector<4x16x16xf32> to vector<4x16xf32>
    %54 = vector.shape_cast %53 : vector<4x16xf32> to vector<4x16x1xf32>
    %55 = tpu.reciprocal %54 {approx = true} : vector<4x16x1xf32> -> vector<4x16x1xf32>
    %56 = vector.broadcast %55 : vector<4x16x1xf32> to vector<4x16x16xf32>
    %57 = arith.mulf %52, %56 : vector<4x16x16xf32>
    %58 = arith.truncf %57 : vector<4x16x16xf32> to vector<4x16x16xbf16>
    "tpu.trace_start"() <{level = 10 : i32, message = "bqk,bkd->bqd"}> : () -> ()
    %cst_17 = arith.constant dense<0.000000e+00> : vector<4x16x128xf32>
    %59 = tpu.matmul %58, %42, %cst_17 {dimension_numbers = #tpu.dot_dimension_numbers<[2], [1], [1], [2], [0, 0, 0, 1, 1, 2], [0], [0]>} : vector<4x16x16xbf16>, vector<4x16x128xbf16>, vector<4x16x128xf32> -> vector<4x16x128xf32>
    "tpu.trace_stop"() : () -> ()
    %60 = vector.shape_cast %59 : vector<4x16x128xf32> to vector<64x128xf32>
    %61 = arith.truncf %60 : vector<64x128xf32> to vector<64x128xbf16>
    %c0_18 = arith.constant 0 : index
    %c0_19 = arith.constant 0 : index
    %62 = vector.load %arg3[%c0_18, %c0_19] : memref<128x128xbf16, #tpu.memory_space<vmem>>, vector<128x128xbf16>
    %cst_20 = arith.constant dense<0.000000e+00> : vector<64x128xf32>
    %63 = tpu.matmul %61, %62, %cst_20 {dimension_numbers = #tpu.dot_dimension_numbers<[1], [0], [0], [1], [0, 0, 1, 1], [], []>} : vector<64x128xbf16>, vector<128x128xbf16>, vector<64x128xf32> -> vector<64x128xf32>
    %c0_21 = arith.constant 0 : index
    %c0_22 = arith.constant 0 : index
    %64 = vector.load %arg4[%c0_21, %c0_22] : memref<1x128xf32, #tpu.memory_space<vmem>>, vector<1x128xf32>
    %65 = vector.shape_cast %64 : vector<1x128xf32> to vector<128xf32>
    %66 = vector.shape_cast %65 : vector<128xf32> to vector<1x128xf32>
    %67 = vector.broadcast %66 : vector<1x128xf32> to vector<64x128xf32>
    %68 = arith.addf %63, %67 : vector<64x128xf32>
    %69 = arith.addf %1, %68 : vector<64x128xf32>
    %c0_23 = arith.constant 0 : index
    %c0_24 = arith.constant 0 : index
    %70 = vector.load %arg7[%c0_23, %c0_24] : memref<1x128xf32, #tpu.memory_space<vmem>>, vector<1x128xf32>
    %71 = vector.shape_cast %70 : vector<1x128xf32> to vector<128xf32>
    %c0_25 = arith.constant 0 : index
    %c0_26 = arith.constant 0 : index
    %72 = vector.load %arg8[%c0_25, %c0_26] : memref<1x128xf32, #tpu.memory_space<vmem>>, vector<1x128xf32>
    %73 = vector.shape_cast %72 : vector<1x128xf32> to vector<128xf32>
    %cst_27 = arith.constant dense<0.000000e+00> : vector<64xf32>
    %74 = vector.multi_reduction <add>, %69, %cst_27 [1] : vector<64x128xf32> to vector<64xf32>
    %75 = vector.shape_cast %74 : vector<64xf32> to vector<64x1xf32>
    %cst_28 = arith.constant 1.280000e+02 : f32
    %76 = vector.broadcast %cst_28 : f32 to vector<64x1xf32>
    %77 = arith.divf %75, %76 : vector<64x1xf32>
    %78 = vector.broadcast %77 : vector<64x1xf32> to vector<64x128xf32>
    %79 = arith.subf %69, %78 : vector<64x128xf32>
    %80 = arith.mulf %79, %79 : vector<64x128xf32>
    %cst_29 = arith.constant dense<0.000000e+00> : vector<64xf32>
    %81 = vector.multi_reduction <add>, %80, %cst_29 [1] : vector<64x128xf32> to vector<64xf32>
    %82 = vector.shape_cast %81 : vector<64xf32> to vector<64x1xf32>
    %cst_30 = arith.constant 1.280000e+02 : f32
    %83 = vector.broadcast %cst_30 : f32 to vector<64x1xf32>
    %84 = arith.divf %82, %83 : vector<64x1xf32>
    %85 = vector.broadcast %77 : vector<64x1xf32> to vector<64x128xf32>
    %86 = arith.subf %69, %85 : vector<64x128xf32>
    %cst_31 = arith.constant 9.99999974E-6 : f32
    %87 = vector.broadcast %cst_31 : f32 to vector<64x1xf32>
    %88 = arith.addf %84, %87 : vector<64x1xf32>
    %89 = math.rsqrt %88 : vector<64x1xf32>
    %90 = vector.broadcast %89 : vector<64x1xf32> to vector<64x128xf32>
    %91 = arith.mulf %86, %90 : vector<64x128xf32>
    %92 = vector.shape_cast %71 : vector<128xf32> to vector<1x128xf32>
    %93 = vector.broadcast %92 : vector<1x128xf32> to vector<64x128xf32>
    %94 = arith.mulf %91, %93 : vector<64x128xf32>
    %95 = vector.shape_cast %73 : vector<128xf32> to vector<1x128xf32>
    %96 = vector.broadcast %95 : vector<1x128xf32> to vector<64x128xf32>
    %97 = arith.addf %94, %96 : vector<64x128xf32>
    %98 = arith.truncf %97 : vector<64x128xf32> to vector<64x128xbf16>
    %c0_32 = arith.constant 0 : index
    %c0_33 = arith.constant 0 : index
    %99 = vector.load %arg9[%c0_32, %c0_33] : memref<128x512xbf16, #tpu.memory_space<vmem>>, vector<128x512xbf16>
    %cst_34 = arith.constant dense<0.000000e+00> : vector<64x512xf32>
    %100 = tpu.matmul %98, %99, %cst_34 {dimension_numbers = #tpu.dot_dimension_numbers<[1], [0], [0], [1], [0, 0, 1, 1], [], []>} : vector<64x128xbf16>, vector<128x512xbf16>, vector<64x512xf32> -> vector<64x512xf32>
    %c0_35 = arith.constant 0 : index
    %c0_36 = arith.constant 0 : index
    %101 = vector.load %arg10[%c0_35, %c0_36] : memref<1x512xf32, #tpu.memory_space<vmem>>, vector<1x512xf32>
    %102 = vector.shape_cast %101 : vector<1x512xf32> to vector<512xf32>
    %103 = vector.shape_cast %102 : vector<512xf32> to vector<1x512xf32>
    %104 = vector.broadcast %103 : vector<1x512xf32> to vector<64x512xf32>
    %105 = arith.addf %100, %104 : vector<64x512xf32>
    %cst_37 = arith.constant 0.000000e+00 : f32
    %106 = vector.broadcast %cst_37 : f32 to vector<64x512xf32>
    %107 = arith.maximumf %105, %106 : vector<64x512xf32>
    %108 = arith.truncf %107 : vector<64x512xf32> to vector<64x512xbf16>
    %c0_38 = arith.constant 0 : index
    %c0_39 = arith.constant 0 : index
    %109 = vector.load %arg11[%c0_38, %c0_39] : memref<512x128xbf16, #tpu.memory_space<vmem>>, vector<512x128xbf16>
    %cst_40 = arith.constant dense<0.000000e+00> : vector<64x128xf32>
    %110 = tpu.matmul %108, %109, %cst_40 {dimension_numbers = #tpu.dot_dimension_numbers<[1], [0], [0], [1], [0, 0, 1, 1], [], []>} : vector<64x512xbf16>, vector<512x128xbf16>, vector<64x128xf32> -> vector<64x128xf32>
    %c0_41 = arith.constant 0 : index
    %c0_42 = arith.constant 0 : index
    %111 = vector.load %arg12[%c0_41, %c0_42] : memref<1x128xf32, #tpu.memory_space<vmem>>, vector<1x128xf32>
    %112 = vector.shape_cast %111 : vector<1x128xf32> to vector<128xf32>
    %113 = vector.shape_cast %112 : vector<128xf32> to vector<1x128xf32>
    %114 = vector.broadcast %113 : vector<1x128xf32> to vector<64x128xf32>
    %115 = arith.addf %110, %114 : vector<64x128xf32>
    %116 = arith.addf %69, %115 : vector<64x128xf32>
    %117 = vector.shape_cast %116 : vector<64x128xf32> to vector<4x16x128xf32>
    %c0_43 = arith.constant 0 : index
    %c0_44 = arith.constant 0 : index
    %c0_45 = arith.constant 0 : index
    %118 = vector.load %arg13[%c0_43, %c0_44, %c0_45] : memref<4x16x128xf32, #tpu.memory_space<vmem>>, vector<4x16x128xf32>
    tpu.vector_store %arg13[%c0_43, %c0_44, %c0_45], %117 {strides = array<i32>} : memref<4x16x128xf32, #tpu.memory_space<vmem>>, vector<4x16x128xf32>,
    return
  }
  func.func @transform_0(%arg0: i32) -> (i32, i32, i32) {
    %c0_i32 = arith.constant 0 : i32
    %c0_i32_0 = arith.constant 0 : i32
    %c0_i32_1 = arith.constant 0 : i32
    return %arg0, %c0_i32, %c0_i32_0 : i32, i32, i32
  }
  func.func @transform_1(%arg0: i32) -> (i32, i32) {
    %c0_i32 = arith.constant 0 : i32
    %c0_i32_0 = arith.constant 0 : i32
    %c0_i32_1 = arith.constant 0 : i32
    return %c0_i32, %c0_i32_0 : i32, i32
  }
  func.func @transform_2(%arg0: i32) -> (i32, i32) {
    %c0_i32 = arith.constant 0 : i32
    %c0_i32_0 = arith.constant 0 : i32
    %c0_i32_1 = arith.constant 0 : i32
    return %c0_i32, %c0_i32_0 : i32, i32
  }
  func.func @transform_3(%arg0: i32) -> (i32, i32) {
    %c0_i32 = arith.constant 0 : i32
    %c0_i32_0 = arith.constant 0 : i32
    %c0_i32_1 = arith.constant 0 : i32
    return %c0_i32, %c0_i32_0 : i32, i32
  }
  func.func @transform_4(%arg0: i32) -> (i32, i32) {
    %c0_i32 = arith.constant 0 : i32
    %c0_i32_0 = arith.constant 0 : i32
    %c0_i32_1 = arith.constant 0 : i32
    return %c0_i32, %c0_i32_0 : i32, i32
  }
  func.func @transform_5(%arg0: i32) -> (i32, i32) {
    %c0_i32 = arith.constant 0 : i32
    %c0_i32_0 = arith.constant 0 : i32
    %c0_i32_1 = arith.constant 0 : i32
    return %c0_i32, %c0_i32_0 : i32, i32
  }
  func.func @transform_6(%arg0: i32) -> (i32, i32) {
    %c0_i32 = arith.constant 0 : i32
    %c0_i32_0 = arith.constant 0 : i32
    %c0_i32_1 = arith.constant 0 : i32
    return %c0_i32, %c0_i32_0 : i32, i32
  }
  func.func @transform_7(%arg0: i32) -> (i32, i32) {
    %c0_i32 = arith.constant 0 : i32
    %c0_i32_0 = arith.constant 0 : i32
    %c0_i32_1 = arith.constant 0 : i32
    return %c0_i32, %c0_i32_0 : i32, i32
  }
  func.func @transform_8(%arg0: i32) -> (i32, i32) {
    %c0_i32 = arith.constant 0 : i32
    %c0_i32_0 = arith.constant 0 : i32
    %c0_i32_1 = arith.constant 0 : i32
    return %c0_i32, %c0_i32_0 : i32, i32
  }
  func.func @transform_9(%arg0: i32) -> (i32, i32) {
    %c0_i32 = arith.constant 0 : i32
    %c0_i32_0 = arith.constant 0 : i32
    %c0_i32_1 = arith.constant 0 : i32
    return %c0_i32, %c0_i32_0 : i32, i32
  }
  func.func @transform_10(%arg0: i32) -> (i32, i32) {
    %c0_i32 = arith.constant 0 : i32
    %c0_i32_0 = arith.constant 0 : i32
    %c0_i32_1 = arith.constant 0 : i32
    return %c0_i32, %c0_i32_0 : i32, i32
  }
  func.func @transform_11(%arg0: i32) -> (i32, i32) {
    %c0_i32 = arith.constant 0 : i32
    %c0_i32_0 = arith.constant 0 : i32
    %c0_i32_1 = arith.constant 0 : i32
    return %c0_i32, %c0_i32_0 : i32, i32
  }
  func.func @transform_12(%arg0: i32) -> (i32, i32, i32) {
    %c0_i32 = arith.constant 0 : i32
    %c0_i32_0 = arith.constant 0 : i32
    %c0_i32_1 = arith.constant 0 : i32
    return %arg0, %c0_i32, %c0_i32_0 : i32, i32, i32
  }
}

</mosaic_0001>

<bundles_post_ra>
// kernel: tpu_custom_call.1
= control target key start
LH: loop header
LB: loop body
LE: loop exit
PB: predicated region body
PF: predicated region fallthrough
CT: control target
= control target key end

     0   :  { %17 = vsyncpa [#allocation3], 0  ;;  %s3160_s0 = inlined_call_operand.hbm [shape: f32[4,16,128], index: 0, kind: input, shape index: {}, may-alias: {0,12}]   ;;  %s3161_s1 = inlined_call_operand.hbm [shape: bf16[128,384], index: 1, kind: input, shape index: {}]   ;;  %s3162_s2 = inlined_call_operand.vmem [shape: bf16[128,128], index: 2, kind: input, shape index: {}]   ;;  %s3163_s3 = inlined_call_operand.vmem [shape: f32[1,128], index: 3, kind: input, shape index: {}]   ;;  %s3164_s4 = inlined_call_operand.vmem [shape: f32[1,128], index: 4, kind: input, shape index: {}]   ;;  %s3165_s5 = inlined_call_operand.vmem [shape: f32[1,128], index: 5, kind: input, shape index: {}]   ;;  %s3166_s6 = inlined_call_operand.vmem [shape: f32[1,128], index: 6, kind: input, shape index: {}]   ;;  %s3167_s7 = inlined_call_operand.vmem [shape: f32[1,128], index: 7, kind: input, shape index: {}]   ;;  %s3168_s8 = inlined_call_operand.hbm [shape: bf16[128,512], index: 8, kind: input, shape index: {}]   ;;  %s3169_s9 = inlined_call_operand.vmem [shape: f32[1,512], index: 9, kind: input, shape index: {}]   ;;  %s3170_s10 = inlined_call_operand.hbm [shape: bf16[512,128], index: 10, kind: input, shape index: {}]   ;;  %s3171_s11 = inlined_call_operand.vmem [shape: f32[1,128], index: 11, kind: input, shape index: {}]   ;;  %s3172_s12 = inlined_call_operand.hbm [shape: f32[4,16,128], index: 12, kind: output, shape index: {}, may-alias: {0,12}]  }
   0x1   :  { %18 = vsyncpa [#allocation6], 0 }
   0x2   :  { %19 = vsyncpa [#allocation9], 0  ;;  %s38_s23 = sshll.u32 %s3161_s1, 4  ;;  %s39_s23 = int_to_ptr.hbm [resolvable:$true] %s38_s23 }
   0x3   :  { %20 = vsyncpa [#allocation4], 0  ;;  %s2694_s24 = smov [#allocation5]   ;;  %s25_s28 = sshll.u32 %s3160_s0, 4  ;;  %s26_s28 = int_to_ptr.hbm [resolvable:$true] %s25_s28 }
   0x4   :  { %s40_s25 = sshll.u32 %s2694_s24, 4  ;;  %s2695_s29 = smov 192   ;;  %s41_s25 = int_to_ptr.vmem [resolvable:$true] %s40_s25 }
   0x5   :  { %s2696_s30 = smov 12   ;;  %s2697_s13 = smov [#allocation2]  }
   0x6   :  { %46 = dma.hbm_to_vmem [thread:$0]  %s39_s23, 3072, %s41_s25, [#allocation6], %s2695_s29, %s2695_s29, %s2696_s30  }
   0x7   :  { %s27_s14 = sshll.u32 %s2697_s13, 4  ;;  %s2698_s15 = smov 128   ;;  %s28_s14 = int_to_ptr.vmem [resolvable:$true] %s27_s14 }
   0x8   :  { %s2699_s16 = smov 8   ;;  %s63_s18 = sshll.u32 %s3168_s8, 4  ;;  %s64_s18 = int_to_ptr.hbm [resolvable:$true] %s63_s18 }
   0x9   :  { %33 = dma.hbm_to_vmem [thread:$0]  %s26_s28, 1024, %s28_s14, [#allocation3], %s2698_s15, %s2698_s15, %s2699_s16  }
   0xa   :  { %s2700_s19 = smov [#allocation7]   ;;  %s78_s22 = sshll.u32 %s3170_s10, 4  ;;  %s79_s22 = int_to_ptr.hbm [resolvable:$true] %s78_s22 }
   0xb   :  { %s65_s0 = sshll.u32 %s2700_s19, 4  ;;  %s2701_s23 = smov 256   ;;  %s66_s0 = int_to_ptr.vmem [resolvable:$true] %s65_s0 }
   0xc   :  { %s2702_s24 = smov 16   ;;  %s2703_s25 = smov [#allocation8]  }
   0xd   :  { %71 = dma.hbm_to_vmem [thread:$0]  %s64_s18, 4096, %s66_s0, [#allocation6], %s2701_s23, %s2701_s23, %s2702_s24  }
   0xe   :  { %s80_s26 = sshll.u32 %s2703_s25, 4  ;;  %s2704_s27 = smov 64   ;;  %s81_s26 = int_to_ptr.vmem [resolvable:$true] %s80_s26 }
   0xf   :  { %s2705_s28 = smov 4  }
  0x10   :  { %86 = dma.hbm_to_vmem [thread:$0]  %s79_s22, 4096, %s81_s26, [#allocation9], %s2704_s27, %s2704_s27, %s2705_s28  }
  0x11   :  { %2686 = dma.done.wait [#allocation3], 1024  }
  0x12   :  { %2687 = vsyncadd [#allocation3], 4294966272 }
  0x13   :  { %2688 = dma.done.wait [#allocation6], 7168  }
  0x14   :  { %2689 = vsyncadd [#allocation6], 4294960128 }
  0x15   :  { %2690 = dma.done.wait [#allocation9], 4096  }
  0x16   :  { %2691 = vsyncadd [#allocation9], 4294963200  ;;  %v110_v0 = vld [vmem:[#allocation2 + $0x20] sm:$0xff]  ;;  %v108_v1 = vld [vmem:[#allocation2 + $0x10] sm:$0xff]  ;;  %v2706_v7 = vmov 128.0   ;;  %s1965_s13 = sshll.u32 %s3172_s12, 4  ;;  %s1966_s13 = int_to_ptr.hbm [resolvable:$true] %s1965_s13 }
  0x17   :  { %v106_v2 = vld [vmem:[#allocation2] sm:$0xff]  ;;  %124 = vadd.xlane.f32.xlu2 %v110_v0  ;;  %120 = vadd.xlane.f32.xlu1 %v108_v1  ;;  %v111_v3 = vld [vmem:[#allocation2 + $0x28] sm:$0xff]  ;;  %v109_v4 = vld [vmem:[#allocation2 + $0x18] sm:$0xff]  ;;  %2492 = vrcp.f32 %v2706_v7 }
  0x18   :  { %116 = vadd.xlane.f32.xlu0 %v106_v2  ;;  %v107_v5 = vld [vmem:[#allocation2 + $0x8] sm:$0xff]  ;;  %v112_v6 = vld [vmem:[#allocation2 + $0x30] sm:$0xff]  ;;  %v2805_v30 = vld [vmem:[#allocation2 + $0x38] sm:$0xff] }
  0x19   :  { %v2066_v43 = vld [vmem:[#allocation5 + $0xa8] sm:$0xf]  ;;  %v2390_v44 = vld [vmem:[#allocation5 + $0xb0] sm:$0xf0]  ;;  %v2389_v45 = vld [vmem:[#allocation5 + $0xac] sm:$0xf] }
  0x1a   :  { %v2067_v46 = vor.u32 %v2390_v44, %v2066_v43  ;;  %v2068_v47 = vld [vmem:[#allocation5 + $0xb4] sm:$0xf0]  ;;  %v2074_v48 = vld [vmem:[#allocation5 + $0xb0] sm:$0xf]  ;;  %v2391_v49 = vld [vmem:[#allocation5 + $0xb8] sm:$0xf0] }
  0x1b   :  { %v2071_v50 = vor.u32 %v2389_v45, %v2068_v47  ;;  %v2075_v51 = vor.u32 %v2391_v49, %v2074_v48  ;;  %v2054_v52 = vld [vmem:[#allocation5 + $0x90] sm:$0xf]  ;;  %v2387_v53 = vld [vmem:[#allocation5 + $0x98] sm:$0xf0]  ;;  %v2386_v54 = vld [vmem:[#allocation5 + $0x94] sm:$0xf] }
  0x1c   :  { %469 = vmatpush.bf16.msra.mxu0 %v2067_v46  ;;  %v2055_v55 = vor.u32 %v2387_v53, %v2054_v52  ;;  %v2056_v56 = vld [vmem:[#allocation5 + $0x9c] sm:$0xf0]  ;;  %v2062_v57 = vld [vmem:[#allocation5 + $0x98] sm:$0xf]  ;;  %v2388_v58 = vld [vmem:[#allocation5 + $0xa0] sm:$0xf0] }
  0x1d   :  { %v2493_v8 = vpop.eup %2492  ;;  %498 = vmatpush.bf16.msra.mxu1 %v2071_v50  ;;  %527 = vmatpush.bf16.msra.mxu2 %v2075_v51  ;;  %v2059_v59 = vor.u32 %v2386_v54, %v2056_v56  ;;  %v2063_v60 = vor.u32 %v2388_v58, %v2062_v57  ;;  %v2042_v61 = vld [vmem:[#allocation5 + $0x78] sm:$0xf]  ;;  %v2384_v62 = vld [vmem:[#allocation5 + $0x80] sm:$0xf0]  ;;  %v2383_v63 = vld [vmem:[#allocation5 + $0x7c] sm:$0xf] }
  0x1e   :  { %v133_v9 = vmul.f32 128.0, %v2493_v8  ;;  %vm137_vm0 = vweird.f32 %v2493_v8  ;;  %v2381_v7 = vld [vmem:[#allocation5 + $0x68] sm:$0xf0]  ;;  %v2372_v43 = vld [vmem:[#allocation5 + $0x20] sm:$0xf0] }
  0x1f   :  { %126 = vadd.xlane.f32.xlu2 %v111_v3  ;;  %122 = vadd.xlane.f32.xlu1 %v109_v4  ;;  %v2371_v44 = vld [vmem:[#allocation5 + $0x1c] sm:$0xf]  ;;  %v1996_v46 = vld [vmem:[#allocation5 + $0x24] sm:$0xf0]  ;;  %v2002_v47 = vld [vmem:[#allocation5 + $0x20] sm:$0xf] }
  0x20   :  { %118 = vadd.xlane.f32.xlu0 %v107_v5  ;;  %v134_v10 = vsub.f32 1.0, %v133_v9  ;;  %470 = vmatpush.bf16.msra.mxu0 %v2055_v55  ;;  %v2373_v48 = vld [vmem:[#allocation5 + $0x28] sm:$0xf0]  ;;  %v1999_v50 = vor.u32 %v2371_v44, %v1996_v46  ;;  %v1982_v53 = vld [vmem:[#allocation5] sm:$0xf] }
  0x21   :  { %499 = vmatpush.bf16.msra.mxu1 %v2059_v59  ;;  %528 = vmatpush.bf16.msra.mxu2 %v2063_v60  ;;  %v2003_v51 = vor.u32 %v2373_v48, %v2002_v47  ;;  %v2369_v54 = vld [vmem:[#allocation5 + $0x8] sm:$0xf0]  ;;  %v2368_v55 = vld [vmem:[#allocation5 + $0x4] sm:$0xf]  ;;  %v1984_v58 = vld [vmem:[#allocation5 + $0xc] sm:$0xf0] }
  0x22   :  { %v135_v11 = vmul.f32 %v2493_v8, %v134_v10  ;;  %v2032_v10 = vld [vmem:[#allocation5 + $0x6c] sm:$0xf0]  ;;  %v1983_v57 = vor.u32 %v2369_v54, %v1982_v53  ;;  %v1990_v59 = vld [vmem:[#allocation5 + $0x8] sm:$0xf]  ;;  %v1987_v60 = vor.u32 %v2368_v55, %v1984_v58 }
  0x24   :  { %v136_v12 = vadd.f32 %v2493_v8, %v135_v11  ;;  %v2038_v11 = vld [vmem:[#allocation5 + $0x68] sm:$0xf] }
  0x26   :  { %v2788_v13 = vsel %vm137_vm0, %v2493_v8, %v136_v12  ;;  %v2380_v8 = vld [vmem:[#allocation5 + $0x64] sm:$0xf]  ;;  %v2382_v12 = vld [vmem:[#allocation5 + $0x70] sm:$0xf0] }
  0x27   :  { %128 = vadd.xlane.f32.xlu2 %v112_v6 }
  0x8a   :  { %v125_v14 = vpop.xlane.xlu2 %124  ;;  %v121_v15 = vpop.xlane.xlu1 %120 }
  0x8b   :  { %v117_v16 = vpop.xlane.xlu0 %116  ;;  %v143_v26 = vmul.f32 %v2788_v13, %v125_v14  ;;  %v141_v27 = vmul.f32 %v2788_v13, %v121_v15  ;;  %v2035_v14 = vor.u32 %v2380_v8, %v2032_v10  ;;  %v2039_v15 = vor.u32 %v2382_v12, %v2038_v11 }
  0x8c   :  { %v139_v17 = vmul.f32 %v2788_v13, %v117_v16  ;;  %v2018_v16 = vld [vmem:[#allocation5 + $0x48] sm:$0xf] }
  0x8d   :  { %v2809_v32 = vsub.f32 %v110_v0, %v143_v26  ;;  %v2811_v33 = vsub.f32 %v108_v1, %v141_v27  ;;  %v2043_v0 = vor.u32 %v2384_v62, %v2042_v61  ;;  %v2044_v1 = vld [vmem:[#allocation5 + $0x84] sm:$0xf0]  ;;  %v2006_v27 = vld [vmem:[#allocation5 + $0x30] sm:$0xf]  ;;  %v2370_v61 = vld [vmem:[#allocation5 + $0x10] sm:$0xf0] }
  0x8e   :  { %v2791_v18 = vsub.f32 %v106_v2, %v139_v17  ;;  %v2050_v2 = vld [vmem:[#allocation5 + $0x80] sm:$0xf]  ;;  %v2378_v17 = vld [vmem:[#allocation5 + $0x50] sm:$0xf0]  ;;  %v1991_v62 = vor.u32 %v2370_v61, %v1990_v59 }
  0x8f   :  { %v159_v38 = vmul.f32 %v2809_v32, %v2809_v32  ;;  %v157_v39 = vmul.f32 %v2811_v33, %v2811_v33  ;;  %471 = vmatpush.bf16.msra.mxu0 %v2043_v0 }
  0x90   :  { %v155_v19 = vmul.f32 %v2791_v18, %v2791_v18 }
  0x92   :  { %163 = vadd.xlane.f32.xlu0 %v155_v19  ;;  %v127_v20 = vpop.xlane.xlu2 %126  ;;  %v123_v21 = vpop.xlane.xlu1 %122  ;;  %v2377_v19 = vld [vmem:[#allocation5 + $0x4c] sm:$0xf] }
  0x93   :  { %v142_v22 = vmul.f32 %v2788_v13, %v123_v21  ;;  %v119_v23 = vpop.xlane.xlu0 %118  ;;  %v144_v37 = vmul.f32 %v2788_v13, %v127_v20  ;;  %v2019_v20 = vor.u32 %v2378_v17, %v2018_v16  ;;  %v2020_v21 = vld [vmem:[#allocation5 + $0x54] sm:$0xf0] }
  0x94   :  { %v140_v24 = vmul.f32 %v2788_v13, %v119_v23  ;;  %v2379_v23 = vld [vmem:[#allocation5 + $0x58] sm:$0xf0] }
  0x95   :  { %v2797_v25 = vsub.f32 %v109_v4, %v142_v22  ;;  %v2824_v41 = vsub.f32 %v111_v3, %v144_v37  ;;  %v2385_v3 = vld [vmem:[#allocation5 + $0x88] sm:$0xf0]  ;;  %v2047_v4 = vor.u32 %v2383_v63, %v2044_v1  ;;  %v2026_v22 = vld [vmem:[#allocation5 + $0x50] sm:$0xf]  ;;  %v2014_v37 = vld [vmem:[#allocation5 + $0x38] sm:$0xf] }
  0x96   :  { %v2801_v28 = vsub.f32 %v107_v5, %v140_v24  ;;  %v2051_v5 = vor.u32 %v2385_v3, %v2050_v2  ;;  %v2023_v24 = vor.u32 %v2377_v19, %v2020_v21  ;;  %v2027_v26 = vor.u32 %v2379_v23, %v2026_v22 }
  0x97   :  { %v158_v29 = vmul.f32 %v2797_v25, %v2797_v25  ;;  %v160_v42 = vmul.f32 %v2824_v41, %v2824_v41  ;;  %500 = vmatpush.bf16.msra.mxu1 %v2047_v4 }
  0x98   :  { %v156_v31 = vmul.f32 %v2801_v28, %v2801_v28  ;;  %529 = vmatpush.bf16.msra.mxu2 %v2051_v5 }
  0x99   :  { %169 = vadd.xlane.f32.xlu2 %v158_v29  ;;  %v2375_v29 = vld [vmem:[#allocation5 + $0x38] sm:$0xf0] }
  0x9a   :  { %130 = vadd.xlane.f32.xlu0 %v2805_v30  ;;  %165 = vadd.xlane.f32.xlu1 %v156_v31  ;;  %v129_v34 = vpop.xlane.xlu2 %128  ;;  %v2374_v31 = vld [vmem:[#allocation5 + $0x34] sm:$0xf] }
  0x9b   :  { %v145_v35 = vmul.f32 %v2788_v13, %v129_v34  ;;  %501 = vmatpush.bf16.msra.mxu1 %v2035_v14  ;;  %v2007_v34 = vor.u32 %v2375_v29, %v2006_v27 }
  0x9c   :  { %530 = vmatpush.bf16.msra.mxu2 %v2039_v15 }
  0x9d   :  { %v2815_v36 = vsub.f32 %v112_v6, %v145_v35  ;;  %v2030_v6 = vld [vmem:[#allocation5 + $0x60] sm:$0xf] }
  0x9e   :  { %v2031_v9 = vor.u32 %v2381_v7, %v2030_v6  ;;  %v2008_v35 = vld [vmem:[#allocation5 + $0x3c] sm:$0xf0] }
  0x9f   :  { %v161_v40 = vmul.f32 %v2815_v36, %v2815_v36  ;;  %502 = vmatpush.bf16.msra.mxu1 %v2023_v24 }
  0xa0   :  { %472 = vmatpush.bf16.msra.mxu0 %v2031_v9  ;;  %531 = vmatpush.bf16.msra.mxu2 %v2027_v26 }
  0xa1   :  { %175 = vadd.xlane.f32.xlu2 %v161_v40 }
  0xa2   :  { %171 = vadd.xlane.f32.xlu0 %v159_v38  ;;  %167 = vadd.xlane.f32.xlu1 %v157_v39  ;;  %v2376_v38 = vld [vmem:[#allocation5 + $0x40] sm:$0xf0]  ;;  %v2011_v39 = vor.u32 %v2374_v31, %v2008_v35 }
  0xa3   :  { %v2015_v40 = vor.u32 %v2376_v38, %v2014_v37 }
  0xa4   :  { %473 = vmatpush.bf16.msra.mxu0 %v2019_v20  ;;  %503 = vmatpush.bf16.msra.mxu1 %v2011_v39 }
  0xa5   :  { %532 = vmatpush.bf16.msra.mxu2 %v2015_v40 }
  0xa8   :  { %474 = vmatpush.bf16.msra.mxu0 %v2007_v34  ;;  %504 = vmatpush.bf16.msra.mxu1 %v1999_v50 }
  0xa9   :  { %533 = vmatpush.bf16.msra.mxu2 %v2003_v51 }
  0xaa   :  { %173 = vadd.xlane.f32.xlu1 %v160_v42  ;;  %v1994_v42 = vld [vmem:[#allocation5 + $0x18] sm:$0xf] }
  0xab   :  { %v1995_v45 = vor.u32 %v2372_v43, %v1994_v42 }
  0xac   :  { %505 = vmatpush.bf16.msra.mxu1 %v1987_v60 }
  0xad   :  { %475 = vmatpush.bf16.msra.mxu0 %v1995_v45  ;;  %534 = vmatpush.bf16.msra.mxu2 %v1991_v62  ;;  %v2855_v45 = vld [vmem:[%s3164_s4] ss:$0 sm:$0xff] }
  0xb1   :  { %476 = vmatpush.bf16.msra.mxu0 %v1983_v57 }
 0x105   :  { %v164_v49 = vpop.xlane.xlu0 %163 }
 0x106   :  { %v179_v52 = vmul.f32 %v164_v49, %v2788_v13 }
 0x108   :  { %v187_v56 = vadd.f32 1e-05, %v179_v52 }
 0x10a   :  { %2494 = vrsqrt.f32 %v187_v56  ;;  %vm201_vm2 = vweird.f32 %v187_v56 }
 0x10c   :  { %v170_v63 = vpop.xlane.xlu2 %169 }
 0x10d   :  { %v182_v0 = vmul.f32 %v170_v63, %v2788_v13  ;;  %v166_v1 = vpop.xlane.xlu1 %165  ;;  %v131_v2 = vpop.xlane.xlu0 %130 }
 0x10e   :  { %v180_v3 = vmul.f32 %v166_v1, %v2788_v13  ;;  %v146_v4 = vmul.f32 %v2788_v13, %v131_v2 }
 0x10f   :  { %v2832_v5 = vadd.f32 1e-05, %v182_v0 }
 0x110   :  { %v2495_v6 = vpop.eup %2494  ;;  %v188_v7 = vadd.f32 1e-05, %v180_v3  ;;  %v2835_v8 = vsub.f32 %v2805_v30, %v146_v4 }
 0x111   :  { %v196_v9 = vmul.f32 %v2495_v6, %v187_v56  ;;  %2496 = vrsqrt.f32 %v2832_v5  ;;  %vm202_vm1 = vweird.f32 %v2495_v6  ;;  %vm231_vm9 = vweird.f32 %v2832_v5 }
 0x112   :  { %2498 = vrsqrt.f32 %v188_v7  ;;  %v162_v10 = vmul.f32 %v2835_v8, %v2835_v8  ;;  %vm203_vm3 = vmor %vm201_vm2, %vm202_vm1  ;;  %vm211_vm5 = vweird.f32 %v188_v7 }
 0x113   :  { %v197_v11 = vmul.f32 %v2495_v6, %v196_v9 }
 0x114   :  { %177 = vadd.xlane.f32.xlu0 %v162_v10 }
 0x115   :  { %v198_v12 = vmul.f32 0.5, %v197_v11  ;;  %v168_v14 = vpop.xlane.xlu1 %167  ;;  %v172_v16 = vpop.xlane.xlu0 %171 }
 0x116   :  { %v181_v15 = vmul.f32 %v168_v14, %v2788_v13  ;;  %v183_v22 = vmul.f32 %v172_v16, %v2788_v13 }
 0x117   :  { %v2841_v17 = vpop.eup %2496  ;;  %v199_v19 = vsub.f32 1.5, %v198_v12 }
 0x118   :  { %v2499_v20 = vpop.eup %2498  ;;  %v189_v30 = vadd.f32 1e-05, %v181_v15  ;;  %v226_v24 = vmul.f32 %v2841_v17, %v2832_v5  ;;  %v2846_v29 = vadd.f32 1e-05, %v183_v22  ;;  %vm232_vm10 = vweird.f32 %v2841_v17 }
 0x119   :  { %v206_v21 = vmul.f32 %v2499_v20, %v188_v7  ;;  %v200_v23 = vmul.f32 %v2495_v6, %v199_v19  ;;  %vm212_vm4 = vweird.f32 %v2499_v20  ;;  %vm233_vm12 = vmor %vm231_vm9, %vm232_vm10  ;;  %vm695_vm10 = vcmask 130048  }
 0x11a   :  { %2500 = vrsqrt.f32 %v189_v30  ;;  %v227_v35 = vmul.f32 %v2841_v17, %v226_v24  ;;  %vm213_vm6 = vmor %vm211_vm5, %vm212_vm4  ;;  %vm221_vm7 = vweird.f32 %v189_v30  ;;  %vm241_vm15 = vweird.f32 %v2846_v29 }
 0x11b   :  { %v207_v26 = vmul.f32 %v2499_v20, %v206_v21  ;;  %v204_v34 = vsel %vm203_vm3, %v2495_v6, %v200_v23  ;;  %2502 = vrsqrt.f32 %v2846_v29 }
 0x11c   :  { %v275_v42 = vmul.f32 %v204_v34, %v2791_v18  ;;  %v228_v46 = vmul.f32 0.5, %v227_v35  ;;  %v2862_v18 = vld [vmem:[%s3165_s5] ss:$0 sm:$0xff] }
 0x11d   :  { %v208_v27 = vmul.f32 0.5, %v207_v26  ;;  %v174_v31 = vpop.xlane.xlu1 %173  ;;  %v176_v26 = vpop.xlane.xlu2 %175 }
 0x11e   :  { %v184_v37 = vmul.f32 %v174_v31, %v2788_v13  ;;  %v286_v51 = vmul.f32 %v2855_v45, %v275_v42  ;;  %v229_v52 = vsub.f32 1.5, %v228_v46 }
 0x11f   :  { %v209_v38 = vsub.f32 1.5, %v208_v27  ;;  %v185_v27 = vmul.f32 %v176_v26, %v2788_v13 }
 0x120   :  { %v2501_v39 = vpop.eup %2500  ;;  %v192_v40 = vadd.f32 1e-05, %v184_v37  ;;  %v297_v58 = vadd.f32 %v2862_v18, %v286_v51  ;;  %v230_v59 = vmul.f32 %v2841_v17, %v229_v52 }
 0x121   :  { %v210_v43 = vmul.f32 %v2499_v20, %v209_v38  ;;  %v216_v44 = vmul.f32 %v2501_v39, %v189_v30  ;;  %vm222_vm8 = vweird.f32 %v2501_v39  ;;  %v2503_v54 = vpop.eup %2502 }
 0x122   :  { %2504 = vrsqrt.f32 %v192_v40  ;;  %vm223_vm11 = vmor %vm221_vm7, %vm222_vm8  ;;  %v236_v60 = vmul.f32 %v2503_v54, %v2846_v29  ;;  %v234_v1 = vsel %vm233_vm12, %v2841_v17, %v230_v59  ;;  %vm251_vm13 = vweird.f32 %v192_v40 }
 0x123   :  { %v214_v47 = vsel %vm213_vm6, %v2499_v20, %v210_v43  ;;  %v217_v48 = vmul.f32 %v2501_v39, %v216_v44  ;;  %v278_v5 = vmul.f32 %v234_v1, %v2797_v25  ;;  %vm242_vm0 = vweird.f32 %v2503_v54 }
 0x124   :  { %v276_v49 = vmul.f32 %v214_v47, %v2801_v28  ;;  %v237_v2 = vmul.f32 %v2503_v54, %v236_v60  ;;  %vm243_vm2 = vmor %vm241_vm15, %vm242_vm0  ;;  %v193_v29 = vadd.f32 1e-05, %v185_v27 }
 0x125   :  { %v218_v50 = vmul.f32 0.5, %v217_v48  ;;  %v289_v10 = vmul.f32 %v2855_v45, %v278_v5 }
 0x126   :  { %v287_v53 = vmul.f32 %v2855_v45, %v276_v49  ;;  %v238_v6 = vmul.f32 0.5, %v237_v2  ;;  %2506 = vrsqrt.f32 %v193_v29  ;;  %vm261_vm3 = vweird.f32 %v193_v29 }
 0x127   :  { %v219_v55 = vsub.f32 1.5, %v218_v50 }
 0x128   :  { %v298_v28 = vadd.f32 %v2862_v18, %v287_v53  ;;  %v2505_v56 = vpop.eup %2504  ;;  %v239_v11 = vsub.f32 1.5, %v238_v6 }
 0x129   :  { %v220_v57 = vmul.f32 %v2501_v39, %v219_v55  ;;  %v246_v61 = vmul.f32 %v2505_v56, %v192_v40  ;;  %vm252_vm14 = vweird.f32 %v2505_v56 }
 0x12a   :  { %v305_v62 = vpack.c.bf16 %v298_v28, %v297_v58  ;;  %vm253_vm1 = vmor %vm251_vm13, %vm252_vm14  ;;  %v240_v15 = vmul.f32 %v2503_v54, %v239_v11 }
 0x12b   :  { %v224_v63 = vsel %vm223_vm11, %v2501_v39, %v220_v57  ;;  %v247_v0 = vmul.f32 %v2505_v56, %v246_v61 }
 0x12c   :  { %477 = vmatmul.bf16.vlgmr.msra.gmra.mxu0 %v305_v62  ;;  %506 = vmatmul.bf16.vlgmr.msra.gmra.mxu1 %v305_v62  ;;  %v277_v3 = vmul.f32 %v224_v63, %v2811_v33  ;;  %v300_v33 = vadd.f32 %v2862_v18, %v289_v10  ;;  %v244_v17 = vsel %vm243_vm2, %v2503_v54, %v240_v15 }
 0x12d   :  { %535 = vmatmul.bf16.vlgmr.msra.gmra.mxu2 %v305_v62  ;;  %v248_v4 = vmul.f32 0.5, %v247_v0  ;;  %v279_v20 = vmul.f32 %v244_v17, %v2809_v32 }
 0x12e   :  { %v288_v7 = vmul.f32 %v2855_v45, %v277_v3 }
 0x12f   :  { %v249_v9 = vsub.f32 1.5, %v248_v4  ;;  %v290_v21 = vmul.f32 %v2855_v45, %v279_v20 }
 0x130   :  { %v299_v12 = vadd.f32 %v2862_v18, %v288_v7 }
 0x131   :  { %v250_v14 = vmul.f32 %v2505_v56, %v249_v9  ;;  %v301_v23 = vadd.f32 %v2862_v18, %v290_v21 }
 0x132   :  { %v306_v25 = vpack.c.bf16 %v300_v33, %v299_v12 }
 0x133   :  { %v254_v16 = vsel %vm253_vm1, %v2505_v56, %v250_v14 }
 0x134   :  { %v280_v19 = vmul.f32 %v254_v16, %v2824_v41  ;;  %v2507_v41 = vpop.eup %2506 }
 0x135   :  { %v256_v31 = vmul.f32 %v2507_v41, %v193_v29  ;;  %vm262_vm4 = vweird.f32 %v2507_v41 }
 0x136   :  { %v291_v30 = vmul.f32 %v2855_v45, %v280_v19  ;;  %vm263_vm5 = vmor %vm261_vm3, %vm262_vm4 }
 0x137   :  { %v257_v32 = vmul.f32 %v2507_v41, %v256_v31 }
 0x138   :  { %v302_v22 = vadd.f32 %v2862_v18, %v291_v30 }
 0x139   :  { %v258_v38 = vmul.f32 0.5, %v257_v32 }
 0x13a   :  { %v307_v24 = vpack.c.bf16 %v302_v22, %v301_v23 }
 0x13b   :  { %v259_v39 = vsub.f32 1.5, %v258_v38 }
 0x13c   :  { %482 = vmatmul.bf16.gmra.mxu0 %v306_v25  ;;  %511 = vmatmul.bf16.gmra.mxu1 %v306_v25 }
 0x13d   :  { %540 = vmatmul.bf16.gmra.mxu2 %v306_v25  ;;  %v260_v42 = vmul.f32 %v2507_v41, %v259_v39 }
 0x13f   :  { %v264_v46 = vsel %vm263_vm5, %v2507_v41, %v260_v42 }
 0x140   :  { %v281_v49 = vmul.f32 %v264_v46, %v2815_v36 }
 0x142   :  { %v292_v53 = vmul.f32 %v2855_v45, %v281_v49 }
 0x144   :  { %v303_v55 = vadd.f32 %v2862_v18, %v292_v53 }
 0x14c   :  { %487 = vmatmul.bf16.gmra.mxu0 %v307_v24  ;;  %516 = vmatmul.bf16.gmra.mxu1 %v307_v24 }
 0x14d   :  { %545 = vmatmul.bf16.gmra.mxu2 %v307_v24 }
 0x187   :  { %v178_v34 = vpop.xlane.xlu0 %177 }
 0x188   :  { %v186_v35 = vmul.f32 %v178_v34, %v2788_v13 }
 0x18a   :  { %v194_v37 = vadd.f32 1e-05, %v186_v35 }
 0x18c   :  { %2508 = vrsqrt.f32 %v194_v37  ;;  %vm271_vm6 = vweird.f32 %v194_v37 }
 0x192   :  { %v2509_v40 = vpop.eup %2508 }
 0x193   :  { %v266_v43 = vmul.f32 %v2509_v40, %v194_v37  ;;  %vm272_vm7 = vweird.f32 %v2509_v40 }
 0x194   :  { %vm273_vm8 = vmor %vm271_vm6, %vm272_vm7 }
 0x195   :  { %v267_v44 = vmul.f32 %v2509_v40, %v266_v43 }
 0x197   :  { %v268_v47 = vmul.f32 0.5, %v267_v44 }
 0x199   :  { %v269_v48 = vsub.f32 1.5, %v268_v47 }
 0x19b   :  { %v270_v50 = vmul.f32 %v2509_v40, %v269_v48 }
 0x19d   :  { %v274_v51 = vsel %vm273_vm8, %v2509_v40, %v270_v50 }
 0x19e   :  { %v282_v52 = vmul.f32 %v274_v51, %v2835_v8 }
 0x1a0   :  { %v293_v54 = vmul.f32 %v2855_v45, %v282_v52 }
 0x1a2   :  { %v304_v28 = vadd.f32 %v2862_v18, %v293_v54 }
 0x1a4   :  { %v308_v56 = vpack.c.bf16 %v304_v28, %v303_v55 }
 0x1a6   :  { %492 = vmatmul.bf16.gmra.mxu0 %v308_v56  ;;  %521 = vmatmul.bf16.gmra.mxu1 %v308_v56 }
 0x1a7   :  { %550 = vmatmul.bf16.gmra.mxu2 %v308_v56 }
 0x1a9   :  { %v478_v57 = vpop.f32.mrf.mxu0  ;;  %v507_v58 = vpop.f32.mrf.mxu1 }
 0x1aa   :  { %v556_v36 = vpack.c.bf16 %v507_v58, %v478_v57 }
 0x1ac   :  { %v587_v62 = vrot.slane %v556_v36, 4  ;;  %v595_v5 = vunpack.c.l.b16 %v556_v36 }
 0x1ae   :  { %v599_v0 = vunpack.c.l.b16 %v587_v62 }
 0x1b0   :  { %v2893_v59 = vpop.f32.mrf.mxu2 }
 0x1b1   :  { %v480_v60 = vpop.f32.mrf.mxu0  ;;  %v509_v61 = vpop.f32.mrf.mxu1  ;;  %v557_v56 = vpack.c.bf16 %v2893_v59, %v2893_v59 }
 0x1b2   :  { %v558_v8 = vpack.c.bf16 %v509_v61, %v480_v60 }
 0x1b3   :  { %v799_v61 = vunpack.c.l.b16 %v557_v56 }
 0x1b4   :  { %v588_v63 = vrot.slane %v558_v8, 4  ;;  %v596_v4 = vunpack.c.l.b16 %v558_v8 }
 0x1b6   :  { %v600_v45 = vunpack.c.l.b16 %v588_v63  ;;  %v597_v7 = vpack.c.b16 %v596_v4, %v595_v5 }
 0x1b8   :  { %v538_v1 = vpop.f32.mrf.mxu2  ;;  %v601_v2 = vpack.c.b16 %v600_v45, %v599_v0 }
 0x1b9   :  { %v483_v3 = vpop.f32.mrf.mxu0  ;;  %v512_v18 = vpop.f32.mrf.mxu1  ;;  %v559_v52 = vpack.c.bf16 %v538_v1, %v538_v1 }
 0x1ba   :  { %610 = vmatpush.bf16.xpose.msra.mxu3 %v601_v2  ;;  %v560_v6 = vpack.c.bf16 %v512_v18, %v483_v3 }
 0x1bb   :  { %v800_v58 = vunpack.c.l.b16 %v559_v52 }
 0x1bc   :  { %v589_v12 = vrot.slane %v560_v6, 4  ;;  %v617_v21 = vunpack.c.l.b16 %v560_v6 }
 0x1bd   :  { %v801_v45 = vpack.c.b16 %v800_v58, %v799_v61 }
 0x1be   :  { %v621_v15 = vunpack.c.l.b16 %v589_v12  ;;  %v572_v12 = vlaneseq }
 0x1c0   :  { %v2895_v9 = vpop.f32.mrf.mxu2 }
 0x1c1   :  { %v485_v10 = vpop.f32.mrf.mxu0  ;;  %v514_v11 = vpop.f32.mrf.mxu1  ;;  %611 = vmatmul.bf16.vlgmr.msra.gmra.mxu3 %v597_v7  ;;  %v561_v1 = vpack.c.bf16 %v2895_v9, %v2895_v9 }
 0x1c2   :  { %v562_v14 = vpack.c.bf16 %v514_v11, %v485_v10 }
 0x1c3   :  { %v827_v7 = vunpack.c.l.b16 %v561_v1 }
 0x1c4   :  { %v590_v33 = vrot.slane %v562_v14, 4  ;;  %v618_v30 = vunpack.c.l.b16 %v562_v14  ;;  %v573_v14 = vshrl.u32 %v572_v12, 7 }
 0x1c6   :  { %v622_v25 = vunpack.c.l.b16 %v590_v33  ;;  %v619_v23 = vpack.c.b16 %v618_v30, %v617_v21  ;;  %v576_v33 = vand.u32 127, %v572_v12 }
 0x1c8   :  { %v543_v16 = vpop.f32.mrf.mxu2  ;;  %v623_v17 = vpack.c.b16 %v622_v25, %v621_v15  ;;  %vm577_vm9 = vcmp.ge.s32.totalorder %v573_v14, %v576_v33 }
 0x1c9   :  { %v488_v19 = vpop.f32.mrf.mxu0  ;;  %v517_v20 = vpop.f32.mrf.mxu1  ;;  %v563_v62 = vpack.c.bf16 %v543_v16, %v543_v16  ;;  %v574_v16 = vadd.s32 8, %v573_v14 }
 0x1ca   :  { %632 = vmatpush.bf16.xpose.msrb.mxu3 %v623_v17  ;;  %v564_v22 = vpack.c.bf16 %v517_v20, %v488_v19 }
 0x1cb   :  { %v828_v59 = vunpack.c.l.b16 %v563_v62  ;;  %vm578_vm11 = vcmp.ge.s32.totalorder %v574_v16, %v576_v33 }
 0x1cc   :  { %v591_v29 = vrot.slane %v564_v22, 4  ;;  %v639_v44 = vunpack.c.l.b16 %v564_v22 }
 0x1cd   :  { %v829_v11 = vpack.c.b16 %v828_v59, %v827_v7 }
 0x1ce   :  { %v643_v32 = vunpack.c.l.b16 %v591_v29 }
 0x1d0   :  { %v546_v24 = vpop.f32.mrf.mxu2 }
 0x1d1   :  { %v490_v26 = vpop.f32.mrf.mxu0  ;;  %v519_v27 = vpop.f32.mrf.mxu1  ;;  %633 = vmatmul.bf16.vlgmr.msrb.gmra.mxu3 %v619_v23  ;;  %v565_v35 = vpack.c.bf16 %v546_v24, %v546_v24 }
 0x1d2   :  { %v566_v41 = vpack.c.bf16 %v519_v27, %v490_v26 }
 0x1d3   :  { %v855_v40 = vunpack.c.l.b16 %v565_v35 }
 0x1d4   :  { %v592_v31 = vrot.slane %v566_v41, 4  ;;  %v640_v42 = vunpack.c.l.b16 %v566_v41 }
 0x1d6   :  { %v644_v34 = vunpack.c.l.b16 %v592_v31  ;;  %v641_v47 = vpack.c.b16 %v640_v42, %v639_v44 }
 0x1d8   :  { %v645_v37 = vpack.c.b16 %v644_v34, %v643_v32  ;;  %v548_v38 = vpop.f32.mrf.mxu2 }
 0x1d9   :  { %v567_v39 = vpack.c.bf16 %v548_v38, %v548_v38 }
 0x1da   :  { %654 = vmatpush.bf16.xpose.msra.mxu3 %v645_v37 }
 0x1db   :  { %v856_v43 = vunpack.c.l.b16 %v567_v39 }
 0x1dd   :  { %v857_v46 = vpack.c.b16 %v856_v43, %v855_v40 }
 0x1df   :  { %869 = vmatpush.bf16.msrb.mxu0 %v857_v46 }
 0x1e1   :  { %655 = vmatmul.bf16.vlgmr.msra.gmra.mxu3 %v641_v47 }
 0x223   :  { %v493_v48 = vpop.f32.mrf.mxu0  ;;  %v522_v49 = vpop.f32.mrf.mxu1 }
 0x224   :  { %v568_v50 = vpack.c.bf16 %v522_v49, %v493_v48 }
 0x226   :  { %v593_v55 = vrot.slane %v568_v50, 4  ;;  %v661_v5 = vunpack.c.l.b16 %v568_v50 }
 0x228   :  { %v665_v36 = vunpack.c.l.b16 %v593_v55 }
 0x22a   :  { %v551_v51 = vpop.f32.mrf.mxu2 }
 0x22b   :  { %v495_v53 = vpop.f32.mrf.mxu0  ;;  %v524_v54 = vpop.f32.mrf.mxu1  ;;  %v569_v8 = vpack.c.bf16 %v551_v51, %v551_v51 }
 0x22c   :  { %v570_v28 = vpack.c.bf16 %v524_v54, %v495_v53 }
 0x22d   :  { %v883_v3 = vunpack.c.l.b16 %v569_v8 }
 0x22e   :  { %v594_v57 = vrot.slane %v570_v28, 4  ;;  %v662_v18 = vunpack.c.l.b16 %v570_v28 }
 0x230   :  { %v666_v60 = vunpack.c.l.b16 %v594_v57  ;;  %v663_v10 = vpack.c.b16 %v662_v18, %v661_v5 }
 0x232   :  { %v667_v63 = vpack.c.b16 %v666_v60, %v665_v36  ;;  %v553_v0 = vpop.f32.mrf.mxu2 }
 0x233   :  { %v571_v2 = vpack.c.bf16 %v553_v0, %v553_v0 }
 0x234   :  { %676 = vmatpush.bf16.xpose.msrb.mxu3 %v667_v63 }
 0x235   :  { %v884_v4 = vunpack.c.l.b16 %v571_v2 }
 0x237   :  { %v885_v6 = vpack.c.b16 %v884_v4, %v883_v3 }
 0x239   :  { %897 = vmatpush.bf16.msrb.mxu1 %v885_v6 }
 0x23b   :  { %677 = vmatmul.bf16.vlgmr.msrb.gmra.mxu3 %v663_v10 }
 0x23c   :  { %813 = vmatpush.bf16.msra.mxu3 %v801_v45 }
 0x240   :  { %841 = vmatpush.bf16.msrb.mxu3 %v829_v11 }
 0x244   :  { %v612_v9 = vpop.f32.mrf.mxu3 }
 0x245   :  { %v687_v15 = vsel %vm577_vm9, %v612_v9, -1e+30 }
 0x246   :  { %v696_v25 = vsel %vm695_vm10, %v687_v15, -inf }
 0x247   :  { %697 = vmax.xlane.f32.xlu1 %v696_v25 }
 0x24c   :  { %v614_v17 = vpop.f32.mrf.mxu3 }
 0x24d   :  { %v688_v19 = vsel %vm578_vm11, %v614_v17, -1e+30 }
 0x24e   :  { %v699_v20 = vsel %vm695_vm10, %v688_v19, -inf }
 0x24f   :  { %700 = vmax.xlane.f32.xlu2 %v699_v20 }
 0x254   :  { %v634_v30 = vpop.f32.mrf.mxu3 }
 0x255   :  { %v689_v21 = vsel %vm577_vm9, %v634_v30, -1e+30 }
 0x256   :  { %v702_v22 = vsel %vm695_vm10, %v689_v21, -inf }
 0x257   :  { %703 = vmax.xlane.f32.xlu0 %v702_v22 }
 0x25c   :  { %v636_v23 = vpop.f32.mrf.mxu3 }
 0x25d   :  { %v690_v24 = vsel %vm578_vm11, %v636_v23, -1e+30 }
 0x25e   :  { %v705_v26 = vsel %vm695_vm10, %v690_v24, -inf }
 0x25f   :  { %706 = vmax.xlane.f32.xlu1 %v705_v26 }
 0x264   :  { %v656_v27 = vpop.f32.mrf.mxu3 }
 0x265   :  { %v691_v29 = vsel %vm577_vm9, %v656_v27, -1e+30 }
 0x266   :  { %v708_v41 = vsel %vm695_vm10, %v691_v29, -inf }
 0x267   :  { %709 = vmax.xlane.f32.xlu2 %v708_v41  ;;  %v2399_v41 = vld [vmem:[%s3162_s2 + $0x38] sm:$0xff] }
 0x268   :  { %976 = vmatpush.bf16.msrb.mxu2 %v2399_v41 }
 0x26c   :  { %v658_v31 = vpop.f32.mrf.mxu3 }
 0x26d   :  { %v692_v32 = vsel %vm578_vm11, %v658_v31, -1e+30 }
 0x26e   :  { %v711_v34 = vsel %vm695_vm10, %v692_v32, -inf }
 0x26f   :  { %712 = vmax.xlane.f32.xlu0 %v711_v34 }
 0x2ba   :  { %v698_v35 = vpop.xlane.xlu1 %697 }
 0x2bb   :  { %v720_v37 = vsub.f32 %v687_v15, %v698_v35  ;;  %v2397_v35 = vld [vmem:[%s3162_s2 + $0x28] sm:$0xff] }
 0x2bd   :  { %v728_v38 = vmul.f32 1.442695, %v720_v37 }
 0x2be   :  { %v678_v39 = vpop.f32.mrf.mxu3 }
 0x2bf   :  { %v693_v40 = vsel %vm577_vm9, %v678_v39, -1e+30  ;;  %2510 = vpow2.f32 %v728_v38 }
 0x2c0   :  { %v714_v42 = vsel %vm695_vm10, %v693_v40, -inf }
 0x2c1   :  { %715 = vmax.xlane.f32.xlu0 %v714_v42 }
 0x2c2   :  { %v701_v43 = vpop.xlane.xlu2 %700 }
 0x2c3   :  { %v721_v44 = vsub.f32 %v688_v19, %v701_v43 }
 0x2c5   :  { %v2511_v46 = vpop.eup %2510  ;;  %v730_v47 = vmul.f32 1.442695, %v721_v44 }
 0x2c6   :  { %v744_v48 = vsel %vm695_vm10, %v2511_v46, 0.0  ;;  %v680_v49 = vpop.f32.mrf.mxu3 }
 0x2c7   :  { %2512 = vpow2.f32 %v730_v47  ;;  %745 = vadd.xlane.f32.xlu1 %v744_v48  ;;  %v694_v51 = vsel %vm578_vm11, %v680_v49, -1e+30 }
 0x2c8   :  { %v717_v28 = vsel %vm695_vm10, %v694_v51, -inf }
 0x2ca   :  { %v704_v50 = vpop.xlane.xlu0 %703 }
 0x2cb   :  { %v722_v52 = vsub.f32 %v689_v21, %v704_v50 }
 0x2cd   :  { %v2513_v53 = vpop.eup %2512  ;;  %v732_v54 = vmul.f32 1.442695, %v722_v52 }
 0x2ce   :  { %v747_v55 = vsel %vm695_vm10, %v2513_v53, 0.0 }
 0x2cf   :  { %2514 = vpow2.f32 %v732_v54  ;;  %748 = vadd.xlane.f32.xlu2 %v747_v55  ;;  %718 = vmax.xlane.f32.xlu1 %v717_v28 }
 0x2d2   :  { %v707_v56 = vpop.xlane.xlu1 %706 }
 0x2d3   :  { %v723_v57 = vsub.f32 %v690_v24, %v707_v56  ;;  %v2396_v56 = vld [vmem:[%s3162_s2 + $0x20] sm:$0xff] }
 0x2d5   :  { %v2515_v58 = vpop.eup %2514  ;;  %v734_v36 = vmul.f32 1.442695, %v723_v57  ;;  %v2395_v57 = vld [vmem:[%s3162_s2 + $0x18] sm:$0xff] }
 0x2d6   :  { %v750_v60 = vsel %vm695_vm10, %v2515_v58, 0.0 }
 0x2d7   :  { %2516 = vpow2.f32 %v734_v36  ;;  %751 = vadd.xlane.f32.xlu2 %v750_v60  ;;  %v2393_v36 = vld [vmem:[%s3162_s2 + $0x8] sm:$0xff]  ;;  %v2392_v60 = vld [vmem:[%s3162_s2] sm:$0xff] }
 0x2da   :  { %v710_v61 = vpop.xlane.xlu2 %709 }
 0x2db   :  { %v724_v8 = vsub.f32 %v691_v29, %v710_v61 }
 0x2dd   :  { %v2517_v62 = vpop.eup %2516  ;;  %v736_v63 = vmul.f32 1.442695, %v724_v8 }
 0x2de   :  { %v753_v0 = vsel %vm695_vm10, %v2517_v62, 0.0 }
 0x2df   :  { %2518 = vpow2.f32 %v736_v63  ;;  %754 = vadd.xlane.f32.xlu0 %v753_v0 }
 0x2e2   :  { %v713_v45 = vpop.xlane.xlu0 %712 }
 0x2e3   :  { %v725_v2 = vsub.f32 %v692_v32, %v713_v45  ;;  %v2398_v32 = vld [vmem:[%s3162_s2 + $0x30] sm:$0xff] }
 0x2e4   :  { %977 = vmatpush.bf16.msrb.mxu2 %v2398_v32 }
 0x2e5   :  { %v2519_v1 = vpop.eup %2518  ;;  %v738_v3 = vmul.f32 1.442695, %v725_v2 }
 0x2e6   :  { %v756_v18 = vsel %vm695_vm10, %v2519_v1, 0.0 }
 0x2e7   :  { %2520 = vpow2.f32 %v738_v3  ;;  %757 = vadd.xlane.f32.xlu1 %v756_v18 }
 0x2e8   :  { %978 = vmatpush.bf16.msrb.mxu2 %v2397_v35 }
 0x2ec   :  { %979 = vmatpush.bf16.msrb.mxu2 %v2396_v56 }
 0x2ed   :  { %v2521_v4 = vpop.eup %2520 }
 0x2ee   :  { %v759_v59 = vsel %vm695_vm10, %v2521_v4, 0.0 }
 0x2ef   :  { %760 = vadd.xlane.f32.xlu2 %v759_v59 }
 0x2f0   :  { %980 = vmatpush.bf16.msrb.mxu2 %v2395_v57 }
 0x334   :  { %v716_v5 = vpop.xlane.xlu0 %715 }
 0x335   :  { %v726_v6 = vsub.f32 %v693_v40, %v716_v5 }
 0x337   :  { %v740_v7 = vmul.f32 1.442695, %v726_v6 }
 0x339   :  { %2522 = vpow2.f32 %v740_v7 }
 0x33a   :  { %v746_v10 = vpop.xlane.xlu1 %745 }
 0x33b   :  { %2524 = vrcp.f32 %v746_v10 }
 0x33f   :  { %v2923_v11 = vpop.eup %2522 }
 0x340   :  { %v762_v12 = vsel %vm695_vm10, %v2923_v11, 0.0 }
 0x341   :  { %763 = vadd.xlane.f32.xlu0 %v762_v12  ;;  %v2525_v9 = vpop.eup %2524 }
 0x342   :  { %v749_v14 = vpop.xlane.xlu2 %748  ;;  %v719_v33 = vpop.xlane.xlu1 %718  ;;  %v776_v16 = vmul.f32 %v2525_v9, %v2511_v46 }
 0x343   :  { %2526 = vrcp.f32 %v749_v14  ;;  %v727_v15 = vsub.f32 %v694_v51, %v719_v33 }
 0x344   :  { %v784_v19 = vpack.c.bf16 %v776_v16, %v776_v16  ;;  %v2488_v16 = vld [vmem:[%s3163_s3] ss:$0 sm:$0xff] }
 0x345   :  { %v742_v25 = vmul.f32 1.442695, %v727_v15 }
 0x346   :  { %v794_v23 = vunpack.c.l.b16 %v784_v19 }
 0x347   :  { %2528 = vpow2.f32 %v742_v25 }
 0x349   :  { %v2527_v17 = vpop.eup %2526 }
 0x34a   :  { %v777_v20 = vmul.f32 %v2527_v17, %v2513_v53  ;;  %v752_v30 = vpop.xlane.xlu2 %751 }
 0x34b   :  { %2530 = vrcp.f32 %v752_v30 }
 0x34c   :  { %v785_v21 = vpack.c.bf16 %v777_v20, %v777_v20  ;;  %v2558_v20 = vld [vmem:[#allocation2] sm:$0xff] }
 0x34d   :  { %v2529_v22 = vpop.eup %2528 }
 0x34e   :  { %v795_v24 = vunpack.c.l.b16 %v785_v21  ;;  %v765_v26 = vsel %vm695_vm10, %v2529_v22, 0.0 }
 0x34f   :  { %766 = vadd.xlane.f32.xlu1 %v765_v26 }
 0x350   :  { %v796_v27 = vpack.c.b16 %v795_v24, %v794_v23  ;;  %v2559_v23 = vld [vmem:[#allocation2 + $0x8] sm:$0xff] }
 0x351   :  { %v2531_v31 = vpop.eup %2530 }
 0x352   :  { %2076 = vmatmul.msk.bf16.vlgmr.msra.gmra.mxu3 %vm695_vm10, %v796_v27  ;;  %v755_v29 = vpop.xlane.xlu0 %754  ;;  %v778_v34 = vmul.f32 %v2531_v31, %v2515_v58  ;;  %v2394_v58 = vld [vmem:[%s3162_s2 + $0x10] sm:$0xff] }
 0x353   :  { %2532 = vrcp.f32 %v755_v29  ;;  %981 = vmatpush.bf16.msrb.mxu2 %v2394_v58  ;;  %v2560_v29 = vld [vmem:[#allocation2 + $0x10] sm:$0xff] }
 0x354   :  { %v786_v38 = vpack.c.bf16 %v778_v34, %v778_v34  ;;  %v2561_v34 = vld [vmem:[#allocation2 + $0x18] sm:$0xff] }
 0x356   :  { %v822_v43 = vunpack.c.l.b16 %v786_v38 }
 0x357   :  { %982 = vmatpush.bf16.msrb.mxu2 %v2393_v36  ;;  %v2565_v36 = vld [vmem:[#allocation2 + $0x38] sm:$0xff] }
 0x359   :  { %v2533_v37 = vpop.eup %2532 }
 0x35a   :  { %v779_v39 = vmul.f32 %v2533_v37, %v2517_v62  ;;  %v758_v40 = vpop.xlane.xlu1 %757 }
 0x35b   :  { %2534 = vrcp.f32 %v758_v40  ;;  %983 = vmatpush.bf16.msrb.mxu2 %v2392_v60 }
 0x35c   :  { %v787_v42 = vpack.c.bf16 %v779_v39, %v779_v39  ;;  %v2562_v39 = vld [vmem:[#allocation2 + $0x20] sm:$0xff] }
 0x35e   :  { %v823_v44 = vunpack.c.l.b16 %v787_v42 }
 0x360   :  { %v824_v46 = vpack.c.b16 %v823_v44, %v822_v43  ;;  %v2563_v44 = vld [vmem:[#allocation2 + $0x28] sm:$0xff] }
 0x361   :  { %v2535_v48 = vpop.eup %2534 }
 0x362   :  { %v761_v47 = vpop.xlane.xlu2 %760  ;;  %2077 = vmatmul.msk.bf16.vlgmr.msrb.gmra.mxu3 %vm695_vm10, %v824_v46  ;;  %v780_v49 = vmul.f32 %v2535_v48, %v2519_v1 }
 0x363   :  { %2536 = vrcp.f32 %v761_v47 }
 0x364   :  { %v788_v51 = vpack.c.bf16 %v780_v49, %v780_v49 }
 0x366   :  { %v850_v54 = vunpack.c.l.b16 %v788_v51 }
 0x369   :  { %v2537_v50 = vpop.eup %2536 }
 0x36a   :  { %v781_v52 = vmul.f32 %v2537_v50, %v2521_v4 }
 0x36c   :  { %v789_v53 = vpack.c.bf16 %v781_v52, %v781_v52  ;;  %v2564_v52 = vld [vmem:[#allocation2 + $0x30] sm:$0xff] }
 0x36e   :  { %v851_v55 = vunpack.c.l.b16 %v789_v53 }
 0x370   :  { %v852_v28 = vpack.c.b16 %v851_v55, %v850_v54 }
 0x372   :  { %2078 = vmatmul.msk.bf16.vlgmr.msrb.gmra.mxu0 %vm695_vm10, %v852_v28 }
 0x3b4   :  { %v764_v61 = vpop.xlane.xlu0 %763 }
 0x3b5   :  { %2538 = vrcp.f32 %v764_v61 }
 0x3bb   :  { %v2539_v62 = vpop.eup %2538 }
 0x3bc   :  { %v782_v63 = vmul.f32 %v2539_v62, %v2923_v11 }
 0x3be   :  { %v790_v45 = vpack.c.bf16 %v782_v63, %v782_v63 }
 0x3c0   :  { %v878_v3 = vunpack.c.l.b16 %v790_v45 }
 0x3c2   :  { %v767_v8 = vpop.xlane.xlu1 %766 }
 0x3c3   :  { %2540 = vrcp.f32 %v767_v8 }
 0x3c9   :  { %v2541_v0 = vpop.eup %2540 }
 0x3ca   :  { %v783_v2 = vmul.f32 %v2541_v0, %v2529_v22 }
 0x3cc   :  { %v791_v1 = vpack.c.bf16 %v783_v2, %v783_v2 }
 0x3ce   :  { %v879_v18 = vunpack.c.l.b16 %v791_v1 }
 0x3d0   :  { %v880_v4 = vpack.c.b16 %v879_v18, %v878_v3 }
 0x3d2   :  { %2079 = vmatmul.msk.bf16.vlgmr.msrb.gmra.mxu1 %vm695_vm10, %v880_v4 }
 0x3d5   :  { %v815_v59 = vpop.f32.mrf.mxu3 }
 0x3dd   :  { %v817_v5 = vpop.f32.mrf.mxu3 }
 0x3de   :  { %v904_v6 = vpack.c.bf16 %v817_v5, %v815_v59 }
 0x3e0   :  { %984 = vmatmul.bf16.vlgmr.msrb.gmra.mxu2 %v904_v6 }
 0x3e5   :  { %v843_v7 = vpop.f32.mrf.mxu3 }
 0x3ed   :  { %v845_v10 = vpop.f32.mrf.mxu3 }
 0x3ee   :  { %v905_v12 = vpack.c.bf16 %v845_v10, %v843_v7 }
 0x3ef   :  { %v871_v14 = vpop.f32.mrf.mxu0 }
 0x3f0   :  { %989 = vmatmul.bf16.gmra.mxu2 %v905_v12 }
 0x3f7   :  { %v873_v33 = vpop.f32.mrf.mxu0 }
 0x3f8   :  { %v906_v11 = vpack.c.bf16 %v873_v33, %v871_v14  ;;  %v2226_v14 = vld [vmem:[#allocation7 + $0xe0] sm:$0xf]  ;;  %v2430_v33 = vld [vmem:[#allocation7 + $0xec] sm:$0xf0] }
 0x400   :  { %994 = vmatmul.bf16.gmra.mxu2 %v906_v11  ;;  %v2428_v11 = vld [vmem:[#allocation7 + $0xe4] sm:$0xf] }
 0x44f   :  { %v899_v9 = vpop.f32.mrf.mxu1 }
 0x457   :  { %v901_v15 = vpop.f32.mrf.mxu1 }
 0x458   :  { %v907_v25 = vpack.c.bf16 %v901_v15, %v899_v9  ;;  %v2227_v9 = vor.u32 %v2430_v33, %v2226_v14  ;;  %v2228_v15 = vld [vmem:[#allocation7 + $0xf0] sm:$0xf0]  ;;  %v2414_v14 = vld [vmem:[#allocation7 + $0x6c] sm:$0xf0]  ;;  %v2412_v33 = vld [vmem:[#allocation7 + $0x64] sm:$0xf] }
 0x45a   :  { %999 = vmatmul.bf16.gmra.mxu2 %v907_v25  ;;  %v2234_v25 = vld [vmem:[#allocation7 + $0xe8] sm:$0xf]  ;;  %1403 = vmatpush.bf16.msra.mxu3 %v2227_v9  ;;  %v2164_v9 = vld [vmem:[#allocation7 + $0x70] sm:$0xf0] }
 0x463   :  { %v985_v17 = vpop.f32.mrf.mxu2 }
 0x464   :  { %v986_v19 = vadd.f32 %v2488_v16, %v985_v17  ;;  %v2231_v17 = vor.u32 %v2428_v11, %v2228_v15  ;;  %v2170_v15 = vld [vmem:[#allocation7 + $0x68] sm:$0xf] }
 0x466   :  { %v2960_v30 = vadd.f32 %v2558_v20, %v986_v19  ;;  %v2429_v20 = vld [vmem:[#allocation7 + $0xec] sm:$0xf]  ;;  %1432 = vmatpush.bf16.msra.mxu0 %v2231_v17 }
 0x468   :  { %1015 = vadd.xlane.f32.xlu2 %v2960_v30 }
 0x46b   :  { %v987_v21 = vpop.f32.mrf.mxu2 }
 0x46c   :  { %v988_v22 = vadd.f32 %v2488_v16, %v987_v21  ;;  %v2236_v21 = vld [vmem:[#allocation7 + $0xf8] sm:$0xf0] }
 0x46e   :  { %v2963_v24 = vadd.f32 %v2559_v23, %v988_v22  ;;  %v2239_v22 = vor.u32 %v2429_v20, %v2236_v21  ;;  %v2210_v23 = vld [vmem:[#allocation7 + $0xc0] sm:$0xf]  ;;  %v2172_v20 = vld [vmem:[#allocation7 + $0x78] sm:$0xf0] }
 0x470   :  { %1017 = vadd.xlane.f32.xlu0 %v2963_v24  ;;  %1490 = vmatpush.bf16.msra.mxu2 %v2239_v22  ;;  %v2146_v22 = vld [vmem:[#allocation7 + $0x40] sm:$0xf] }
 0x473   :  { %v990_v26 = vpop.f32.mrf.mxu2 }
 0x474   :  { %v991_v27 = vadd.f32 %v2488_v16, %v990_v26  ;;  %v2426_v26 = vld [vmem:[#allocation7 + $0xcc] sm:$0xf0] }
 0x476   :  { %v2966_v41 = vadd.f32 %v2560_v29, %v991_v27  ;;  %v2424_v27 = vld [vmem:[#allocation7 + $0xc4] sm:$0xf]  ;;  %v2211_v29 = vor.u32 %v2426_v26, %v2210_v23  ;;  %v2410_v23 = vld [vmem:[#allocation7 + $0x4c] sm:$0xf0] }
 0x477   :  { %v2408_v26 = vld [vmem:[#allocation7 + $0x44] sm:$0xf] }
 0x478   :  { %1019 = vadd.xlane.f32.xlu1 %v2966_v41  ;;  %1404 = vmatpush.bf16.msra.mxu3 %v2211_v29  ;;  %v2148_v29 = vld [vmem:[#allocation7 + $0x50] sm:$0xf0] }
 0x47b   :  { %v992_v31 = vpop.f32.mrf.mxu2 }
 0x47c   :  { %v993_v32 = vadd.f32 %v2488_v16, %v992_v31  ;;  %v2212_v31 = vld [vmem:[#allocation7 + $0xd0] sm:$0xf0] }
 0x47e   :  { %v2969_v35 = vadd.f32 %v2561_v34, %v993_v32  ;;  %v2218_v32 = vld [vmem:[#allocation7 + $0xc8] sm:$0xf]  ;;  %v2427_v34 = vld [vmem:[#allocation7 + $0xd4] sm:$0xf0] }
 0x480   :  { %1021 = vadd.xlane.f32.xlu2 %v2969_v35 }
 0x483   :  { %v995_v37 = vpop.f32.mrf.mxu2 }
 0x484   :  { %v996_v38 = vadd.f32 %v2488_v16, %v995_v37  ;;  %v2215_v37 = vor.u32 %v2424_v27, %v2212_v31  ;;  %v2147_v27 = vor.u32 %v2410_v23, %v2146_v22  ;;  %v2154_v31 = vld [vmem:[#allocation7 + $0x48] sm:$0xf] }
 0x486   :  { %v2972_v40 = vadd.f32 %v2562_v39, %v996_v38  ;;  %v2219_v38 = vor.u32 %v2427_v34, %v2218_v32  ;;  %v2425_v39 = vld [vmem:[#allocation7 + $0xcc] sm:$0xf]  ;;  %1433 = vmatpush.bf16.msra.mxu0 %v2215_v37  ;;  %v2411_v32 = vld [vmem:[#allocation7 + $0x54] sm:$0xf0]  ;;  %v2151_v34 = vor.u32 %v2408_v26, %v2148_v29 }
 0x487   :  { %v2155_v37 = vor.u32 %v2411_v32, %v2154_v31 }
 0x488   :  { %1023 = vadd.xlane.f32.xlu0 %v2972_v40 }
 0x48b   :  { %v997_v42 = vpop.f32.mrf.mxu2 }
 0x48c   :  { %v998_v43 = vadd.f32 %v2488_v16, %v997_v42  ;;  %v2220_v42 = vld [vmem:[#allocation7 + $0xd8] sm:$0xf0] }
 0x48e   :  { %v2975_v46 = vadd.f32 %v2563_v44, %v998_v43  ;;  %v2223_v43 = vor.u32 %v2425_v39, %v2220_v42  ;;  %v2194_v44 = vld [vmem:[#allocation7 + $0xa0] sm:$0xf]  ;;  %v2156_v39 = vld [vmem:[#allocation7 + $0x58] sm:$0xf0] }
 0x490   :  { %1025 = vadd.xlane.f32.xlu1 %v2975_v46  ;;  %1491 = vmatpush.bf16.msra.mxu2 %v2223_v43  ;;  %v2130_v43 = vld [vmem:[#allocation7 + $0x20] sm:$0xf] }
 0x4db   :  { %v1016_v47 = vpop.xlane.xlu2 %1015 }
 0x4dc   :  { %v1031_v48 = vmul.f32 %v1016_v47, %v2788_v13  ;;  %v2422_v47 = vld [vmem:[#allocation7 + $0xac] sm:$0xf0] }
 0x4dd   :  { %v1000_v49 = vpop.f32.mrf.mxu2 }
 0x4de   :  { %v2980_v50 = vsub.f32 %v2960_v30, %v1031_v48  ;;  %v1001_v51 = vadd.f32 %v2488_v16, %v1000_v49  ;;  %v2420_v48 = vld [vmem:[#allocation7 + $0xa4] sm:$0xf]  ;;  %v2195_v49 = vor.u32 %v2422_v47, %v2194_v44  ;;  %v2406_v44 = vld [vmem:[#allocation7 + $0x2c] sm:$0xf0] }
 0x4df   :  { %v2404_v47 = vld [vmem:[#allocation7 + $0x24] sm:$0xf] }
 0x4e0   :  { %v2982_v53 = vadd.f32 %v2564_v52, %v1001_v51  ;;  %v1047_v54 = vmul.f32 %v2980_v50, %v2980_v50  ;;  %v2196_v51 = vld [vmem:[#allocation7 + $0xb0] sm:$0xf0]  ;;  %v2202_v52 = vld [vmem:[#allocation7 + $0xa8] sm:$0xf]  ;;  %1405 = vmatpush.bf16.msra.mxu3 %v2195_v49 }
 0x4e1   :  { %v2132_v49 = vld [vmem:[#allocation7 + $0x30] sm:$0xf0] }
 0x4e2   :  { %1055 = vadd.xlane.f32.xlu2 %v1047_v54  ;;  %1027 = vadd.xlane.f32.xlu1 %v2982_v53  ;;  %v2423_v54 = vld [vmem:[#allocation7 + $0xb4] sm:$0xf0] }
 0x4e3   :  { %v1018_v55 = vpop.xlane.xlu0 %1017 }
 0x4e4   :  { %v1032_v28 = vmul.f32 %v1018_v55, %v2788_v13  ;;  %v2199_v55 = vor.u32 %v2420_v48, %v2196_v51  ;;  %v2131_v48 = vor.u32 %v2406_v44, %v2130_v43  ;;  %v2138_v51 = vld [vmem:[#allocation7 + $0x28] sm:$0xf] }
 0x4e5   :  { %v1002_v56 = vpop.f32.mrf.mxu2 }
 0x4e6   :  { %v2989_v57 = vsub.f32 %v2963_v24, %v1032_v28  ;;  %v1003_v58 = vadd.f32 %v2488_v16, %v1002_v56  ;;  %v2431_v16 = vld [vmem:[#allocation7 + $0xf4] sm:$0xf0]  ;;  %v2203_v28 = vor.u32 %v2423_v54, %v2202_v52  ;;  %v2421_v56 = vld [vmem:[#allocation7 + $0xac] sm:$0xf]  ;;  %1434 = vmatpush.bf16.msra.mxu0 %v2199_v55 }
 0x4e7   :  { %v2235_v19 = vor.u32 %v2431_v16, %v2234_v25  ;;  %v2415_v25 = vld [vmem:[#allocation7 + $0x74] sm:$0xf0]  ;;  %v2167_v16 = vor.u32 %v2412_v33, %v2164_v9  ;;  %v2124_v33 = vld [vmem:[#allocation7 + $0x18] sm:$0xf0] }
 0x4e8   :  { %v2991_v60 = vadd.f32 %v2565_v36, %v1003_v58  ;;  %v1048_v61 = vmul.f32 %v2989_v57, %v2989_v57  ;;  %v2204_v58 = vld [vmem:[#allocation7 + $0xb8] sm:$0xf0]  ;;  %v2171_v17 = vor.u32 %v2415_v25, %v2170_v15  ;;  %v2407_v52 = vld [vmem:[#allocation7 + $0x34] sm:$0xf0] }
 0x4e9   :  { %1461 = vmatpush.bf16.msra.mxu1 %v2235_v19  ;;  %v2207_v36 = vor.u32 %v2421_v56, %v2204_v58  ;;  %v2413_v19 = vld [vmem:[#allocation7 + $0x6c] sm:$0xf]  ;;  %v2139_v56 = vor.u32 %v2407_v52, %v2138_v51 }
 0x4ea   :  { %1029 = vadd.xlane.f32.xlu2 %v2991_v60  ;;  %1057 = vadd.xlane.f32.xlu0 %v1048_v61  ;;  %v2178_v61 = vld [vmem:[#allocation7 + $0x80] sm:$0xf]  ;;  %v2175_v21 = vor.u32 %v2413_v19, %v2172_v20  ;;  %v2405_v58 = vld [vmem:[#allocation7 + $0x2c] sm:$0xf] }
 0x4eb   :  { %v1020_v8 = vpop.xlane.xlu1 %1019  ;;  %1492 = vmatpush.bf16.msra.mxu2 %v2207_v36  ;;  %v2140_v36 = vld [vmem:[#allocation7 + $0x38] sm:$0xf0] }
 0x4ec   :  { %v1033_v62 = vmul.f32 %v1020_v8, %v2788_v13  ;;  %v2418_v8 = vld [vmem:[#allocation7 + $0x8c] sm:$0xf0] }
 0x4ed   :  { %1462 = vmatpush.bf16.msra.mxu1 %v2219_v38  ;;  %v2409_v38 = vld [vmem:[#allocation7 + $0x4c] sm:$0xf] }
 0x4ee   :  { %v2998_v63 = vsub.f32 %v2966_v41, %v1033_v62  ;;  %v2416_v62 = vld [vmem:[#allocation7 + $0x84] sm:$0xf]  ;;  %v2159_v42 = vor.u32 %v2409_v38, %v2156_v39 }
 0x4f0   :  { %v1049_v0 = vmul.f32 %v2998_v63, %v2998_v63 }
 0x4f1   :  { %1463 = vmatpush.bf16.msra.mxu1 %v2203_v28  ;;  %v2135_v28 = vor.u32 %v2404_v47, %v2132_v49 }
 0x4f2   :  { %1059 = vadd.xlane.f32.xlu0 %v1049_v0  ;;  %v2179_v0 = vor.u32 %v2418_v8, %v2178_v61 }
 0x4f3   :  { %v1022_v45 = vpop.xlane.xlu2 %1021 }
 0x4f4   :  { %v1034_v2 = vmul.f32 %v1022_v45, %v2788_v13  ;;  %v2180_v45 = vld [vmem:[#allocation7 + $0x90] sm:$0xf0]  ;;  %1406 = vmatpush.bf16.msra.mxu3 %v2179_v0  ;;  %v2114_v0 = vld [vmem:[#allocation7] sm:$0xf] }
 0x4f6   :  { %v3004_v1 = vsub.f32 %v2969_v35, %v1034_v2  ;;  %v2186_v2 = vld [vmem:[#allocation7 + $0x88] sm:$0xf] }
 0x4f8   :  { %v1050_v3 = vmul.f32 %v3004_v1, %v3004_v1 }
 0x4fa   :  { %1061 = vadd.xlane.f32.xlu1 %v1050_v3  ;;  %v2419_v3 = vld [vmem:[#allocation7 + $0x94] sm:$0xf0] }
 0x4fb   :  { %v1024_v18 = vpop.xlane.xlu0 %1023 }
 0x4fc   :  { %v1035_v4 = vmul.f32 %v1024_v18, %v2788_v13  ;;  %v2183_v18 = vor.u32 %v2416_v62, %v2180_v45  ;;  %v2143_v62 = vor.u32 %v2405_v58, %v2140_v36  ;;  %v2402_v45 = vld [vmem:[#allocation7 + $0xc] sm:$0xf0] }
 0x4fe   :  { %v3010_v59 = vsub.f32 %v2972_v40, %v1035_v4  ;;  %v2187_v4 = vor.u32 %v2419_v3, %v2186_v2  ;;  %1435 = vmatpush.bf16.msra.mxu0 %v2183_v18  ;;  %v2400_v2 = vld [vmem:[#allocation7 + $0x4] sm:$0xf] }
 0x500   :  { %v1051_v5 = vmul.f32 %v3010_v59, %v3010_v59  ;;  %1464 = vmatpush.bf16.msra.mxu1 %v2187_v4  ;;  %v2115_v4 = vor.u32 %v2402_v45, %v2114_v0 }
 0x502   :  { %1063 = vadd.xlane.f32.xlu2 %v1051_v5  ;;  %v2417_v5 = vld [vmem:[#allocation7 + $0x8c] sm:$0xf]  ;;  %1436 = vmatpush.bf16.msra.mxu0 %v2167_v16 }
 0x503   :  { %v1026_v6 = vpop.xlane.xlu1 %1025 }
 0x504   :  { %v1036_v7 = vmul.f32 %v1026_v6, %v2788_v13  ;;  %v2188_v6 = vld [vmem:[#allocation7 + $0x98] sm:$0xf0]  ;;  %1465 = vmatpush.bf16.msra.mxu1 %v2171_v17 }
 0x506   :  { %v3016_v10 = vsub.f32 %v2975_v46, %v1036_v7  ;;  %v2191_v7 = vor.u32 %v2417_v5, %v2188_v6  ;;  %1437 = vmatpush.bf16.msra.mxu0 %v2151_v34  ;;  %v2116_v5 = vld [vmem:[#allocation7 + $0x10] sm:$0xf0]  ;;  %v2122_v6 = vld [vmem:[#allocation7 + $0x8] sm:$0xf] }
 0x508   :  { %v1052_v12 = vmul.f32 %v3016_v10, %v3016_v10  ;;  %1493 = vmatpush.bf16.msra.mxu2 %v2191_v7  ;;  %1466 = vmatpush.bf16.msra.mxu1 %v2155_v37  ;;  %v2119_v7 = vor.u32 %v2400_v2, %v2116_v5 }
 0x50a   :  { %1065 = vadd.xlane.f32.xlu0 %v1052_v12  ;;  %v2162_v12 = vld [vmem:[#allocation7 + $0x60] sm:$0xf]  ;;  %1438 = vmatpush.bf16.msra.mxu0 %v2135_v28 }
 0x50b   :  { %v2163_v11 = vor.u32 %v2414_v14, %v2162_v12  ;;  %v2403_v12 = vld [vmem:[#allocation7 + $0x14] sm:$0xf0]  ;;  %v2401_v14 = vld [vmem:[#allocation7 + $0xc] sm:$0xf]  ;;  %v3040_v28 = vld [vmem:[%s3166_s6] ss:$0 sm:$0xff] }
 0x50c   :  { %1494 = vmatpush.bf16.msra.mxu2 %v2175_v21  ;;  %1467 = vmatpush.bf16.msra.mxu1 %v2139_v56  ;;  %v2123_v9 = vor.u32 %v2403_v12, %v2122_v6  ;;  %v2127_v15 = vor.u32 %v2401_v14, %v2124_v33 }
 0x50d   :  { %1407 = vmatpush.bf16.msra.mxu3 %v2163_v11 }
 0x50e   :  { %1439 = vmatpush.bf16.msra.mxu0 %v2119_v7 }
 0x510   :  { %1495 = vmatpush.bf16.msra.mxu2 %v2159_v42  ;;  %1468 = vmatpush.bf16.msra.mxu1 %v2123_v9 }
 0x511   :  { %1408 = vmatpush.bf16.msra.mxu3 %v2147_v27 }
 0x514   :  { %1496 = vmatpush.bf16.msra.mxu2 %v2143_v62 }
 0x515   :  { %1409 = vmatpush.bf16.msra.mxu3 %v2131_v48 }
 0x518   :  { %1497 = vmatpush.bf16.msra.mxu2 %v2127_v15 }
 0x519   :  { %1410 = vmatpush.bf16.msra.mxu3 %v2115_v4 }
 0x555   :  { %v1056_v54 = vpop.xlane.xlu2 %1055  ;;  %v1028_v55 = vpop.xlane.xlu1 %1027 }
 0x556   :  { %v1071_v61 = vmul.f32 %v1056_v54, %v2788_v13  ;;  %v1037_v8 = vmul.f32 %v1028_v55, %v2788_v13 }
 0x558   :  { %v1079_v3 = vadd.f32 1e-05, %v1071_v61  ;;  %v3023_v18 = vsub.f32 %v2982_v53, %v1037_v8 }
 0x55a   :  { %2542 = vrsqrt.f32 %v1079_v3  ;;  %v1053_v11 = vmul.f32 %v3023_v18, %v3023_v18  ;;  %vm1093_vm13 = vweird.f32 %v1079_v3 }
 0x55c   :  { %1067 = vadd.xlane.f32.xlu1 %v1053_v11 }
 0x55d   :  { %v1030_v25 = vpop.xlane.xlu2 %1029  ;;  %v1058_v16 = vpop.xlane.xlu0 %1057 }
 0x55e   :  { %v1038_v17 = vmul.f32 %v1030_v25, %v2788_v13  ;;  %v1072_v19 = vmul.f32 %v1058_v16, %v2788_v13 }
 0x560   :  { %v2543_v20 = vpop.eup %2542  ;;  %v3030_v21 = vsub.f32 %v2991_v60, %v1038_v17  ;;  %v1080_v22 = vadd.f32 1e-05, %v1072_v19 }
 0x561   :  { %v1088_v23 = vmul.f32 %v2543_v20, %v1079_v3  ;;  %vm1094_vm12 = vweird.f32 %v2543_v20 }
 0x562   :  { %2544 = vrsqrt.f32 %v1080_v22  ;;  %v1054_v26 = vmul.f32 %v3030_v21, %v3030_v21  ;;  %vm1095_vm14 = vmor %vm1093_vm13, %vm1094_vm12  ;;  %vm1103_vm0 = vweird.f32 %v1080_v22 }
 0x563   :  { %v1089_v27 = vmul.f32 %v2543_v20, %v1088_v23 }
 0x564   :  { %1069 = vadd.xlane.f32.xlu2 %v1054_v26 }
 0x565   :  { %v1090_v29 = vmul.f32 0.5, %v1089_v27  ;;  %v1060_v31 = vpop.xlane.xlu0 %1059 }
 0x566   :  { %v1073_v32 = vmul.f32 %v1060_v31, %v2788_v13 }
 0x567   :  { %v1091_v34 = vsub.f32 1.5, %v1090_v29 }
 0x568   :  { %v2545_v37 = vpop.eup %2544  ;;  %v1081_v38 = vadd.f32 1e-05, %v1073_v32 }
 0x569   :  { %v1092_v39 = vmul.f32 %v2543_v20, %v1091_v34  ;;  %v1098_v42 = vmul.f32 %v2545_v37, %v1080_v22  ;;  %vm1104_vm15 = vweird.f32 %v2545_v37 }
 0x56a   :  { %2546 = vrsqrt.f32 %v1081_v38  ;;  %vm1105_vm1 = vmor %vm1103_vm0, %vm1104_vm15  ;;  %vm1113_vm3 = vweird.f32 %v1081_v38 }
 0x56b   :  { %v1099_v43 = vmul.f32 %v2545_v37, %v1098_v42  ;;  %v1096_v44 = vsel %vm1095_vm14, %v2543_v20, %v1092_v39 }
 0x56c   :  { %v1167_v54 = vmul.f32 %v1096_v44, %v2980_v50  ;;  %v3047_v50 = vld [vmem:[%s3167_s7] ss:$0 sm:$0xff] }
 0x56d   :  { %v1100_v47 = vmul.f32 0.5, %v1099_v43  ;;  %v1062_v48 = vpop.xlane.xlu1 %1061 }
 0x56e   :  { %v1074_v49 = vmul.f32 %v1062_v48, %v2788_v13  ;;  %v1178_v62 = vmul.f32 %v3040_v28, %v1167_v54 }
 0x56f   :  { %v1101_v51 = vsub.f32 1.5, %v1100_v47 }
 0x570   :  { %v2547_v52 = vpop.eup %2546  ;;  %v1082_v55 = vadd.f32 1e-05, %v1074_v49  ;;  %v1189_v7 = vadd.f32 %v3047_v50, %v1178_v62 }
 0x571   :  { %v1102_v56 = vmul.f32 %v2545_v37, %v1101_v51  ;;  %v1108_v58 = vmul.f32 %v2547_v52, %v1081_v38  ;;  %vm1114_vm2 = vweird.f32 %v2547_v52 }
 0x572   :  { %2548 = vrsqrt.f32 %v1082_v55  ;;  %vm1115_vm4 = vmor %vm1113_vm3, %vm1114_vm2  ;;  %vm1123_vm6 = vweird.f32 %v1082_v55 }
 0x573   :  { %v1106_v36 = vsel %vm1105_vm1, %v2545_v37, %v1102_v56  ;;  %v1109_v61 = vmul.f32 %v2547_v52, %v1108_v58 }
 0x574   :  { %v1168_v8 = vmul.f32 %v1106_v36, %v2989_v57 }
 0x575   :  { %v1110_v0 = vmul.f32 0.5, %v1109_v61  ;;  %v1064_v45 = vpop.xlane.xlu2 %1063 }
 0x576   :  { %v1075_v2 = vmul.f32 %v1064_v45, %v2788_v13  ;;  %v1179_v3 = vmul.f32 %v3040_v28, %v1168_v8  ;;  %v2446_v45 = vld [vmem:[#allocation8 + $0x70] sm:$0xff] }
 0x577   :  { %v1111_v4 = vsub.f32 1.5, %v1110_v0  ;;  %v2455_v0 = vld [vmem:[#allocation8 + $0xb8] sm:$0xff] }
 0x578   :  { %v2549_v5 = vpop.eup %2548  ;;  %v1083_v6 = vadd.f32 1e-05, %v1075_v2  ;;  %v1190_v57 = vadd.f32 %v3047_v50, %v1179_v3  ;;  %1885 = vmatpush.bf16.msrb.mxu1 %v2455_v0  ;;  %v2454_v2 = vld [vmem:[#allocation8 + $0xb0] sm:$0xff]  ;;  %v3066_v3 = vld [vmem:[#allocation8 + $0xf8] sm:$0xff] }
 0x579   :  { %v1112_v12 = vmul.f32 %v2547_v52, %v1111_v4  ;;  %v1118_v14 = vmul.f32 %v2549_v5, %v1082_v55  ;;  %vm1124_vm5 = vweird.f32 %v2549_v5  ;;  %v2445_v4 = vld [vmem:[#allocation8 + $0x68] sm:$0xff]  ;;  %1914 = vmatpush.bf16.msrb.mxu2 %v3066_v3 }
 0x57a   :  { %2550 = vrsqrt.f32 %v1083_v6  ;;  %v1197_v33 = vpack.c.bf16 %v1190_v57, %v1189_v7  ;;  %vm1125_vm7 = vmor %vm1123_vm6, %vm1124_vm5  ;;  %vm1133_vm9 = vweird.f32 %v1083_v6  ;;  %v2438_v57 = vld [vmem:[#allocation8 + $0x30] sm:$0xff] }
 0x57b   :  { %v1119_v11 = vmul.f32 %v2549_v5, %v1118_v14  ;;  %v1116_v9 = vsel %vm1115_vm4, %v2547_v52, %v1112_v12  ;;  %v3070_v12 = vld [vmem:[#allocation8 + $0xf0] sm:$0xff] }
 0x57c   :  { %1411 = vmatmul.bf16.vlgmr.msra.gmra.mxu3 %v1197_v33  ;;  %1440 = vmatmul.bf16.vlgmr.msra.gmra.mxu0 %v1197_v33  ;;  %v1169_v20 = vmul.f32 %v1116_v9, %v2998_v63  ;;  %v2437_v9 = vld [vmem:[#allocation8 + $0x28] sm:$0xff] }
 0x57d   :  { %v1120_v15 = vmul.f32 0.5, %v1119_v11  ;;  %1469 = vmatmul.bf16.vlgmr.msra.gmra.mxu1 %v1197_v33  ;;  %1498 = vmatmul.bf16.vlgmr.msra.gmra.mxu2 %v1197_v33  ;;  %v1066_v25 = vpop.xlane.xlu0 %1065  ;;  %v2444_v33 = vld [vmem:[#allocation8 + $0x60] sm:$0xff] }
 0x57e   :  { %v1076_v16 = vmul.f32 %v1066_v25, %v2788_v13  ;;  %v1180_v32 = vmul.f32 %v3040_v28, %v1169_v20  ;;  %1886 = vmatpush.bf16.msrb.mxu1 %v2454_v2  ;;  %v2452_v11 = vld [vmem:[#allocation8 + $0xa0] sm:$0xff]  ;;  %1915 = vmatpush.bf16.msrb.mxu2 %v3070_v12 }
 0x57f   :  { %v1121_v17 = vsub.f32 1.5, %v1120_v15  ;;  %v3073_v15 = vld [vmem:[#allocation8 + $0xe8] sm:$0xff] }
 0x580   :  { %v2551_v19 = vpop.eup %2550  ;;  %v1084_v22 = vadd.f32 1e-05, %v1076_v16  ;;  %v1191_v42 = vadd.f32 %v3047_v50, %v1180_v32  ;;  %v2435_v32 = vld [vmem:[#allocation8 + $0x18] sm:$0xff] }
 0x581   :  { %v1122_v23 = vmul.f32 %v2549_v5, %v1121_v17  ;;  %v1128_v26 = vmul.f32 %v2551_v19, %v1083_v6  ;;  %vm1134_vm8 = vweird.f32 %v2551_v19  ;;  %v2453_v6 = vld [vmem:[#allocation8 + $0xa8] sm:$0xff]  ;;  %v2443_v17 = vld [vmem:[#allocation8 + $0x58] sm:$0xff] }
 0x582   :  { %2552 = vrsqrt.f32 %v1084_v22  ;;  %vm1135_vm10 = vmor %vm1133_vm9, %vm1134_vm8  ;;  %vm1143_vm12 = vweird.f32 %v1084_v22  ;;  %1887 = vmatpush.bf16.msrb.mxu1 %v2453_v6  ;;  %1916 = vmatpush.bf16.msrb.mxu2 %v3073_v15 }
 0x583   :  { %v1126_v27 = vsel %vm1125_vm7, %v2549_v5, %v1122_v23  ;;  %v1129_v29 = vmul.f32 %v2551_v19, %v1128_v26  ;;  %v2436_v23 = vld [vmem:[#allocation8 + $0x20] sm:$0xff] }
 0x584   :  { %v1170_v31 = vmul.f32 %v1126_v27, %v3004_v1  ;;  %v3077_v26 = vld [vmem:[#allocation8 + $0xe0] sm:$0xff] }
 0x585   :  { %v1130_v34 = vmul.f32 0.5, %v1129_v29  ;;  %v2442_v29 = vld [vmem:[#allocation8 + $0x50] sm:$0xff] }
 0x586   :  { %v1181_v37 = vmul.f32 %v3040_v28, %v1170_v31  ;;  %1888 = vmatpush.bf16.msrb.mxu1 %v2452_v11  ;;  %1917 = vmatpush.bf16.msrb.mxu2 %v3077_v26  ;;  %v2450_v31 = vld [vmem:[#allocation8 + $0x90] sm:$0xff] }
 0x587   :  { %v1131_v38 = vsub.f32 1.5, %v1130_v34  ;;  %v2459_v34 = vld [vmem:[#allocation8 + $0xd8] sm:$0xff] }
 0x588   :  { %v2553_v39 = vpop.eup %2552  ;;  %v1192_v63 = vadd.f32 %v3047_v50, %v1181_v37 }
 0x589   :  { %v1132_v43 = vmul.f32 %v2551_v19, %v1131_v38  ;;  %v1138_v44 = vmul.f32 %v2553_v39, %v1084_v22  ;;  %vm1144_vm11 = vweird.f32 %v2553_v39  ;;  %v2441_v38 = vld [vmem:[#allocation8 + $0x48] sm:$0xff] }
 0x58a   :  { %v1198_v47 = vpack.c.bf16 %v1192_v63, %v1191_v42  ;;  %vm1145_vm13 = vmor %vm1143_vm12, %vm1144_vm11  ;;  %1918 = vmatpush.bf16.msrb.mxu2 %v2459_v34 }
 0x58b   :  { %v1139_v48 = vmul.f32 %v2553_v39, %v1138_v44  ;;  %v1136_v1 = vsel %vm1135_vm10, %v2551_v19, %v1132_v43  ;;  %v2451_v19 = vld [vmem:[#allocation8 + $0x98] sm:$0xff]  ;;  %v2434_v43 = vld [vmem:[#allocation8 + $0x10] sm:$0xff] }
 0x58c   :  { %1416 = vmatmul.bf16.gmra.mxu3 %v1198_v47  ;;  %1445 = vmatmul.bf16.gmra.mxu0 %v1198_v47  ;;  %v1171_v52 = vmul.f32 %v1136_v1, %v3010_v59  ;;  %v2447_v59 = vld [vmem:[#allocation8 + $0x78] sm:$0xff]  ;;  %v2458_v44 = vld [vmem:[#allocation8 + $0xd0] sm:$0xff]  ;;  %v2440_v1 = vld [vmem:[#allocation8 + $0x40] sm:$0xff] }
 0x58d   :  { %v1140_v49 = vmul.f32 0.5, %v1139_v48  ;;  %1474 = vmatmul.bf16.gmra.mxu1 %v1198_v47  ;;  %1503 = vmatmul.bf16.gmra.mxu2 %v1198_v47 }
 0x58e   :  { %v1182_v58 = vmul.f32 %v3040_v28, %v1171_v52  ;;  %1856 = vmatpush.bf16.msrb.mxu0 %v2447_v59  ;;  %1889 = vmatpush.bf16.msrb.mxu1 %v2451_v19  ;;  %v2433_v52 = vld [vmem:[#allocation8 + $0x8] sm:$0xff] }
 0x58f   :  { %v1141_v51 = vsub.f32 1.5, %v1140_v49  ;;  %1919 = vmatpush.bf16.msrb.mxu2 %v2458_v44  ;;  %v2448_v49 = vld [vmem:[#allocation8 + $0x80] sm:$0xff] }
 0x590   :  { %v1193_v61 = vadd.f32 %v3047_v50, %v1182_v58 }
 0x591   :  { %v1142_v54 = vmul.f32 %v2553_v39, %v1141_v51 }
 0x592   :  { %1857 = vmatpush.bf16.msrb.mxu0 %v2446_v45  ;;  %1890 = vmatpush.bf16.msrb.mxu1 %v2450_v31 }
 0x593   :  { %v1146_v55 = vsel %vm1145_vm13, %v2553_v39, %v1142_v54  ;;  %v2449_v39 = vld [vmem:[#allocation8 + $0x88] sm:$0xff] }
 0x594   :  { %v1172_v56 = vmul.f32 %v1146_v55, %v3016_v10  ;;  %v2439_v10 = vld [vmem:[#allocation8 + $0x38] sm:$0xff]  ;;  %v2457_v54 = vld [vmem:[#allocation8 + $0xc8] sm:$0xff] }
 0x595   :  { %1827 = vmatpush.bf16.msrb.mxu3 %v2439_v10  ;;  %1920 = vmatpush.bf16.msrb.mxu2 %v2457_v54 }
 0x596   :  { %v1183_v36 = vmul.f32 %v3040_v28, %v1172_v56  ;;  %1858 = vmatpush.bf16.msrb.mxu0 %v2445_v4  ;;  %1891 = vmatpush.bf16.msrb.mxu1 %v2449_v39 }
 0x598   :  { %v1194_v8 = vadd.f32 %v3047_v50, %v1183_v36 }
 0x599   :  { %1828 = vmatpush.bf16.msrb.mxu3 %v2438_v57 }
 0x59a   :  { %v1199_v62 = vpack.c.bf16 %v1194_v8, %v1193_v61  ;;  %1859 = vmatpush.bf16.msrb.mxu0 %v2444_v33  ;;  %1892 = vmatpush.bf16.msrb.mxu1 %v2448_v49  ;;  %v2432_v61 = vld [vmem:[#allocation8] sm:$0xff] }
 0x59b   :  { %v2456_v8 = vld [vmem:[#allocation8 + $0xc0] sm:$0xff] }
 0x59c   :  { %1421 = vmatmul.bf16.gmra.mxu3 %v1199_v62  ;;  %1450 = vmatmul.bf16.gmra.mxu0 %v1199_v62 }
 0x59d   :  { %1479 = vmatmul.bf16.gmra.mxu1 %v1199_v62  ;;  %1508 = vmatmul.bf16.gmra.mxu2 %v1199_v62 }
 0x59e   :  { %1829 = vmatpush.bf16.msrb.mxu3 %v2437_v9  ;;  %1860 = vmatpush.bf16.msrb.mxu0 %v2443_v17 }
 0x59f   :  { %1921 = vmatpush.bf16.msrb.mxu2 %v2456_v8 }
 0x5a2   :  { %1830 = vmatpush.bf16.msrb.mxu3 %v2436_v23  ;;  %1861 = vmatpush.bf16.msrb.mxu0 %v2442_v29 }
 0x5a6   :  { %1831 = vmatpush.bf16.msrb.mxu3 %v2435_v32  ;;  %1862 = vmatpush.bf16.msrb.mxu0 %v2441_v38 }
 0x5aa   :  { %1832 = vmatpush.bf16.msrb.mxu3 %v2434_v43  ;;  %1863 = vmatpush.bf16.msrb.mxu0 %v2440_v1 }
 0x5ae   :  { %1833 = vmatpush.bf16.msrb.mxu3 %v2433_v52 }
 0x5b2   :  { %1834 = vmatpush.bf16.msrb.mxu3 %v2432_v61 }
 0x5b6   :  { %2464 = vmatpush.bf16.msra.mxu3 %v3066_v3 }
 0x5ba   :  { %2465 = vmatpush.bf16.msra.mxu3 %v3070_v12 }
 0x5be   :  { %2466 = vmatpush.bf16.msra.mxu3 %v3073_v15 }
 0x5c2   :  { %2467 = vmatpush.bf16.msra.mxu3 %v3077_v26 }
 0x5c6   :  { %2468 = vmatpush.bf16.msra.mxu3 %v2459_v34 }
 0x5ca   :  { %2469 = vmatpush.bf16.msra.mxu3 %v2458_v44 }
 0x5ce   :  { %2470 = vmatpush.bf16.msra.mxu3 %v2457_v54 }
 0x5cf   :  { %v1068_v5 = vpop.xlane.xlu1 %1067 }
 0x5d0   :  { %v1077_v7 = vmul.f32 %v1068_v5, %v2788_v13 }
 0x5d2   :  { %v1085_v14 = vadd.f32 1e-05, %v1077_v7  ;;  %2471 = vmatpush.bf16.msra.mxu3 %v2456_v8 }
 0x5d4   :  { %2554 = vrsqrt.f32 %v1085_v14  ;;  %vm1153_vm15 = vweird.f32 %v1085_v14 }
 0x5d7   :  { %v1070_v25 = vpop.xlane.xlu2 %1069 }
 0x5d8   :  { %v1078_v16 = vmul.f32 %v1070_v25, %v2788_v13 }
 0x5da   :  { %v2555_v20 = vpop.eup %2554  ;;  %v1086_v22 = vadd.f32 1e-05, %v1078_v16 }
 0x5db   :  { %v1148_v27 = vmul.f32 %v2555_v20, %v1085_v14  ;;  %vm1154_vm14 = vweird.f32 %v2555_v20 }
 0x5dc   :  { %2556 = vrsqrt.f32 %v1086_v22  ;;  %vm1155_vm0 = vmor %vm1153_vm15, %vm1154_vm14  ;;  %vm1163_vm2 = vweird.f32 %v1086_v22 }
 0x5dd   :  { %v1149_v13 = vmul.f32 %v2555_v20, %v1148_v27 }
 0x5df   :  { %v1150_v37 = vmul.f32 0.5, %v1149_v13 }
 0x5e1   :  { %v1151_v42 = vsub.f32 1.5, %v1150_v37 }
 0x5e2   :  { %v2557_v63 = vpop.eup %2556 }
 0x5e3   :  { %v1152_v47 = vmul.f32 %v2555_v20, %v1151_v42  ;;  %v1158_v48 = vmul.f32 %v2557_v63, %v1086_v22  ;;  %vm1164_vm1 = vweird.f32 %v2557_v63 }
 0x5e4   :  { %vm1165_vm3 = vmor %vm1163_vm2, %vm1164_vm1 }
 0x5e5   :  { %v1159_v51 = vmul.f32 %v2557_v63, %v1158_v48  ;;  %v1156_v55 = vsel %vm1155_vm0, %v2555_v20, %v1152_v47 }
 0x5e6   :  { %v1173_v36 = vmul.f32 %v1156_v55, %v3023_v18 }
 0x5e7   :  { %v1160_v56 = vmul.f32 0.5, %v1159_v51 }
 0x5e8   :  { %v1184_v45 = vmul.f32 %v3040_v28, %v1173_v36 }
 0x5e9   :  { %v1161_v58 = vsub.f32 1.5, %v1160_v56 }
 0x5ea   :  { %v1195_v18 = vadd.f32 %v3047_v50, %v1184_v45 }
 0x5eb   :  { %v1162_v62 = vmul.f32 %v2557_v63, %v1161_v58 }
 0x5ed   :  { %v1166_v59 = vsel %vm1165_vm3, %v2557_v63, %v1162_v62 }
 0x5ee   :  { %v1174_v0 = vmul.f32 %v1166_v59, %v3030_v21  ;;  %v1233_v21 = vld [vmem:[%s3169_s9] sm:$0xf] }
 0x5ef   :  { %v3093_v5 = vperm.slane %v1233_v21, 1  ;;  %v3095_v6 = vperm.slane %v1233_v21, 2  ;;  %v3099_v33 = vperm.slane %v1233_v21, 0  ;;  %v3102_v15 = vperm.slane %v1233_v21, 3 }
 0x5f0   :  { %v1185_v2 = vmul.f32 %v3040_v28, %v1174_v0 }
 0x5f2   :  { %v1196_v10 = vadd.f32 %v3047_v50, %v1185_v2 }
 0x5f4   :  { %v1200_v4 = vpack.c.bf16 %v1196_v10, %v1195_v18 }
 0x5f6   :  { %1426 = vmatmul.bf16.gmra.mxu3 %v1200_v4  ;;  %1455 = vmatmul.bf16.gmra.mxu0 %v1200_v4 }
 0x5f7   :  { %1484 = vmatmul.bf16.gmra.mxu1 %v1200_v4  ;;  %1513 = vmatmul.bf16.gmra.mxu2 %v1200_v4 }
 0x5f9   :  { %v1441_v3 = vpop.f32.mrf.mxu0 }
 0x5fa   :  { %v1470_v28 = vpop.f32.mrf.mxu1  ;;  %v1442_v7 = vadd.f32 %v1441_v3, %v3093_v5 }
 0x5fb   :  { %v1471_v12 = vadd.f32 %v1470_v28, %v3095_v6 }
 0x5fc   :  { %v1520_v16 = vmax.f32 %v1442_v7, 0.0 }
 0x5fd   :  { %v1521_v19 = vmax.f32 %v1471_v12, 0.0 }
 0x5ff   :  { %v1412_v50 = vpop.f32.mrf.mxu3 }
 0x600   :  { %v1499_v57 = vpop.f32.mrf.mxu2  ;;  %v1413_v22 = vadd.f32 %v1412_v50, %v3099_v33 }
 0x601   :  { %v1443_v14 = vpop.f32.mrf.mxu0  ;;  %v1500_v26 = vadd.f32 %v1499_v57, %v3102_v15 }
 0x602   :  { %v1444_v11 = vadd.f32 %v1443_v14, %v3093_v5  ;;  %v1472_v9 = vpop.f32.mrf.mxu1  ;;  %v1519_v37 = vmax.f32 %v1413_v22, 0.0 }
 0x603   :  { %v1473_v25 = vadd.f32 %v1472_v9, %v3095_v6  ;;  %v1522_v42 = vmax.f32 %v1500_v26, 0.0 }
 0x604   :  { %v1524_v17 = vmax.f32 %v1444_v11, 0.0 }
 0x605   :  { %v1525_v20 = vmax.f32 %v1473_v25, 0.0 }
 0x606   :  { %v1552_v23 = vpack.c.bf16 %v1524_v17, %v1520_v16 }
 0x607   :  { %v1553_v27 = vpack.c.bf16 %v1525_v20, %v1521_v19  ;;  %v1414_v29 = vpop.f32.mrf.mxu3 }
 0x608   :  { %v1415_v31 = vadd.f32 %v1414_v29, %v3099_v33  ;;  %v1501_v13 = vpop.f32.mrf.mxu2  ;;  %1864 = vmatmul.bf16.vlgmr.msrb.gmra.mxu0 %v1552_v23 }
 0x609   :  { %v1502_v32 = vadd.f32 %v1501_v13, %v3102_v15  ;;  %1893 = vmatmul.bf16.vlgmr.msrb.gmra.mxu1 %v1553_v27  ;;  %v1446_v34 = vpop.f32.mrf.mxu0 }
 0x60a   :  { %v1523_v38 = vmax.f32 %v1415_v31, 0.0  ;;  %v1475_v39 = vpop.f32.mrf.mxu1  ;;  %v1447_v48 = vadd.f32 %v1446_v34, %v3093_v5 }
 0x60b   :  { %v1526_v63 = vmax.f32 %v1502_v32, 0.0  ;;  %v1476_v49 = vadd.f32 %v1475_v39, %v3095_v6 }
 0x60c   :  { %v1551_v43 = vpack.c.bf16 %v1523_v38, %v1519_v37  ;;  %v1528_v56 = vmax.f32 %v1447_v48, 0.0 }
 0x60d   :  { %v1554_v44 = vpack.c.bf16 %v1526_v63, %v1522_v42  ;;  %v1529_v36 = vmax.f32 %v1476_v49, 0.0 }
 0x60e   :  { %1835 = vmatmul.bf16.vlgmr.msrb.gmra.mxu3 %v1551_v43 }
 0x60f   :  { %1922 = vmatmul.bf16.vlgmr.msrb.gmra.mxu2 %v1554_v44  ;;  %v1417_v47 = vpop.f32.mrf.mxu3 }
 0x610   :  { %v1504_v1 = vpop.f32.mrf.mxu2  ;;  %v1418_v8 = vadd.f32 %v1417_v47, %v3099_v33 }
 0x611   :  { %v1448_v51 = vpop.f32.mrf.mxu0  ;;  %v1505_v59 = vadd.f32 %v1504_v1, %v3102_v15 }
 0x612   :  { %v1449_v52 = vadd.f32 %v1448_v51, %v3093_v5  ;;  %v1477_v54 = vpop.f32.mrf.mxu1  ;;  %v1527_v21 = vmax.f32 %v1418_v8, 0.0 }
 0x613   :  { %v1478_v55 = vadd.f32 %v1477_v54, %v3095_v6  ;;  %v1530_v50 = vmax.f32 %v1505_v59, 0.0 }
 0x614   :  { %v1532_v58 = vmax.f32 %v1449_v52, 0.0 }
 0x615   :  { %v1533_v61 = vmax.f32 %v1478_v55, 0.0 }
 0x616   :  { %v1556_v62 = vpack.c.bf16 %v1532_v58, %v1528_v56 }
 0x617   :  { %v1419_v0 = vpop.f32.mrf.mxu3  ;;  %v1557_v45 = vpack.c.bf16 %v1533_v61, %v1529_v36 }
 0x618   :  { %v1420_v2 = vadd.f32 %v1419_v0, %v3099_v33  ;;  %v1506_v18 = vpop.f32.mrf.mxu2  ;;  %1869 = vmatmul.bf16.gmra.mxu0 %v1556_v62 }
 0x619   :  { %v1507_v10 = vadd.f32 %v1506_v18, %v3102_v15  ;;  %1898 = vmatmul.bf16.gmra.mxu1 %v1557_v45  ;;  %v1451_v4 = vpop.f32.mrf.mxu0 }
 0x61a   :  { %v1531_v3 = vmax.f32 %v1420_v2, 0.0  ;;  %v1480_v28 = vpop.f32.mrf.mxu1  ;;  %v1452_v11 = vadd.f32 %v1451_v4, %v3093_v5 }
 0x61b   :  { %v1534_v7 = vmax.f32 %v1507_v10, 0.0  ;;  %v1481_v25 = vadd.f32 %v1480_v28, %v3095_v6 }
 0x61c   :  { %v1555_v57 = vpack.c.bf16 %v1531_v3, %v1527_v21  ;;  %v1536_v22 = vmax.f32 %v1452_v11, 0.0 }
 0x61d   :  { %v1558_v12 = vpack.c.bf16 %v1534_v7, %v1530_v50  ;;  %v1537_v26 = vmax.f32 %v1481_v25, 0.0 }
 0x61e   :  { %1840 = vmatmul.bf16.gmra.mxu3 %v1555_v57  ;;  %v3135_v57 = vld [vmem:[%s3171_s11] ss:$0 sm:$0xff]  ;;  %s2707_s11 = smov [#allocation10]  }
 0x61f   :  { %1927 = vmatmul.bf16.gmra.mxu2 %v1558_v12  ;;  %v1422_v14 = vpop.f32.mrf.mxu3  ;;  %s1963_s30 = sshll.u32 %s2707_s11, 4  ;;  %s1964_s30 = int_to_ptr.vmem [resolvable:$true] %s1963_s30 }
 0x620   :  { %v1509_v9 = vpop.f32.mrf.mxu2  ;;  %v1423_v29 = vadd.f32 %v1422_v14, %v3099_v33 }
 0x621   :  { %v1453_v16 = vpop.f32.mrf.mxu0  ;;  %v1510_v13 = vadd.f32 %v1509_v9, %v3102_v15 }
 0x622   :  { %v1454_v17 = vadd.f32 %v1453_v16, %v3093_v5  ;;  %v1482_v19 = vpop.f32.mrf.mxu1  ;;  %v1535_v42 = vmax.f32 %v1423_v29, 0.0 }
 0x623   :  { %v1483_v20 = vadd.f32 %v1482_v19, %v3095_v6  ;;  %v1538_v43 = vmax.f32 %v1510_v13, 0.0 }
 0x624   :  { %v1540_v23 = vmax.f32 %v1454_v17, 0.0 }
 0x625   :  { %v1541_v27 = vmax.f32 %v1483_v20, 0.0 }
 0x626   :  { %v1560_v31 = vpack.c.bf16 %v1540_v23, %v1536_v22 }
 0x627   :  { %v1424_v32 = vpop.f32.mrf.mxu3  ;;  %v1561_v34 = vpack.c.bf16 %v1541_v27, %v1537_v26 }
 0x628   :  { %v1425_v37 = vadd.f32 %v1424_v32, %v3099_v33  ;;  %v1511_v38 = vpop.f32.mrf.mxu2  ;;  %1874 = vmatmul.bf16.gmra.mxu0 %v1560_v31 }
 0x629   :  { %v1512_v39 = vadd.f32 %v1511_v38, %v3102_v15  ;;  %1903 = vmatmul.bf16.gmra.mxu1 %v1561_v34 }
 0x62a   :  { %v1539_v63 = vmax.f32 %v1425_v37, 0.0 }
 0x62b   :  { %v1542_v44 = vmax.f32 %v1512_v39, 0.0 }
 0x62c   :  { %v1559_v47 = vpack.c.bf16 %v1539_v63, %v1535_v42 }
 0x62d   :  { %v1562_v48 = vpack.c.bf16 %v1542_v44, %v1538_v43 }
 0x62e   :  { %1845 = vmatmul.bf16.gmra.mxu3 %v1559_v47 }
 0x62f   :  { %1932 = vmatmul.bf16.gmra.mxu2 %v1562_v48 }
 0x673   :  { %v1456_v1 = vpop.f32.mrf.mxu0 }
 0x674   :  { %v1485_v49 = vpop.f32.mrf.mxu1  ;;  %v1457_v52 = vadd.f32 %v1456_v1, %v3093_v5 }
 0x675   :  { %v1486_v54 = vadd.f32 %v1485_v49, %v3095_v6 }
 0x676   :  { %v1544_v61 = vmax.f32 %v1457_v52, 0.0 }
 0x677   :  { %v1545_v62 = vmax.f32 %v1486_v54, 0.0 }
 0x679   :  { %v1427_v51 = vpop.f32.mrf.mxu3 }
 0x67a   :  { %v1428_v0 = vadd.f32 %v1427_v51, %v3099_v33  ;;  %v1514_v45 = vpop.f32.mrf.mxu2 }
 0x67b   :  { %v1458_v55 = vpop.f32.mrf.mxu0  ;;  %v1515_v12 = vadd.f32 %v1514_v45, %v3102_v15 }
 0x67c   :  { %v1459_v56 = vadd.f32 %v1458_v55, %v3093_v5  ;;  %v1487_v58 = vpop.f32.mrf.mxu1  ;;  %v1543_v21 = vmax.f32 %v1428_v0, 0.0 }
 0x67d   :  { %v1488_v36 = vadd.f32 %v1487_v58, %v3095_v6  ;;  %v1546_v16 = vmax.f32 %v1515_v12, 0.0 }
 0x67e   :  { %v1548_v8 = vmax.f32 %v1459_v56, 0.0 }
 0x67f   :  { %v1549_v59 = vmax.f32 %v1488_v36, 0.0 }
 0x680   :  { %v1564_v2 = vpack.c.bf16 %v1548_v8, %v1544_v61 }
 0x681   :  { %v1565_v18 = vpack.c.bf16 %v1549_v59, %v1545_v62  ;;  %v1429_v10 = vpop.f32.mrf.mxu3 }
 0x682   :  { %v1430_v4 = vadd.f32 %v1429_v10, %v3099_v33  ;;  %1879 = vmatmul.bf16.gmra.mxu0 %v1564_v2  ;;  %v1516_v6 = vpop.f32.mrf.mxu2 }
 0x683   :  { %1908 = vmatmul.bf16.gmra.mxu1 %v1565_v18  ;;  %v1517_v7 = vadd.f32 %v1516_v6, %v3102_v15 }
 0x684   :  { %v1547_v3 = vmax.f32 %v1430_v4, 0.0 }
 0x685   :  { %v1865_v28 = vpop.f32.mrf.mxu0  ;;  %v1550_v33 = vmax.f32 %v1517_v7, 0.0 }
 0x686   :  { %v1563_v5 = vpack.c.bf16 %v1547_v3, %v1543_v21  ;;  %v1894_v50 = vpop.f32.mrf.mxu1 }
 0x687   :  { %v1566_v20 = vpack.c.bf16 %v1550_v33, %v1546_v16 }
 0x688   :  { %1850 = vmatmul.bf16.gmra.mxu3 %v1563_v5 }
 0x68d   :  { %v1867_v25 = vpop.f32.mrf.mxu0 }
 0x68e   :  { %v1896_v19 = vpop.f32.mrf.mxu1 }
 0x691   :  { %v1836_v14 = vpop.f32.mrf.mxu3 }
 0x692   :  { %v1837_v11 = vadd.f32 %v3135_v57, %v1836_v14  ;;  %v1923_v9 = vpop.f32.mrf.mxu2 }
 0x694   :  { %v1866_v17 = vadd.f32 %v1865_v28, %v1837_v11 }
 0x695   :  { %v1870_v13 = vpop.f32.mrf.mxu0 }
 0x696   :  { %v1895_v22 = vadd.f32 %v1894_v50, %v1866_v17  ;;  %v1899_v34 = vpop.f32.mrf.mxu1 }
 0x698   :  { %v1924_v23 = vadd.f32 %v1923_v9, %v1895_v22  ;;  %1937 = vmatmul.bf16.vlgmr.msra.gmra.mxu3 %v1566_v20 }
 0x699   :  { %v1838_v26 = vpop.f32.mrf.mxu3 }
 0x69a   :  { %v1943_v27 = vadd.f32 %v1924_v23, %v2960_v30  ;;  %v1839_v29 = vadd.f32 %v3135_v57, %v1838_v26  ;;  %v1925_v31 = vpop.f32.mrf.mxu2 }
 0x69c   :  { %1951 = vst [vmem:[#allocation10] sm:$0xff] %v1943_v27  ;;  %v1868_v15 = vadd.f32 %v1867_v25, %v1839_v29 }
 0x69d   :  { %v1872_v47 = vpop.f32.mrf.mxu0 }
 0x69e   :  { %v1897_v32 = vadd.f32 %v1896_v19, %v1868_v15  ;;  %v1901_v48 = vpop.f32.mrf.mxu1 }
 0x6a0   :  { %v1926_v37 = vadd.f32 %v1925_v31, %v1897_v32 }
 0x6a1   :  { %v1841_v38 = vpop.f32.mrf.mxu3 }
 0x6a2   :  { %v1944_v39 = vadd.f32 %v1926_v37, %v2963_v24  ;;  %v1842_v42 = vadd.f32 %v3135_v57, %v1841_v38  ;;  %v1928_v63 = vpop.f32.mrf.mxu2 }
 0x6a4   :  { %1952 = vst [vmem:[#allocation10 + $0x8] sm:$0xff] %v1944_v39  ;;  %v1871_v43 = vadd.f32 %v1870_v13, %v1842_v42 }
 0x6a5   :  { %v1875_v24 = vpop.f32.mrf.mxu0 }
 0x6a6   :  { %v1900_v44 = vadd.f32 %v1899_v34, %v1871_v43  ;;  %v1904_v8 = vpop.f32.mrf.mxu1 }
 0x6a8   :  { %v1929_v30 = vadd.f32 %v1928_v63, %v1900_v44 }
 0x6a9   :  { %v1843_v1 = vpop.f32.mrf.mxu3 }
 0x6aa   :  { %v1945_v49 = vadd.f32 %v1929_v30, %v2966_v41  ;;  %v1844_v51 = vadd.f32 %v3135_v57, %v1843_v1  ;;  %v1930_v52 = vpop.f32.mrf.mxu2 }
 0x6ac   :  { %1953 = vst [vmem:[#allocation10 + $0x10] sm:$0xff] %v1945_v49  ;;  %v1873_v54 = vadd.f32 %v1872_v47, %v1844_v51 }
 0x6ad   :  { %v1877_v10 = vpop.f32.mrf.mxu0 }
 0x6ae   :  { %v1902_v55 = vadd.f32 %v1901_v48, %v1873_v54  ;;  %v1906_v21 = vpop.f32.mrf.mxu1 }
 0x6b0   :  { %v1931_v56 = vadd.f32 %v1930_v52, %v1902_v55 }
 0x6b1   :  { %v1846_v58 = vpop.f32.mrf.mxu3 }
 0x6b2   :  { %v1946_v36 = vadd.f32 %v1931_v56, %v2969_v35  ;;  %v1847_v61 = vadd.f32 %v3135_v57, %v1846_v58  ;;  %v1933_v59 = vpop.f32.mrf.mxu2 }
 0x6b4   :  { %1954 = vst [vmem:[#allocation10 + $0x18] sm:$0xff] %v1946_v36  ;;  %v1876_v62 = vadd.f32 %v1875_v24, %v1847_v61 }
 0x6b6   :  { %v1905_v0 = vadd.f32 %v1904_v8, %v1876_v62 }
 0x6b8   :  { %v1934_v45 = vadd.f32 %v1933_v59, %v1905_v0 }
 0x6b9   :  { %v1848_v41 = vpop.f32.mrf.mxu3 }
 0x6ba   :  { %v1947_v2 = vadd.f32 %v1934_v45, %v2972_v40  ;;  %v1849_v18 = vadd.f32 %v3135_v57, %v1848_v41  ;;  %v1935_v5 = vpop.f32.mrf.mxu2 }
 0x6bc   :  { %1955 = vst [vmem:[#allocation10 + $0x20] sm:$0xff] %v1947_v2  ;;  %v1878_v4 = vadd.f32 %v1877_v10, %v1849_v18 }
 0x6be   :  { %v1907_v3 = vadd.f32 %v1906_v21, %v1878_v4 }
 0x6c0   :  { %v1936_v35 = vadd.f32 %v1935_v5, %v1907_v3 }
 0x6c2   :  { %v1948_v28 = vadd.f32 %v1936_v35, %v2975_v46 }
 0x6c4   :  { %1956 = vst [vmem:[#allocation10 + $0x28] sm:$0xff] %v1948_v28 }
 0x6ff   :  { %v1880_v7 = vpop.f32.mrf.mxu0 }
 0x700   :  { %v1909_v33 = vpop.f32.mrf.mxu1 }
 0x707   :  { %v1882_v16 = vpop.f32.mrf.mxu0 }
 0x708   :  { %v1911_v20 = vpop.f32.mrf.mxu1 }
 0x70b   :  { %v1851_v6 = vpop.f32.mrf.mxu3 }
 0x70c   :  { %v1852_v50 = vadd.f32 %v3135_v57, %v1851_v6 }
 0x70e   :  { %v1881_v14 = vadd.f32 %v1880_v7, %v1852_v50 }
 0x710   :  { %v1910_v11 = vadd.f32 %v1909_v33, %v1881_v14 }
 0x713   :  { %v1853_v12 = vpop.f32.mrf.mxu3 }
 0x714   :  { %v1854_v40 = vadd.f32 %v3135_v57, %v1853_v12 }
 0x716   :  { %v1883_v17 = vadd.f32 %v1882_v16, %v1854_v40 }
 0x718   :  { %v1912_v46 = vadd.f32 %v1911_v20, %v1883_v17 }
 0x71b   :  { %v1938_v9 = vpop.f32.mrf.mxu3 }
 0x71c   :  { %v1939_v25 = vadd.f32 %v1938_v9, %v1910_v11 }
 0x71e   :  { %v1949_v19 = vadd.f32 %v1939_v25, %v2982_v53 }
 0x720   :  { %1957 = vst [vmem:[#allocation10 + $0x30] sm:$0xff] %v1949_v19 }
 0x723   :  { %v1940_v22 = vpop.f32.mrf.mxu3 }
 0x724   :  { %v1941_v23 = vadd.f32 %v1940_v22, %v1912_v46 }
 0x726   :  { %v1950_v57 = vadd.f32 %v1941_v23, %v2991_v60 }
 0x728   :  { %1958 = vst [vmem:[#allocation10 + $0x38] sm:$0xff] %v1950_v57 }
 0x729   :  { %1971 = dma.vmem_to_hbm [thread:$0]  %s1964_s30, 1024, %s1966_s13, [#allocation4], %s2698_s15, %s2698_s15, %s2699_s16  }
 0x72a   :  { %2692 = dma.done.wait [#allocation4], 1024  }
 0x72b   :  { %2693 = vsyncadd [#allocation4], 4294966272 }
 0x72c   :  { %1976 = vsyncpa [#allocation3], 1 }
 0x72d   :  { %1977 = vsyncpa [#allocation6], 1 }
 0x72e   :  { %1978 = vsyncpa [#allocation9], 1 }
 0x72f   :  { %1979 = vsyncpa [#allocation4], 1 }

// kernel: tpu_custom_call.1
= control target key start
LH: loop header
LB: loop body
LE: loop exit
PB: predicated region body
PF: predicated region fallthrough
CT: control target
= control target key end

     0   :  { %17 = vsyncpa [#allocation3], 0  ;;  %s3262_s0 = inlined_call_operand.hbm [shape: f32[4,16,128], index: 0, kind: input, shape index: {}]   ;;  %s3263_s1 = inlined_call_operand.hbm [shape: bf16[128,384], index: 1, kind: input, shape index: {}]   ;;  %s3264_s2 = inlined_call_operand.hbm [shape: bf16[128,128], index: 2, kind: input, shape index: {}]   ;;  %s3265_s3 = inlined_call_operand.vmem [shape: f32[1,128], index: 3, kind: input, shape index: {}]   ;;  %s3266_s4 = inlined_call_operand.vmem [shape: f32[1,128], index: 4, kind: input, shape index: {}]   ;;  %s3267_s5 = inlined_call_operand.vmem [shape: f32[1,128], index: 5, kind: input, shape index: {}]   ;;  %s3268_s6 = inlined_call_operand.hbm [shape: f32[1,128], index: 6, kind: input, shape index: {}]   ;;  %s3269_s7 = inlined_call_operand.hbm [shape: f32[1,128], index: 7, kind: input, shape index: {}]   ;;  %s3270_s8 = inlined_call_operand.hbm [shape: bf16[128,512], index: 8, kind: input, shape index: {}]   ;;  %s3271_s9 = inlined_call_operand.vmem [shape: f32[1,512], index: 9, kind: input, shape index: {}]   ;;  %s3272_s10 = inlined_call_operand.hbm [shape: bf16[512,128], index: 10, kind: input, shape index: {}]   ;;  %s3273_s11 = inlined_call_operand.vmem [shape: f32[1,128], index: 11, kind: input, shape index: {}]   ;;  %s3274_s12 = inlined_call_operand.hbm [shape: f32[4,16,128], index: 12, kind: output, shape index: {}]  }
   0x1   :  { %18 = vsyncpa [#allocation6], 0 }
   0x2   :  { %19 = vsyncpa [#allocation9], 0 }
   0x3   :  { %20 = vsyncpa [#allocation12], 0  ;;  %s39_s23 = sshll.u32 %s3263_s1, 4  ;;  %s40_s23 = int_to_ptr.hbm [resolvable:$true] %s39_s23 }
   0x4   :  { %21 = vsyncpa [#allocation4], 0  ;;  %s2814_s24 = smov [#allocation5]   ;;  %s72_s28 = sshll.u32 %s3268_s6, 4  ;;  %s73_s28 = int_to_ptr.hbm [resolvable:$true] %s72_s28 }
   0x5   :  { %s41_s25 = sshll.u32 %s2814_s24, 4  ;;  %s2815_s29 = smov 192   ;;  %s42_s25 = int_to_ptr.vmem [resolvable:$true] %s41_s25 }
   0x6   :  { %s2816_s30 = smov 12   ;;  %s2817_s13 = smov [#allocation8]  }
   0x7   :  { %47 = dma.hbm_to_vmem [thread:$0]  %s40_s23, 3072, %s42_s25, [#allocation6], %s2815_s29, %s2815_s29, %s2816_s30  }
   0x8   :  { %s74_s14 = sshll.u32 %s2817_s13, 4  ;;  %s93_s17 = sshll.u32 %s3270_s8, 4  ;;  %s75_s14 = int_to_ptr.vmem [resolvable:$true] %s74_s14  ;;  %s94_s17 = int_to_ptr.hbm [resolvable:$true] %s93_s17 }
   0x9   :  { %77 = dma.hbm_to_vmem [thread:$0]  %s73_s28, 16, %s75_s14, [#allocation9]  }
   0xa   :  { %s2818_s1 = smov [#allocation11]   ;;  %s26_s6 = sshll.u32 %s3262_s0, 4  ;;  %s27_s6 = int_to_ptr.hbm [resolvable:$true] %s26_s6 }
   0xb   :  { %s95_s18 = sshll.u32 %s2818_s1, 4  ;;  %s2819_s21 = smov 256   ;;  %s96_s18 = int_to_ptr.vmem [resolvable:$true] %s95_s18 }
   0xc   :  { %s2820_s22 = smov 16   ;;  %s2821_s23 = smov [#allocation2]  }
   0xd   :  { %101 = dma.hbm_to_vmem [thread:$0]  %s94_s17, 4096, %s96_s18, [#allocation12], %s2819_s21, %s2819_s21, %s2820_s22  }
   0xe   :  { %s28_s24 = sshll.u32 %s2821_s23, 4  ;;  %s2822_s25 = smov 128   ;;  %s29_s24 = int_to_ptr.vmem [resolvable:$true] %s28_s24 }
   0xf   :  { %s2823_s26 = smov 8   ;;  %s52_s28 = sshll.u32 %s3264_s2, 4  ;;  %s53_s28 = int_to_ptr.hbm [resolvable:$true] %s52_s28 }
  0x10   :  { %34 = dma.hbm_to_vmem [thread:$0]  %s27_s6, 1024, %s29_s24, [#allocation3], %s2822_s25, %s2822_s25, %s2823_s26  }
  0x11   :  { %s2824_s29 = smov [#allocation7]   ;;  %s83_s14 = sshll.u32 %s3269_s7, 4  ;;  %s84_s14 = int_to_ptr.hbm [resolvable:$true] %s83_s14 }
  0x12   :  { %s54_s0 = sshll.u32 %s2824_s29, 4  ;;  %s2825_s15 = smov 64   ;;  %s55_s0 = int_to_ptr.vmem [resolvable:$true] %s54_s0 }
  0x13   :  { %s2826_s16 = smov 4   ;;  %s2827_s17 = smov [#allocation10]  }
  0x14   :  { %60 = dma.hbm_to_vmem [thread:$0]  %s53_s28, 1024, %s55_s0, [#allocation6], %s2825_s15, %s2825_s15, %s2826_s16  }
  0x15   :  { %s85_s1 = sshll.u32 %s2827_s17, 4  ;;  %s108_s20 = sshll.u32 %s3272_s10, 4  ;;  %s86_s1 = int_to_ptr.vmem [resolvable:$true] %s85_s1  ;;  %s109_s20 = int_to_ptr.hbm [resolvable:$true] %s108_s20 }
  0x16   :  { %88 = dma.hbm_to_vmem [thread:$0]  %s84_s14, 16, %s86_s1, [#allocation9]  }
  0x17   :  { %s2828_s2 = smov [#allocation13]  }
  0x18   :  { %s110_s6 = sshll.u32 %s2828_s2, 4  ;;  %s111_s6 = int_to_ptr.vmem [resolvable:$true] %s110_s6 }
  0x19   :  { %116 = dma.hbm_to_vmem [thread:$0]  %s109_s20, 4096, %s111_s6, [#allocation12], %s2825_s15, %s2825_s15, %s2826_s16  }
  0x1a   :  { %2804 = dma.done.wait [#allocation3], 1024  }
  0x1b   :  { %2805 = vsyncadd [#allocation3], 4294966272 }
  0x1c   :  { %2806 = dma.done.wait [#allocation6], 4096  }
  0x1d   :  { %2807 = vsyncadd [#allocation6], 4294963200 }
  0x1e   :  { %2808 = dma.done.wait [#allocation9], 32  }
  0x1f   :  { %2809 = vsyncadd [#allocation9], 4294967264 }
  0x20   :  { %2810 = dma.done.wait [#allocation12], 8192  }
  0x21   :  { %2811 = vsyncadd [#allocation12], 4294959104  ;;  %v152_v0 = vld [vmem:[#allocation2 + $0x20] sm:$0xff]  ;;  %v150_v1 = vld [vmem:[#allocation2 + $0x10] sm:$0xff]  ;;  %v2829_v7 = vmov 128.0   ;;  %s2007_s29 = sshll.u32 %s3274_s12, 4  ;;  %s2008_s29 = int_to_ptr.hbm [resolvable:$true] %s2007_s29 }
  0x22   :  { %v148_v2 = vld [vmem:[#allocation2] sm:$0xff]  ;;  %166 = vadd.xlane.f32.xlu2 %v152_v0  ;;  %162 = vadd.xlane.f32.xlu1 %v150_v1  ;;  %v153_v3 = vld [vmem:[#allocation2 + $0x28] sm:$0xff]  ;;  %v151_v4 = vld [vmem:[#allocation2 + $0x18] sm:$0xff]  ;;  %2538 = vrcp.f32 %v2829_v7 }
  0x23   :  { %158 = vadd.xlane.f32.xlu0 %v148_v2  ;;  %v149_v5 = vld [vmem:[#allocation2 + $0x8] sm:$0xff]  ;;  %v154_v6 = vld [vmem:[#allocation2 + $0x30] sm:$0xff]  ;;  %v2937_v30 = vld [vmem:[#allocation2 + $0x38] sm:$0xff] }
  0x24   :  { %v2109_v43 = vld [vmem:[#allocation5 + $0xa8] sm:$0xf]  ;;  %v2433_v44 = vld [vmem:[#allocation5 + $0xb0] sm:$0xf0]  ;;  %v2432_v45 = vld [vmem:[#allocation5 + $0xac] sm:$0xf] }
  0x25   :  { %v2110_v46 = vor.u32 %v2433_v44, %v2109_v43  ;;  %v2111_v47 = vld [vmem:[#allocation5 + $0xb4] sm:$0xf0]  ;;  %v2117_v48 = vld [vmem:[#allocation5 + $0xb0] sm:$0xf]  ;;  %v2434_v49 = vld [vmem:[#allocation5 + $0xb8] sm:$0xf0] }
  0x26   :  { %v2114_v50 = vor.u32 %v2432_v45, %v2111_v47  ;;  %v2118_v51 = vor.u32 %v2434_v49, %v2117_v48  ;;  %v2097_v52 = vld [vmem:[#allocation5 + $0x90] sm:$0xf]  ;;  %v2430_v53 = vld [vmem:[#allocation5 + $0x98] sm:$0xf0]  ;;  %v2429_v54 = vld [vmem:[#allocation5 + $0x94] sm:$0xf] }
  0x27   :  { %511 = vmatpush.bf16.msra.mxu0 %v2110_v46  ;;  %v2098_v55 = vor.u32 %v2430_v53, %v2097_v52  ;;  %v2099_v56 = vld [vmem:[#allocation5 + $0x9c] sm:$0xf0]  ;;  %v2105_v57 = vld [vmem:[#allocation5 + $0x98] sm:$0xf]  ;;  %v2431_v58 = vld [vmem:[#allocation5 + $0xa0] sm:$0xf0] }
  0x28   :  { %v2539_v8 = vpop.eup %2538  ;;  %540 = vmatpush.bf16.msra.mxu1 %v2114_v50  ;;  %569 = vmatpush.bf16.msra.mxu2 %v2118_v51  ;;  %v2102_v59 = vor.u32 %v2429_v54, %v2099_v56  ;;  %v2106_v60 = vor.u32 %v2431_v58, %v2105_v57  ;;  %v2085_v61 = vld [vmem:[#allocation5 + $0x78] sm:$0xf]  ;;  %v2427_v62 = vld [vmem:[#allocation5 + $0x80] sm:$0xf0]  ;;  %v2426_v63 = vld [vmem:[#allocation5 + $0x7c] sm:$0xf] }
  0x29   :  { %v175_v9 = vmul.f32 128.0, %v2539_v8  ;;  %vm179_vm0 = vweird.f32 %v2539_v8  ;;  %v2424_v7 = vld [vmem:[#allocation5 + $0x68] sm:$0xf0]  ;;  %v2415_v43 = vld [vmem:[#allocation5 + $0x20] sm:$0xf0] }
  0x2a   :  { %168 = vadd.xlane.f32.xlu2 %v153_v3  ;;  %164 = vadd.xlane.f32.xlu1 %v151_v4  ;;  %v2414_v44 = vld [vmem:[#allocation5 + $0x1c] sm:$0xf]  ;;  %v2039_v46 = vld [vmem:[#allocation5 + $0x24] sm:$0xf0]  ;;  %v2045_v47 = vld [vmem:[#allocation5 + $0x20] sm:$0xf] }
  0x2b   :  { %160 = vadd.xlane.f32.xlu0 %v149_v5  ;;  %v176_v10 = vsub.f32 1.0, %v175_v9  ;;  %512 = vmatpush.bf16.msra.mxu0 %v2098_v55  ;;  %v2416_v48 = vld [vmem:[#allocation5 + $0x28] sm:$0xf0]  ;;  %v2042_v50 = vor.u32 %v2414_v44, %v2039_v46  ;;  %v2025_v53 = vld [vmem:[#allocation5] sm:$0xf] }
  0x2c   :  { %541 = vmatpush.bf16.msra.mxu1 %v2102_v59  ;;  %570 = vmatpush.bf16.msra.mxu2 %v2106_v60  ;;  %v2046_v51 = vor.u32 %v2416_v48, %v2045_v47  ;;  %v2412_v54 = vld [vmem:[#allocation5 + $0x8] sm:$0xf0]  ;;  %v2411_v55 = vld [vmem:[#allocation5 + $0x4] sm:$0xf]  ;;  %v2027_v58 = vld [vmem:[#allocation5 + $0xc] sm:$0xf0] }
  0x2d   :  { %v177_v11 = vmul.f32 %v2539_v8, %v176_v10  ;;  %v2075_v10 = vld [vmem:[#allocation5 + $0x6c] sm:$0xf0]  ;;  %v2026_v57 = vor.u32 %v2412_v54, %v2025_v53  ;;  %v2033_v59 = vld [vmem:[#allocation5 + $0x8] sm:$0xf]  ;;  %v2030_v60 = vor.u32 %v2411_v55, %v2027_v58 }
  0x2f   :  { %v178_v12 = vadd.f32 %v2539_v8, %v177_v11  ;;  %v2081_v11 = vld [vmem:[#allocation5 + $0x68] sm:$0xf] }
  0x31   :  { %v2920_v13 = vsel %vm179_vm0, %v2539_v8, %v178_v12  ;;  %v2423_v8 = vld [vmem:[#allocation5 + $0x64] sm:$0xf]  ;;  %v2425_v12 = vld [vmem:[#allocation5 + $0x70] sm:$0xf0] }
  0x32   :  { %170 = vadd.xlane.f32.xlu2 %v154_v6 }
  0x95   :  { %v167_v14 = vpop.xlane.xlu2 %166  ;;  %v163_v15 = vpop.xlane.xlu1 %162 }
  0x96   :  { %v159_v16 = vpop.xlane.xlu0 %158  ;;  %v185_v26 = vmul.f32 %v2920_v13, %v167_v14  ;;  %v183_v27 = vmul.f32 %v2920_v13, %v163_v15  ;;  %v2078_v14 = vor.u32 %v2423_v8, %v2075_v10  ;;  %v2082_v15 = vor.u32 %v2425_v12, %v2081_v11 }
  0x97   :  { %v181_v17 = vmul.f32 %v2920_v13, %v159_v16  ;;  %v2061_v16 = vld [vmem:[#allocation5 + $0x48] sm:$0xf] }
  0x98   :  { %v2941_v32 = vsub.f32 %v152_v0, %v185_v26  ;;  %v2943_v33 = vsub.f32 %v150_v1, %v183_v27  ;;  %v2086_v0 = vor.u32 %v2427_v62, %v2085_v61  ;;  %v2087_v1 = vld [vmem:[#allocation5 + $0x84] sm:$0xf0]  ;;  %v2049_v27 = vld [vmem:[#allocation5 + $0x30] sm:$0xf]  ;;  %v2413_v61 = vld [vmem:[#allocation5 + $0x10] sm:$0xf0] }
  0x99   :  { %v2923_v18 = vsub.f32 %v148_v2, %v181_v17  ;;  %v2093_v2 = vld [vmem:[#allocation5 + $0x80] sm:$0xf]  ;;  %v2421_v17 = vld [vmem:[#allocation5 + $0x50] sm:$0xf0]  ;;  %v2034_v62 = vor.u32 %v2413_v61, %v2033_v59 }
  0x9a   :  { %v201_v38 = vmul.f32 %v2941_v32, %v2941_v32  ;;  %v199_v39 = vmul.f32 %v2943_v33, %v2943_v33  ;;  %513 = vmatpush.bf16.msra.mxu0 %v2086_v0 }
  0x9b   :  { %v197_v19 = vmul.f32 %v2923_v18, %v2923_v18 }
  0x9d   :  { %205 = vadd.xlane.f32.xlu0 %v197_v19  ;;  %v169_v20 = vpop.xlane.xlu2 %168  ;;  %v165_v21 = vpop.xlane.xlu1 %164  ;;  %v2420_v19 = vld [vmem:[#allocation5 + $0x4c] sm:$0xf] }
  0x9e   :  { %v184_v22 = vmul.f32 %v2920_v13, %v165_v21  ;;  %v161_v23 = vpop.xlane.xlu0 %160  ;;  %v186_v37 = vmul.f32 %v2920_v13, %v169_v20  ;;  %v2062_v20 = vor.u32 %v2421_v17, %v2061_v16  ;;  %v2063_v21 = vld [vmem:[#allocation5 + $0x54] sm:$0xf0] }
  0x9f   :  { %v182_v24 = vmul.f32 %v2920_v13, %v161_v23  ;;  %v2422_v23 = vld [vmem:[#allocation5 + $0x58] sm:$0xf0] }
  0xa0   :  { %v2929_v25 = vsub.f32 %v151_v4, %v184_v22  ;;  %v2956_v41 = vsub.f32 %v153_v3, %v186_v37  ;;  %v2428_v3 = vld [vmem:[#allocation5 + $0x88] sm:$0xf0]  ;;  %v2090_v4 = vor.u32 %v2426_v63, %v2087_v1  ;;  %v2069_v22 = vld [vmem:[#allocation5 + $0x50] sm:$0xf]  ;;  %v2057_v37 = vld [vmem:[#allocation5 + $0x38] sm:$0xf] }
  0xa1   :  { %v2933_v28 = vsub.f32 %v149_v5, %v182_v24  ;;  %v2094_v5 = vor.u32 %v2428_v3, %v2093_v2  ;;  %v2066_v24 = vor.u32 %v2420_v19, %v2063_v21  ;;  %v2070_v26 = vor.u32 %v2422_v23, %v2069_v22 }
  0xa2   :  { %v200_v29 = vmul.f32 %v2929_v25, %v2929_v25  ;;  %v202_v42 = vmul.f32 %v2956_v41, %v2956_v41  ;;  %542 = vmatpush.bf16.msra.mxu1 %v2090_v4 }
  0xa3   :  { %v198_v31 = vmul.f32 %v2933_v28, %v2933_v28  ;;  %571 = vmatpush.bf16.msra.mxu2 %v2094_v5 }
  0xa4   :  { %211 = vadd.xlane.f32.xlu2 %v200_v29  ;;  %v2418_v29 = vld [vmem:[#allocation5 + $0x38] sm:$0xf0] }
  0xa5   :  { %172 = vadd.xlane.f32.xlu0 %v2937_v30  ;;  %207 = vadd.xlane.f32.xlu1 %v198_v31  ;;  %v171_v34 = vpop.xlane.xlu2 %170  ;;  %v2417_v31 = vld [vmem:[#allocation5 + $0x34] sm:$0xf] }
  0xa6   :  { %v187_v35 = vmul.f32 %v2920_v13, %v171_v34  ;;  %543 = vmatpush.bf16.msra.mxu1 %v2078_v14  ;;  %v2050_v34 = vor.u32 %v2418_v29, %v2049_v27 }
  0xa7   :  { %572 = vmatpush.bf16.msra.mxu2 %v2082_v15 }
  0xa8   :  { %v2947_v36 = vsub.f32 %v154_v6, %v187_v35  ;;  %v2073_v6 = vld [vmem:[#allocation5 + $0x60] sm:$0xf] }
  0xa9   :  { %v2074_v9 = vor.u32 %v2424_v7, %v2073_v6  ;;  %v2051_v35 = vld [vmem:[#allocation5 + $0x3c] sm:$0xf0] }
  0xaa   :  { %v203_v40 = vmul.f32 %v2947_v36, %v2947_v36  ;;  %544 = vmatpush.bf16.msra.mxu1 %v2066_v24 }
  0xab   :  { %514 = vmatpush.bf16.msra.mxu0 %v2074_v9  ;;  %573 = vmatpush.bf16.msra.mxu2 %v2070_v26 }
  0xac   :  { %217 = vadd.xlane.f32.xlu2 %v203_v40 }
  0xad   :  { %213 = vadd.xlane.f32.xlu0 %v201_v38  ;;  %209 = vadd.xlane.f32.xlu1 %v199_v39  ;;  %v2419_v38 = vld [vmem:[#allocation5 + $0x40] sm:$0xf0]  ;;  %v2054_v39 = vor.u32 %v2417_v31, %v2051_v35 }
  0xae   :  { %v2058_v40 = vor.u32 %v2419_v38, %v2057_v37 }
  0xaf   :  { %515 = vmatpush.bf16.msra.mxu0 %v2062_v20  ;;  %545 = vmatpush.bf16.msra.mxu1 %v2054_v39 }
  0xb0   :  { %574 = vmatpush.bf16.msra.mxu2 %v2058_v40 }
  0xb3   :  { %516 = vmatpush.bf16.msra.mxu0 %v2050_v34  ;;  %546 = vmatpush.bf16.msra.mxu1 %v2042_v50 }
  0xb4   :  { %575 = vmatpush.bf16.msra.mxu2 %v2046_v51 }
  0xb5   :  { %215 = vadd.xlane.f32.xlu1 %v202_v42  ;;  %v2037_v42 = vld [vmem:[#allocation5 + $0x18] sm:$0xf] }
  0xb6   :  { %v2038_v45 = vor.u32 %v2415_v43, %v2037_v42 }
  0xb7   :  { %547 = vmatpush.bf16.msra.mxu1 %v2030_v60 }
  0xb8   :  { %517 = vmatpush.bf16.msra.mxu0 %v2038_v45  ;;  %576 = vmatpush.bf16.msra.mxu2 %v2034_v62  ;;  %v2987_v45 = vld [vmem:[%s3266_s4] ss:$0 sm:$0xff] }
  0xbc   :  { %518 = vmatpush.bf16.msra.mxu0 %v2026_v57 }
 0x110   :  { %v206_v49 = vpop.xlane.xlu0 %205 }
 0x111   :  { %v221_v52 = vmul.f32 %v206_v49, %v2920_v13 }
 0x113   :  { %v229_v56 = vadd.f32 1e-05, %v221_v52 }
 0x115   :  { %2540 = vrsqrt.f32 %v229_v56  ;;  %vm243_vm2 = vweird.f32 %v229_v56 }
 0x117   :  { %v212_v63 = vpop.xlane.xlu2 %211 }
 0x118   :  { %v224_v0 = vmul.f32 %v212_v63, %v2920_v13  ;;  %v208_v1 = vpop.xlane.xlu1 %207  ;;  %v173_v2 = vpop.xlane.xlu0 %172 }
 0x119   :  { %v222_v3 = vmul.f32 %v208_v1, %v2920_v13  ;;  %v188_v4 = vmul.f32 %v2920_v13, %v173_v2 }
 0x11a   :  { %v2964_v5 = vadd.f32 1e-05, %v224_v0 }
 0x11b   :  { %v2541_v6 = vpop.eup %2540  ;;  %v230_v7 = vadd.f32 1e-05, %v222_v3  ;;  %v2967_v8 = vsub.f32 %v2937_v30, %v188_v4 }
 0x11c   :  { %v238_v9 = vmul.f32 %v2541_v6, %v229_v56  ;;  %2542 = vrsqrt.f32 %v2964_v5  ;;  %vm244_vm1 = vweird.f32 %v2541_v6  ;;  %vm273_vm9 = vweird.f32 %v2964_v5 }
 0x11d   :  { %2544 = vrsqrt.f32 %v230_v7  ;;  %v204_v10 = vmul.f32 %v2967_v8, %v2967_v8  ;;  %vm245_vm3 = vmor %vm243_vm2, %vm244_vm1  ;;  %vm253_vm5 = vweird.f32 %v230_v7 }
 0x11e   :  { %v239_v11 = vmul.f32 %v2541_v6, %v238_v9 }
 0x11f   :  { %219 = vadd.xlane.f32.xlu0 %v204_v10 }
 0x120   :  { %v240_v12 = vmul.f32 0.5, %v239_v11  ;;  %v210_v14 = vpop.xlane.xlu1 %209  ;;  %v214_v16 = vpop.xlane.xlu0 %213 }
 0x121   :  { %v223_v15 = vmul.f32 %v210_v14, %v2920_v13  ;;  %v225_v22 = vmul.f32 %v214_v16, %v2920_v13 }
 0x122   :  { %v2973_v17 = vpop.eup %2542  ;;  %v241_v19 = vsub.f32 1.5, %v240_v12 }
 0x123   :  { %v2545_v20 = vpop.eup %2544  ;;  %v231_v30 = vadd.f32 1e-05, %v223_v15  ;;  %v268_v24 = vmul.f32 %v2973_v17, %v2964_v5  ;;  %v2978_v29 = vadd.f32 1e-05, %v225_v22  ;;  %vm274_vm10 = vweird.f32 %v2973_v17 }
 0x124   :  { %v248_v21 = vmul.f32 %v2545_v20, %v230_v7  ;;  %v242_v23 = vmul.f32 %v2541_v6, %v241_v19  ;;  %vm254_vm4 = vweird.f32 %v2545_v20  ;;  %vm275_vm12 = vmor %vm273_vm9, %vm274_vm10  ;;  %vm737_vm10 = vcmask 130048  }
 0x125   :  { %2546 = vrsqrt.f32 %v231_v30  ;;  %v269_v35 = vmul.f32 %v2973_v17, %v268_v24  ;;  %vm255_vm6 = vmor %vm253_vm5, %vm254_vm4  ;;  %vm263_vm7 = vweird.f32 %v231_v30  ;;  %vm283_vm15 = vweird.f32 %v2978_v29 }
 0x126   :  { %v249_v26 = vmul.f32 %v2545_v20, %v248_v21  ;;  %v246_v34 = vsel %vm245_vm3, %v2541_v6, %v242_v23  ;;  %2548 = vrsqrt.f32 %v2978_v29 }
 0x127   :  { %v317_v42 = vmul.f32 %v246_v34, %v2923_v18  ;;  %v270_v46 = vmul.f32 0.5, %v269_v35  ;;  %v2994_v18 = vld [vmem:[%s3267_s5] ss:$0 sm:$0xff] }
 0x128   :  { %v250_v27 = vmul.f32 0.5, %v249_v26  ;;  %v216_v31 = vpop.xlane.xlu1 %215  ;;  %v218_v26 = vpop.xlane.xlu2 %217 }
 0x129   :  { %v226_v37 = vmul.f32 %v216_v31, %v2920_v13  ;;  %v328_v51 = vmul.f32 %v2987_v45, %v317_v42  ;;  %v271_v52 = vsub.f32 1.5, %v270_v46 }
 0x12a   :  { %v251_v38 = vsub.f32 1.5, %v250_v27  ;;  %v227_v27 = vmul.f32 %v218_v26, %v2920_v13 }
 0x12b   :  { %v2547_v39 = vpop.eup %2546  ;;  %v234_v40 = vadd.f32 1e-05, %v226_v37  ;;  %v339_v58 = vadd.f32 %v2994_v18, %v328_v51  ;;  %v272_v59 = vmul.f32 %v2973_v17, %v271_v52 }
 0x12c   :  { %v252_v43 = vmul.f32 %v2545_v20, %v251_v38  ;;  %v258_v44 = vmul.f32 %v2547_v39, %v231_v30  ;;  %vm264_vm8 = vweird.f32 %v2547_v39  ;;  %v2549_v54 = vpop.eup %2548 }
 0x12d   :  { %2550 = vrsqrt.f32 %v234_v40  ;;  %vm265_vm11 = vmor %vm263_vm7, %vm264_vm8  ;;  %v278_v60 = vmul.f32 %v2549_v54, %v2978_v29  ;;  %v276_v1 = vsel %vm275_vm12, %v2973_v17, %v272_v59  ;;  %vm293_vm13 = vweird.f32 %v234_v40 }
 0x12e   :  { %v256_v47 = vsel %vm255_vm6, %v2545_v20, %v252_v43  ;;  %v259_v48 = vmul.f32 %v2547_v39, %v258_v44  ;;  %v320_v5 = vmul.f32 %v276_v1, %v2929_v25  ;;  %vm284_vm0 = vweird.f32 %v2549_v54 }
 0x12f   :  { %v318_v49 = vmul.f32 %v256_v47, %v2933_v28  ;;  %v279_v2 = vmul.f32 %v2549_v54, %v278_v60  ;;  %vm285_vm2 = vmor %vm283_vm15, %vm284_vm0  ;;  %v235_v29 = vadd.f32 1e-05, %v227_v27 }
 0x130   :  { %v260_v50 = vmul.f32 0.5, %v259_v48  ;;  %v331_v10 = vmul.f32 %v2987_v45, %v320_v5 }
 0x131   :  { %v329_v53 = vmul.f32 %v2987_v45, %v318_v49  ;;  %v280_v6 = vmul.f32 0.5, %v279_v2  ;;  %2552 = vrsqrt.f32 %v235_v29  ;;  %vm303_vm3 = vweird.f32 %v235_v29 }
 0x132   :  { %v261_v55 = vsub.f32 1.5, %v260_v50 }
 0x133   :  { %v340_v28 = vadd.f32 %v2994_v18, %v329_v53  ;;  %v2551_v56 = vpop.eup %2550  ;;  %v281_v11 = vsub.f32 1.5, %v280_v6 }
 0x134   :  { %v262_v57 = vmul.f32 %v2547_v39, %v261_v55  ;;  %v288_v61 = vmul.f32 %v2551_v56, %v234_v40  ;;  %vm294_vm14 = vweird.f32 %v2551_v56 }
 0x135   :  { %v347_v62 = vpack.c.bf16 %v340_v28, %v339_v58  ;;  %vm295_vm1 = vmor %vm293_vm13, %vm294_vm14  ;;  %v282_v15 = vmul.f32 %v2549_v54, %v281_v11 }
 0x136   :  { %v266_v63 = vsel %vm265_vm11, %v2547_v39, %v262_v57  ;;  %v289_v0 = vmul.f32 %v2551_v56, %v288_v61 }
 0x137   :  { %519 = vmatmul.bf16.vlgmr.msra.gmra.mxu0 %v347_v62  ;;  %548 = vmatmul.bf16.vlgmr.msra.gmra.mxu1 %v347_v62  ;;  %v319_v3 = vmul.f32 %v266_v63, %v2943_v33  ;;  %v342_v33 = vadd.f32 %v2994_v18, %v331_v10  ;;  %v286_v17 = vsel %vm285_vm2, %v2549_v54, %v282_v15 }
 0x138   :  { %577 = vmatmul.bf16.vlgmr.msra.gmra.mxu2 %v347_v62  ;;  %v290_v4 = vmul.f32 0.5, %v289_v0  ;;  %v321_v20 = vmul.f32 %v286_v17, %v2941_v32 }
 0x139   :  { %v330_v7 = vmul.f32 %v2987_v45, %v319_v3 }
 0x13a   :  { %v291_v9 = vsub.f32 1.5, %v290_v4  ;;  %v332_v21 = vmul.f32 %v2987_v45, %v321_v20 }
 0x13b   :  { %v341_v12 = vadd.f32 %v2994_v18, %v330_v7 }
 0x13c   :  { %v292_v14 = vmul.f32 %v2551_v56, %v291_v9  ;;  %v343_v23 = vadd.f32 %v2994_v18, %v332_v21 }
 0x13d   :  { %v348_v25 = vpack.c.bf16 %v342_v33, %v341_v12 }
 0x13e   :  { %v296_v16 = vsel %vm295_vm1, %v2551_v56, %v292_v14 }
 0x13f   :  { %v322_v19 = vmul.f32 %v296_v16, %v2956_v41  ;;  %v2553_v41 = vpop.eup %2552 }
 0x140   :  { %v298_v31 = vmul.f32 %v2553_v41, %v235_v29  ;;  %vm304_vm4 = vweird.f32 %v2553_v41 }
 0x141   :  { %v333_v30 = vmul.f32 %v2987_v45, %v322_v19  ;;  %vm305_vm5 = vmor %vm303_vm3, %vm304_vm4 }
 0x142   :  { %v299_v32 = vmul.f32 %v2553_v41, %v298_v31 }
 0x143   :  { %v344_v22 = vadd.f32 %v2994_v18, %v333_v30 }
 0x144   :  { %v300_v38 = vmul.f32 0.5, %v299_v32 }
 0x145   :  { %v349_v24 = vpack.c.bf16 %v344_v22, %v343_v23 }
 0x146   :  { %v301_v39 = vsub.f32 1.5, %v300_v38 }
 0x147   :  { %524 = vmatmul.bf16.gmra.mxu0 %v348_v25  ;;  %553 = vmatmul.bf16.gmra.mxu1 %v348_v25 }
 0x148   :  { %582 = vmatmul.bf16.gmra.mxu2 %v348_v25  ;;  %v302_v42 = vmul.f32 %v2553_v41, %v301_v39 }
 0x14a   :  { %v306_v46 = vsel %vm305_vm5, %v2553_v41, %v302_v42 }
 0x14b   :  { %v323_v49 = vmul.f32 %v306_v46, %v2947_v36 }
 0x14d   :  { %v334_v53 = vmul.f32 %v2987_v45, %v323_v49 }
 0x14f   :  { %v345_v55 = vadd.f32 %v2994_v18, %v334_v53 }
 0x157   :  { %529 = vmatmul.bf16.gmra.mxu0 %v349_v24  ;;  %558 = vmatmul.bf16.gmra.mxu1 %v349_v24 }
 0x158   :  { %587 = vmatmul.bf16.gmra.mxu2 %v349_v24 }
 0x192   :  { %v220_v34 = vpop.xlane.xlu0 %219 }
 0x193   :  { %v228_v35 = vmul.f32 %v220_v34, %v2920_v13 }
 0x195   :  { %v236_v37 = vadd.f32 1e-05, %v228_v35 }
 0x197   :  { %2554 = vrsqrt.f32 %v236_v37  ;;  %vm313_vm6 = vweird.f32 %v236_v37 }
 0x19d   :  { %v2555_v40 = vpop.eup %2554 }
 0x19e   :  { %v308_v43 = vmul.f32 %v2555_v40, %v236_v37  ;;  %vm314_vm7 = vweird.f32 %v2555_v40 }
 0x19f   :  { %vm315_vm8 = vmor %vm313_vm6, %vm314_vm7 }
 0x1a0   :  { %v309_v44 = vmul.f32 %v2555_v40, %v308_v43 }
 0x1a2   :  { %v310_v47 = vmul.f32 0.5, %v309_v44 }
 0x1a4   :  { %v311_v48 = vsub.f32 1.5, %v310_v47 }
 0x1a6   :  { %v312_v50 = vmul.f32 %v2555_v40, %v311_v48 }
 0x1a8   :  { %v316_v51 = vsel %vm315_vm8, %v2555_v40, %v312_v50 }
 0x1a9   :  { %v324_v52 = vmul.f32 %v316_v51, %v2967_v8 }
 0x1ab   :  { %v335_v54 = vmul.f32 %v2987_v45, %v324_v52 }
 0x1ad   :  { %v346_v28 = vadd.f32 %v2994_v18, %v335_v54 }
 0x1af   :  { %v350_v56 = vpack.c.bf16 %v346_v28, %v345_v55 }
 0x1b1   :  { %534 = vmatmul.bf16.gmra.mxu0 %v350_v56  ;;  %563 = vmatmul.bf16.gmra.mxu1 %v350_v56 }
 0x1b2   :  { %592 = vmatmul.bf16.gmra.mxu2 %v350_v56 }
 0x1b4   :  { %v520_v57 = vpop.f32.mrf.mxu0  ;;  %v549_v58 = vpop.f32.mrf.mxu1 }
 0x1b5   :  { %v598_v36 = vpack.c.bf16 %v549_v58, %v520_v57 }
 0x1b7   :  { %v629_v62 = vrot.slane %v598_v36, 4  ;;  %v637_v5 = vunpack.c.l.b16 %v598_v36 }
 0x1b9   :  { %v641_v0 = vunpack.c.l.b16 %v629_v62 }
 0x1bb   :  { %v3025_v59 = vpop.f32.mrf.mxu2 }
 0x1bc   :  { %v522_v60 = vpop.f32.mrf.mxu0  ;;  %v551_v61 = vpop.f32.mrf.mxu1  ;;  %v599_v56 = vpack.c.bf16 %v3025_v59, %v3025_v59 }
 0x1bd   :  { %v600_v8 = vpack.c.bf16 %v551_v61, %v522_v60 }
 0x1be   :  { %v841_v61 = vunpack.c.l.b16 %v599_v56 }
 0x1bf   :  { %v630_v63 = vrot.slane %v600_v8, 4  ;;  %v638_v4 = vunpack.c.l.b16 %v600_v8 }
 0x1c1   :  { %v642_v45 = vunpack.c.l.b16 %v630_v63  ;;  %v639_v7 = vpack.c.b16 %v638_v4, %v637_v5 }
 0x1c3   :  { %v580_v1 = vpop.f32.mrf.mxu2  ;;  %v643_v2 = vpack.c.b16 %v642_v45, %v641_v0 }
 0x1c4   :  { %v525_v3 = vpop.f32.mrf.mxu0  ;;  %v554_v18 = vpop.f32.mrf.mxu1  ;;  %v601_v52 = vpack.c.bf16 %v580_v1, %v580_v1 }
 0x1c5   :  { %652 = vmatpush.bf16.xpose.msra.mxu3 %v643_v2  ;;  %v602_v6 = vpack.c.bf16 %v554_v18, %v525_v3 }
 0x1c6   :  { %v842_v58 = vunpack.c.l.b16 %v601_v52 }
 0x1c7   :  { %v631_v12 = vrot.slane %v602_v6, 4  ;;  %v659_v21 = vunpack.c.l.b16 %v602_v6 }
 0x1c8   :  { %v843_v45 = vpack.c.b16 %v842_v58, %v841_v61 }
 0x1c9   :  { %v663_v15 = vunpack.c.l.b16 %v631_v12  ;;  %v614_v12 = vlaneseq }
 0x1cb   :  { %v3027_v9 = vpop.f32.mrf.mxu2 }
 0x1cc   :  { %v527_v10 = vpop.f32.mrf.mxu0  ;;  %v556_v11 = vpop.f32.mrf.mxu1  ;;  %653 = vmatmul.bf16.vlgmr.msra.gmra.mxu3 %v639_v7  ;;  %v603_v1 = vpack.c.bf16 %v3027_v9, %v3027_v9 }
 0x1cd   :  { %v604_v14 = vpack.c.bf16 %v556_v11, %v527_v10 }
 0x1ce   :  { %v869_v7 = vunpack.c.l.b16 %v603_v1 }
 0x1cf   :  { %v632_v33 = vrot.slane %v604_v14, 4  ;;  %v660_v30 = vunpack.c.l.b16 %v604_v14  ;;  %v615_v14 = vshrl.u32 %v614_v12, 7 }
 0x1d1   :  { %v664_v25 = vunpack.c.l.b16 %v632_v33  ;;  %v661_v23 = vpack.c.b16 %v660_v30, %v659_v21  ;;  %v618_v33 = vand.u32 127, %v614_v12 }
 0x1d3   :  { %v585_v16 = vpop.f32.mrf.mxu2  ;;  %v665_v17 = vpack.c.b16 %v664_v25, %v663_v15  ;;  %vm619_vm9 = vcmp.ge.s32.totalorder %v615_v14, %v618_v33 }
 0x1d4   :  { %v530_v19 = vpop.f32.mrf.mxu0  ;;  %v559_v20 = vpop.f32.mrf.mxu1  ;;  %v605_v62 = vpack.c.bf16 %v585_v16, %v585_v16  ;;  %v616_v16 = vadd.s32 8, %v615_v14 }
 0x1d5   :  { %674 = vmatpush.bf16.xpose.msrb.mxu3 %v665_v17  ;;  %v606_v22 = vpack.c.bf16 %v559_v20, %v530_v19 }
 0x1d6   :  { %v870_v59 = vunpack.c.l.b16 %v605_v62  ;;  %vm620_vm11 = vcmp.ge.s32.totalorder %v616_v16, %v618_v33 }
 0x1d7   :  { %v633_v29 = vrot.slane %v606_v22, 4  ;;  %v681_v44 = vunpack.c.l.b16 %v606_v22 }
 0x1d8   :  { %v871_v11 = vpack.c.b16 %v870_v59, %v869_v7 }
 0x1d9   :  { %v685_v32 = vunpack.c.l.b16 %v633_v29 }
 0x1db   :  { %v588_v24 = vpop.f32.mrf.mxu2 }
 0x1dc   :  { %v532_v26 = vpop.f32.mrf.mxu0  ;;  %v561_v27 = vpop.f32.mrf.mxu1  ;;  %675 = vmatmul.bf16.vlgmr.msrb.gmra.mxu3 %v661_v23  ;;  %v607_v35 = vpack.c.bf16 %v588_v24, %v588_v24 }
 0x1dd   :  { %v608_v41 = vpack.c.bf16 %v561_v27, %v532_v26 }
 0x1de   :  { %v897_v40 = vunpack.c.l.b16 %v607_v35 }
 0x1df   :  { %v634_v31 = vrot.slane %v608_v41, 4  ;;  %v682_v42 = vunpack.c.l.b16 %v608_v41 }
 0x1e1   :  { %v686_v34 = vunpack.c.l.b16 %v634_v31  ;;  %v683_v47 = vpack.c.b16 %v682_v42, %v681_v44 }
 0x1e3   :  { %v687_v37 = vpack.c.b16 %v686_v34, %v685_v32  ;;  %v590_v38 = vpop.f32.mrf.mxu2 }
 0x1e4   :  { %v609_v39 = vpack.c.bf16 %v590_v38, %v590_v38 }
 0x1e5   :  { %696 = vmatpush.bf16.xpose.msra.mxu3 %v687_v37 }
 0x1e6   :  { %v898_v43 = vunpack.c.l.b16 %v609_v39 }
 0x1e8   :  { %v899_v46 = vpack.c.b16 %v898_v43, %v897_v40 }
 0x1ea   :  { %911 = vmatpush.bf16.msrb.mxu0 %v899_v46 }
 0x1ec   :  { %697 = vmatmul.bf16.vlgmr.msra.gmra.mxu3 %v683_v47 }
 0x22e   :  { %v535_v48 = vpop.f32.mrf.mxu0  ;;  %v564_v49 = vpop.f32.mrf.mxu1 }
 0x22f   :  { %v610_v50 = vpack.c.bf16 %v564_v49, %v535_v48 }
 0x231   :  { %v635_v55 = vrot.slane %v610_v50, 4  ;;  %v703_v5 = vunpack.c.l.b16 %v610_v50 }
 0x233   :  { %v707_v36 = vunpack.c.l.b16 %v635_v55 }
 0x235   :  { %v593_v51 = vpop.f32.mrf.mxu2 }
 0x236   :  { %v537_v53 = vpop.f32.mrf.mxu0  ;;  %v566_v54 = vpop.f32.mrf.mxu1  ;;  %v611_v8 = vpack.c.bf16 %v593_v51, %v593_v51 }
 0x237   :  { %v612_v28 = vpack.c.bf16 %v566_v54, %v537_v53 }
 0x238   :  { %v925_v3 = vunpack.c.l.b16 %v611_v8 }
 0x239   :  { %v636_v57 = vrot.slane %v612_v28, 4  ;;  %v704_v18 = vunpack.c.l.b16 %v612_v28 }
 0x23b   :  { %v708_v60 = vunpack.c.l.b16 %v636_v57  ;;  %v705_v10 = vpack.c.b16 %v704_v18, %v703_v5 }
 0x23d   :  { %v709_v63 = vpack.c.b16 %v708_v60, %v707_v36  ;;  %v595_v0 = vpop.f32.mrf.mxu2 }
 0x23e   :  { %v613_v2 = vpack.c.bf16 %v595_v0, %v595_v0 }
 0x23f   :  { %718 = vmatpush.bf16.xpose.msrb.mxu3 %v709_v63 }
 0x240   :  { %v926_v4 = vunpack.c.l.b16 %v613_v2 }
 0x242   :  { %v927_v6 = vpack.c.b16 %v926_v4, %v925_v3 }
 0x244   :  { %939 = vmatpush.bf16.msrb.mxu1 %v927_v6 }
 0x246   :  { %719 = vmatmul.bf16.vlgmr.msrb.gmra.mxu3 %v705_v10 }
 0x247   :  { %855 = vmatpush.bf16.msra.mxu3 %v843_v45 }
 0x24b   :  { %883 = vmatpush.bf16.msrb.mxu3 %v871_v11 }
 0x24f   :  { %v654_v9 = vpop.f32.mrf.mxu3 }
 0x250   :  { %v729_v15 = vsel %vm619_vm9, %v654_v9, -1e+30 }
 0x251   :  { %v738_v25 = vsel %vm737_vm10, %v729_v15, -inf }
 0x252   :  { %739 = vmax.xlane.f32.xlu1 %v738_v25 }
 0x257   :  { %v656_v17 = vpop.f32.mrf.mxu3 }
 0x258   :  { %v730_v19 = vsel %vm620_vm11, %v656_v17, -1e+30 }
 0x259   :  { %v741_v20 = vsel %vm737_vm10, %v730_v19, -inf }
 0x25a   :  { %742 = vmax.xlane.f32.xlu2 %v741_v20 }
 0x25f   :  { %v676_v30 = vpop.f32.mrf.mxu3 }
 0x260   :  { %v731_v21 = vsel %vm619_vm9, %v676_v30, -1e+30 }
 0x261   :  { %v744_v22 = vsel %vm737_vm10, %v731_v21, -inf }
 0x262   :  { %745 = vmax.xlane.f32.xlu0 %v744_v22 }
 0x267   :  { %v678_v23 = vpop.f32.mrf.mxu3 }
 0x268   :  { %v732_v24 = vsel %vm620_vm11, %v678_v23, -1e+30 }
 0x269   :  { %v747_v26 = vsel %vm737_vm10, %v732_v24, -inf }
 0x26a   :  { %748 = vmax.xlane.f32.xlu1 %v747_v26 }
 0x26f   :  { %v698_v27 = vpop.f32.mrf.mxu3 }
 0x270   :  { %v733_v29 = vsel %vm619_vm9, %v698_v27, -1e+30 }
 0x271   :  { %v750_v41 = vsel %vm737_vm10, %v733_v29, -inf }
 0x272   :  { %751 = vmax.xlane.f32.xlu2 %v750_v41  ;;  %v2442_v41 = vld [vmem:[#allocation7 + $0x38] sm:$0xff] }
 0x273   :  { %1018 = vmatpush.bf16.msrb.mxu2 %v2442_v41 }
 0x277   :  { %v700_v31 = vpop.f32.mrf.mxu3 }
 0x278   :  { %v734_v32 = vsel %vm620_vm11, %v700_v31, -1e+30 }
 0x279   :  { %v753_v34 = vsel %vm737_vm10, %v734_v32, -inf }
 0x27a   :  { %754 = vmax.xlane.f32.xlu0 %v753_v34 }
 0x2c5   :  { %v740_v35 = vpop.xlane.xlu1 %739 }
 0x2c6   :  { %v762_v37 = vsub.f32 %v729_v15, %v740_v35  ;;  %v2440_v35 = vld [vmem:[#allocation7 + $0x28] sm:$0xff] }
 0x2c8   :  { %v770_v38 = vmul.f32 1.442695, %v762_v37 }
 0x2c9   :  { %v720_v39 = vpop.f32.mrf.mxu3 }
 0x2ca   :  { %v735_v40 = vsel %vm619_vm9, %v720_v39, -1e+30  ;;  %2556 = vpow2.f32 %v770_v38 }
 0x2cb   :  { %v756_v42 = vsel %vm737_vm10, %v735_v40, -inf }
 0x2cc   :  { %757 = vmax.xlane.f32.xlu0 %v756_v42 }
 0x2cd   :  { %v743_v43 = vpop.xlane.xlu2 %742 }
 0x2ce   :  { %v763_v44 = vsub.f32 %v730_v19, %v743_v43 }
 0x2d0   :  { %v2557_v46 = vpop.eup %2556  ;;  %v772_v47 = vmul.f32 1.442695, %v763_v44 }
 0x2d1   :  { %v786_v48 = vsel %vm737_vm10, %v2557_v46, 0.0  ;;  %v722_v49 = vpop.f32.mrf.mxu3 }
 0x2d2   :  { %2558 = vpow2.f32 %v772_v47  ;;  %787 = vadd.xlane.f32.xlu1 %v786_v48  ;;  %v736_v51 = vsel %vm620_vm11, %v722_v49, -1e+30 }
 0x2d3   :  { %v759_v28 = vsel %vm737_vm10, %v736_v51, -inf }
 0x2d5   :  { %v746_v50 = vpop.xlane.xlu0 %745 }
 0x2d6   :  { %v764_v52 = vsub.f32 %v731_v21, %v746_v50 }
 0x2d8   :  { %v2559_v53 = vpop.eup %2558  ;;  %v774_v54 = vmul.f32 1.442695, %v764_v52 }
 0x2d9   :  { %v789_v55 = vsel %vm737_vm10, %v2559_v53, 0.0 }
 0x2da   :  { %2560 = vpow2.f32 %v774_v54  ;;  %790 = vadd.xlane.f32.xlu2 %v789_v55  ;;  %760 = vmax.xlane.f32.xlu1 %v759_v28 }
 0x2dd   :  { %v749_v56 = vpop.xlane.xlu1 %748 }
 0x2de   :  { %v765_v57 = vsub.f32 %v732_v24, %v749_v56  ;;  %v2439_v56 = vld [vmem:[#allocation7 + $0x20] sm:$0xff] }
 0x2e0   :  { %v2561_v58 = vpop.eup %2560  ;;  %v776_v36 = vmul.f32 1.442695, %v765_v57  ;;  %v2438_v57 = vld [vmem:[#allocation7 + $0x18] sm:$0xff] }
 0x2e1   :  { %v792_v60 = vsel %vm737_vm10, %v2561_v58, 0.0 }
 0x2e2   :  { %2562 = vpow2.f32 %v776_v36  ;;  %793 = vadd.xlane.f32.xlu2 %v792_v60  ;;  %v2436_v36 = vld [vmem:[#allocation7 + $0x8] sm:$0xff]  ;;  %v2435_v60 = vld [vmem:[#allocation7] sm:$0xff] }
 0x2e5   :  { %v752_v61 = vpop.xlane.xlu2 %751 }
 0x2e6   :  { %v766_v8 = vsub.f32 %v733_v29, %v752_v61 }
 0x2e8   :  { %v2563_v62 = vpop.eup %2562  ;;  %v778_v63 = vmul.f32 1.442695, %v766_v8 }
 0x2e9   :  { %v795_v0 = vsel %vm737_vm10, %v2563_v62, 0.0 }
 0x2ea   :  { %2564 = vpow2.f32 %v778_v63  ;;  %796 = vadd.xlane.f32.xlu0 %v795_v0 }
 0x2ed   :  { %v755_v45 = vpop.xlane.xlu0 %754 }
 0x2ee   :  { %v767_v2 = vsub.f32 %v734_v32, %v755_v45  ;;  %v2441_v32 = vld [vmem:[#allocation7 + $0x30] sm:$0xff] }
 0x2ef   :  { %1019 = vmatpush.bf16.msrb.mxu2 %v2441_v32 }
 0x2f0   :  { %v2565_v1 = vpop.eup %2564  ;;  %v780_v3 = vmul.f32 1.442695, %v767_v2 }
 0x2f1   :  { %v798_v18 = vsel %vm737_vm10, %v2565_v1, 0.0 }
 0x2f2   :  { %2566 = vpow2.f32 %v780_v3  ;;  %799 = vadd.xlane.f32.xlu1 %v798_v18 }
 0x2f3   :  { %1020 = vmatpush.bf16.msrb.mxu2 %v2440_v35 }
 0x2f7   :  { %1021 = vmatpush.bf16.msrb.mxu2 %v2439_v56 }
 0x2f8   :  { %v2567_v4 = vpop.eup %2566 }
 0x2f9   :  { %v801_v59 = vsel %vm737_vm10, %v2567_v4, 0.0 }
 0x2fa   :  { %802 = vadd.xlane.f32.xlu2 %v801_v59 }
 0x2fb   :  { %1022 = vmatpush.bf16.msrb.mxu2 %v2438_v57 }
 0x33f   :  { %v758_v5 = vpop.xlane.xlu0 %757 }
 0x340   :  { %v768_v6 = vsub.f32 %v735_v40, %v758_v5 }
 0x342   :  { %v782_v7 = vmul.f32 1.442695, %v768_v6 }
 0x344   :  { %2568 = vpow2.f32 %v782_v7 }
 0x345   :  { %v788_v10 = vpop.xlane.xlu1 %787 }
 0x346   :  { %2570 = vrcp.f32 %v788_v10 }
 0x34a   :  { %v3055_v11 = vpop.eup %2568 }
 0x34b   :  { %v804_v12 = vsel %vm737_vm10, %v3055_v11, 0.0 }
 0x34c   :  { %805 = vadd.xlane.f32.xlu0 %v804_v12  ;;  %v2571_v9 = vpop.eup %2570 }
 0x34d   :  { %v791_v14 = vpop.xlane.xlu2 %790  ;;  %v761_v33 = vpop.xlane.xlu1 %760  ;;  %v818_v16 = vmul.f32 %v2571_v9, %v2557_v46 }
 0x34e   :  { %2572 = vrcp.f32 %v791_v14  ;;  %v769_v15 = vsub.f32 %v736_v51, %v761_v33 }
 0x34f   :  { %v826_v19 = vpack.c.bf16 %v818_v16, %v818_v16  ;;  %v2534_v16 = vld [vmem:[%s3265_s3] ss:$0 sm:$0xff] }
 0x350   :  { %v784_v25 = vmul.f32 1.442695, %v769_v15 }
 0x351   :  { %v836_v23 = vunpack.c.l.b16 %v826_v19 }
 0x352   :  { %2574 = vpow2.f32 %v784_v25 }
 0x354   :  { %v2573_v17 = vpop.eup %2572 }
 0x355   :  { %v819_v20 = vmul.f32 %v2573_v17, %v2559_v53  ;;  %v794_v30 = vpop.xlane.xlu2 %793 }
 0x356   :  { %2576 = vrcp.f32 %v794_v30 }
 0x357   :  { %v827_v21 = vpack.c.bf16 %v819_v20, %v819_v20  ;;  %v2604_v20 = vld [vmem:[#allocation2] sm:$0xff] }
 0x358   :  { %v2575_v22 = vpop.eup %2574 }
 0x359   :  { %v837_v24 = vunpack.c.l.b16 %v827_v21  ;;  %v807_v26 = vsel %vm737_vm10, %v2575_v22, 0.0 }
 0x35a   :  { %808 = vadd.xlane.f32.xlu1 %v807_v26 }
 0x35b   :  { %v838_v27 = vpack.c.b16 %v837_v24, %v836_v23  ;;  %v2605_v23 = vld [vmem:[#allocation2 + $0x8] sm:$0xff] }
 0x35c   :  { %v2577_v31 = vpop.eup %2576 }
 0x35d   :  { %2119 = vmatmul.msk.bf16.vlgmr.msra.gmra.mxu3 %vm737_vm10, %v838_v27  ;;  %v797_v29 = vpop.xlane.xlu0 %796  ;;  %v820_v34 = vmul.f32 %v2577_v31, %v2561_v58  ;;  %v2437_v58 = vld [vmem:[#allocation7 + $0x10] sm:$0xff] }
 0x35e   :  { %2578 = vrcp.f32 %v797_v29  ;;  %1023 = vmatpush.bf16.msrb.mxu2 %v2437_v58  ;;  %v2606_v29 = vld [vmem:[#allocation2 + $0x10] sm:$0xff] }
 0x35f   :  { %v828_v38 = vpack.c.bf16 %v820_v34, %v820_v34  ;;  %v2607_v34 = vld [vmem:[#allocation2 + $0x18] sm:$0xff] }
 0x361   :  { %v864_v43 = vunpack.c.l.b16 %v828_v38 }
 0x362   :  { %1024 = vmatpush.bf16.msrb.mxu2 %v2436_v36  ;;  %v2611_v36 = vld [vmem:[#allocation2 + $0x38] sm:$0xff] }
 0x364   :  { %v2579_v37 = vpop.eup %2578 }
 0x365   :  { %v821_v39 = vmul.f32 %v2579_v37, %v2563_v62  ;;  %v800_v40 = vpop.xlane.xlu1 %799 }
 0x366   :  { %2580 = vrcp.f32 %v800_v40  ;;  %1025 = vmatpush.bf16.msrb.mxu2 %v2435_v60 }
 0x367   :  { %v829_v42 = vpack.c.bf16 %v821_v39, %v821_v39  ;;  %v2608_v39 = vld [vmem:[#allocation2 + $0x20] sm:$0xff] }
 0x369   :  { %v865_v44 = vunpack.c.l.b16 %v829_v42 }
 0x36b   :  { %v866_v46 = vpack.c.b16 %v865_v44, %v864_v43  ;;  %v2609_v44 = vld [vmem:[#allocation2 + $0x28] sm:$0xff] }
 0x36c   :  { %v2581_v48 = vpop.eup %2580 }
 0x36d   :  { %v803_v47 = vpop.xlane.xlu2 %802  ;;  %2120 = vmatmul.msk.bf16.vlgmr.msrb.gmra.mxu3 %vm737_vm10, %v866_v46  ;;  %v822_v49 = vmul.f32 %v2581_v48, %v2565_v1 }
 0x36e   :  { %2582 = vrcp.f32 %v803_v47 }
 0x36f   :  { %v830_v51 = vpack.c.bf16 %v822_v49, %v822_v49 }
 0x371   :  { %v892_v54 = vunpack.c.l.b16 %v830_v51 }
 0x374   :  { %v2583_v50 = vpop.eup %2582 }
 0x375   :  { %v823_v52 = vmul.f32 %v2583_v50, %v2567_v4 }
 0x377   :  { %v831_v53 = vpack.c.bf16 %v823_v52, %v823_v52  ;;  %v2610_v52 = vld [vmem:[#allocation2 + $0x30] sm:$0xff] }
 0x379   :  { %v893_v55 = vunpack.c.l.b16 %v831_v53 }
 0x37b   :  { %v894_v28 = vpack.c.b16 %v893_v55, %v892_v54 }
 0x37d   :  { %2121 = vmatmul.msk.bf16.vlgmr.msrb.gmra.mxu0 %vm737_vm10, %v894_v28 }
 0x3bf   :  { %v806_v61 = vpop.xlane.xlu0 %805 }
 0x3c0   :  { %2584 = vrcp.f32 %v806_v61 }
 0x3c6   :  { %v2585_v62 = vpop.eup %2584 }
 0x3c7   :  { %v824_v63 = vmul.f32 %v2585_v62, %v3055_v11 }
 0x3c9   :  { %v832_v45 = vpack.c.bf16 %v824_v63, %v824_v63 }
 0x3cb   :  { %v920_v3 = vunpack.c.l.b16 %v832_v45 }
 0x3cd   :  { %v809_v8 = vpop.xlane.xlu1 %808 }
 0x3ce   :  { %2586 = vrcp.f32 %v809_v8 }
 0x3d4   :  { %v2587_v0 = vpop.eup %2586 }
 0x3d5   :  { %v825_v2 = vmul.f32 %v2587_v0, %v2575_v22 }
 0x3d7   :  { %v833_v1 = vpack.c.bf16 %v825_v2, %v825_v2 }
 0x3d9   :  { %v921_v18 = vunpack.c.l.b16 %v833_v1 }
 0x3db   :  { %v922_v4 = vpack.c.b16 %v921_v18, %v920_v3 }
 0x3dd   :  { %2122 = vmatmul.msk.bf16.vlgmr.msrb.gmra.mxu1 %vm737_vm10, %v922_v4 }
 0x3e0   :  { %v857_v59 = vpop.f32.mrf.mxu3 }
 0x3e8   :  { %v859_v5 = vpop.f32.mrf.mxu3 }
 0x3e9   :  { %v946_v6 = vpack.c.bf16 %v859_v5, %v857_v59 }
 0x3eb   :  { %1026 = vmatmul.bf16.vlgmr.msrb.gmra.mxu2 %v946_v6 }
 0x3f0   :  { %v885_v7 = vpop.f32.mrf.mxu3 }
 0x3f8   :  { %v887_v10 = vpop.f32.mrf.mxu3 }
 0x3f9   :  { %v947_v12 = vpack.c.bf16 %v887_v10, %v885_v7 }
 0x3fa   :  { %v913_v14 = vpop.f32.mrf.mxu0 }
 0x3fb   :  { %1031 = vmatmul.bf16.gmra.mxu2 %v947_v12 }
 0x402   :  { %v915_v33 = vpop.f32.mrf.mxu0 }
 0x403   :  { %v948_v11 = vpack.c.bf16 %v915_v33, %v913_v14  ;;  %v2269_v14 = vld [vmem:[#allocation11 + $0xe0] sm:$0xf]  ;;  %v2473_v33 = vld [vmem:[#allocation11 + $0xec] sm:$0xf0] }
 0x40b   :  { %1036 = vmatmul.bf16.gmra.mxu2 %v948_v11  ;;  %v2471_v11 = vld [vmem:[#allocation11 + $0xe4] sm:$0xf] }
 0x45a   :  { %v941_v9 = vpop.f32.mrf.mxu1 }
 0x462   :  { %v943_v15 = vpop.f32.mrf.mxu1 }
 0x463   :  { %v949_v25 = vpack.c.bf16 %v943_v15, %v941_v9  ;;  %v2270_v9 = vor.u32 %v2473_v33, %v2269_v14  ;;  %v2271_v15 = vld [vmem:[#allocation11 + $0xf0] sm:$0xf0]  ;;  %v2457_v14 = vld [vmem:[#allocation11 + $0x6c] sm:$0xf0]  ;;  %v2455_v33 = vld [vmem:[#allocation11 + $0x64] sm:$0xf] }
 0x465   :  { %1041 = vmatmul.bf16.gmra.mxu2 %v949_v25  ;;  %v2277_v25 = vld [vmem:[#allocation11 + $0xe8] sm:$0xf]  ;;  %1445 = vmatpush.bf16.msra.mxu3 %v2270_v9  ;;  %v2207_v9 = vld [vmem:[#allocation11 + $0x70] sm:$0xf0] }
 0x46e   :  { %v1027_v17 = vpop.f32.mrf.mxu2 }
 0x46f   :  { %v1028_v19 = vadd.f32 %v2534_v16, %v1027_v17  ;;  %v2274_v17 = vor.u32 %v2471_v11, %v2271_v15  ;;  %v2213_v15 = vld [vmem:[#allocation11 + $0x68] sm:$0xf] }
 0x471   :  { %v3068_v30 = vadd.f32 %v2604_v20, %v1028_v19  ;;  %v2472_v20 = vld [vmem:[#allocation11 + $0xec] sm:$0xf]  ;;  %1474 = vmatpush.bf16.msra.mxu0 %v2274_v17 }
 0x473   :  { %1057 = vadd.xlane.f32.xlu2 %v3068_v30 }
 0x476   :  { %v1029_v21 = vpop.f32.mrf.mxu2 }
 0x477   :  { %v1030_v22 = vadd.f32 %v2534_v16, %v1029_v21  ;;  %v2279_v21 = vld [vmem:[#allocation11 + $0xf8] sm:$0xf0] }
 0x479   :  { %v3071_v24 = vadd.f32 %v2605_v23, %v1030_v22  ;;  %v2282_v22 = vor.u32 %v2472_v20, %v2279_v21  ;;  %v2253_v23 = vld [vmem:[#allocation11 + $0xc0] sm:$0xf]  ;;  %v2215_v20 = vld [vmem:[#allocation11 + $0x78] sm:$0xf0] }
 0x47b   :  { %1059 = vadd.xlane.f32.xlu0 %v3071_v24  ;;  %1532 = vmatpush.bf16.msra.mxu2 %v2282_v22  ;;  %v2189_v22 = vld [vmem:[#allocation11 + $0x40] sm:$0xf] }
 0x47e   :  { %v1032_v26 = vpop.f32.mrf.mxu2 }
 0x47f   :  { %v1033_v27 = vadd.f32 %v2534_v16, %v1032_v26  ;;  %v2469_v26 = vld [vmem:[#allocation11 + $0xcc] sm:$0xf0] }
 0x481   :  { %v3074_v41 = vadd.f32 %v2606_v29, %v1033_v27  ;;  %v2467_v27 = vld [vmem:[#allocation11 + $0xc4] sm:$0xf]  ;;  %v2254_v29 = vor.u32 %v2469_v26, %v2253_v23  ;;  %v2453_v23 = vld [vmem:[#allocation11 + $0x4c] sm:$0xf0] }
 0x482   :  { %v2451_v26 = vld [vmem:[#allocation11 + $0x44] sm:$0xf] }
 0x483   :  { %1061 = vadd.xlane.f32.xlu1 %v3074_v41  ;;  %1446 = vmatpush.bf16.msra.mxu3 %v2254_v29  ;;  %v2191_v29 = vld [vmem:[#allocation11 + $0x50] sm:$0xf0] }
 0x486   :  { %v1034_v31 = vpop.f32.mrf.mxu2 }
 0x487   :  { %v1035_v32 = vadd.f32 %v2534_v16, %v1034_v31  ;;  %v2255_v31 = vld [vmem:[#allocation11 + $0xd0] sm:$0xf0] }
 0x489   :  { %v3077_v35 = vadd.f32 %v2607_v34, %v1035_v32  ;;  %v2261_v32 = vld [vmem:[#allocation11 + $0xc8] sm:$0xf]  ;;  %v2470_v34 = vld [vmem:[#allocation11 + $0xd4] sm:$0xf0] }
 0x48b   :  { %1063 = vadd.xlane.f32.xlu2 %v3077_v35 }
 0x48e   :  { %v1037_v37 = vpop.f32.mrf.mxu2 }
 0x48f   :  { %v1038_v38 = vadd.f32 %v2534_v16, %v1037_v37  ;;  %v2258_v37 = vor.u32 %v2467_v27, %v2255_v31  ;;  %v2190_v27 = vor.u32 %v2453_v23, %v2189_v22  ;;  %v2197_v31 = vld [vmem:[#allocation11 + $0x48] sm:$0xf] }
 0x491   :  { %v3080_v40 = vadd.f32 %v2608_v39, %v1038_v38  ;;  %v2262_v38 = vor.u32 %v2470_v34, %v2261_v32  ;;  %v2468_v39 = vld [vmem:[#allocation11 + $0xcc] sm:$0xf]  ;;  %1475 = vmatpush.bf16.msra.mxu0 %v2258_v37  ;;  %v2454_v32 = vld [vmem:[#allocation11 + $0x54] sm:$0xf0]  ;;  %v2194_v34 = vor.u32 %v2451_v26, %v2191_v29 }
 0x492   :  { %v2198_v37 = vor.u32 %v2454_v32, %v2197_v31 }
 0x493   :  { %1065 = vadd.xlane.f32.xlu0 %v3080_v40 }
 0x496   :  { %v1039_v42 = vpop.f32.mrf.mxu2 }
 0x497   :  { %v1040_v43 = vadd.f32 %v2534_v16, %v1039_v42  ;;  %v2263_v42 = vld [vmem:[#allocation11 + $0xd8] sm:$0xf0] }
 0x499   :  { %v3083_v46 = vadd.f32 %v2609_v44, %v1040_v43  ;;  %v2266_v43 = vor.u32 %v2468_v39, %v2263_v42  ;;  %v2237_v44 = vld [vmem:[#allocation11 + $0xa0] sm:$0xf]  ;;  %v2199_v39 = vld [vmem:[#allocation11 + $0x58] sm:$0xf0] }
 0x49b   :  { %1067 = vadd.xlane.f32.xlu1 %v3083_v46  ;;  %1533 = vmatpush.bf16.msra.mxu2 %v2266_v43  ;;  %v2173_v43 = vld [vmem:[#allocation11 + $0x20] sm:$0xf] }
 0x4e6   :  { %v1058_v47 = vpop.xlane.xlu2 %1057 }
 0x4e7   :  { %v1073_v48 = vmul.f32 %v1058_v47, %v2920_v13  ;;  %v2465_v47 = vld [vmem:[#allocation11 + $0xac] sm:$0xf0] }
 0x4e8   :  { %v1042_v49 = vpop.f32.mrf.mxu2 }
 0x4e9   :  { %v3088_v50 = vsub.f32 %v3068_v30, %v1073_v48  ;;  %v1043_v51 = vadd.f32 %v2534_v16, %v1042_v49  ;;  %v2463_v48 = vld [vmem:[#allocation11 + $0xa4] sm:$0xf]  ;;  %v2238_v49 = vor.u32 %v2465_v47, %v2237_v44  ;;  %v2449_v44 = vld [vmem:[#allocation11 + $0x2c] sm:$0xf0] }
 0x4ea   :  { %v2447_v47 = vld [vmem:[#allocation11 + $0x24] sm:$0xf] }
 0x4eb   :  { %v3090_v53 = vadd.f32 %v2610_v52, %v1043_v51  ;;  %v1089_v54 = vmul.f32 %v3088_v50, %v3088_v50  ;;  %v2239_v51 = vld [vmem:[#allocation11 + $0xb0] sm:$0xf0]  ;;  %v2245_v52 = vld [vmem:[#allocation11 + $0xa8] sm:$0xf]  ;;  %1447 = vmatpush.bf16.msra.mxu3 %v2238_v49 }
 0x4ec   :  { %v2175_v49 = vld [vmem:[#allocation11 + $0x30] sm:$0xf0] }
 0x4ed   :  { %1097 = vadd.xlane.f32.xlu2 %v1089_v54  ;;  %1069 = vadd.xlane.f32.xlu1 %v3090_v53  ;;  %v2466_v54 = vld [vmem:[#allocation11 + $0xb4] sm:$0xf0] }
 0x4ee   :  { %v1060_v55 = vpop.xlane.xlu0 %1059 }
 0x4ef   :  { %v1074_v28 = vmul.f32 %v1060_v55, %v2920_v13  ;;  %v2242_v55 = vor.u32 %v2463_v48, %v2239_v51  ;;  %v2174_v48 = vor.u32 %v2449_v44, %v2173_v43  ;;  %v2181_v51 = vld [vmem:[#allocation11 + $0x28] sm:$0xf] }
 0x4f0   :  { %v1044_v56 = vpop.f32.mrf.mxu2 }
 0x4f1   :  { %v3097_v57 = vsub.f32 %v3071_v24, %v1074_v28  ;;  %v1045_v58 = vadd.f32 %v2534_v16, %v1044_v56  ;;  %v2474_v16 = vld [vmem:[#allocation11 + $0xf4] sm:$0xf0]  ;;  %v2246_v28 = vor.u32 %v2466_v54, %v2245_v52  ;;  %v2464_v56 = vld [vmem:[#allocation11 + $0xac] sm:$0xf]  ;;  %1476 = vmatpush.bf16.msra.mxu0 %v2242_v55 }
 0x4f2   :  { %v2278_v19 = vor.u32 %v2474_v16, %v2277_v25  ;;  %v2458_v25 = vld [vmem:[#allocation11 + $0x74] sm:$0xf0]  ;;  %v2210_v16 = vor.u32 %v2455_v33, %v2207_v9  ;;  %v2167_v33 = vld [vmem:[#allocation11 + $0x18] sm:$0xf0] }
 0x4f3   :  { %v3099_v60 = vadd.f32 %v2611_v36, %v1045_v58  ;;  %v1090_v61 = vmul.f32 %v3097_v57, %v3097_v57  ;;  %v2247_v58 = vld [vmem:[#allocation11 + $0xb8] sm:$0xf0]  ;;  %v2214_v17 = vor.u32 %v2458_v25, %v2213_v15  ;;  %v2450_v52 = vld [vmem:[#allocation11 + $0x34] sm:$0xf0] }
 0x4f4   :  { %1503 = vmatpush.bf16.msra.mxu1 %v2278_v19  ;;  %v2250_v36 = vor.u32 %v2464_v56, %v2247_v58  ;;  %v2456_v19 = vld [vmem:[#allocation11 + $0x6c] sm:$0xf]  ;;  %v2182_v56 = vor.u32 %v2450_v52, %v2181_v51 }
 0x4f5   :  { %1071 = vadd.xlane.f32.xlu2 %v3099_v60  ;;  %1099 = vadd.xlane.f32.xlu0 %v1090_v61  ;;  %v2221_v61 = vld [vmem:[#allocation11 + $0x80] sm:$0xf]  ;;  %v2218_v21 = vor.u32 %v2456_v19, %v2215_v20  ;;  %v2448_v58 = vld [vmem:[#allocation11 + $0x2c] sm:$0xf] }
 0x4f6   :  { %v1062_v8 = vpop.xlane.xlu1 %1061  ;;  %1534 = vmatpush.bf16.msra.mxu2 %v2250_v36  ;;  %v2183_v36 = vld [vmem:[#allocation11 + $0x38] sm:$0xf0] }
 0x4f7   :  { %v1075_v62 = vmul.f32 %v1062_v8, %v2920_v13  ;;  %v2461_v8 = vld [vmem:[#allocation11 + $0x8c] sm:$0xf0] }
 0x4f8   :  { %1504 = vmatpush.bf16.msra.mxu1 %v2262_v38  ;;  %v2452_v38 = vld [vmem:[#allocation11 + $0x4c] sm:$0xf] }
 0x4f9   :  { %v3106_v63 = vsub.f32 %v3074_v41, %v1075_v62  ;;  %v2459_v62 = vld [vmem:[#allocation11 + $0x84] sm:$0xf]  ;;  %v2202_v42 = vor.u32 %v2452_v38, %v2199_v39 }
 0x4fb   :  { %v1091_v0 = vmul.f32 %v3106_v63, %v3106_v63 }
 0x4fc   :  { %1505 = vmatpush.bf16.msra.mxu1 %v2246_v28  ;;  %v2178_v28 = vor.u32 %v2447_v47, %v2175_v49 }
 0x4fd   :  { %1101 = vadd.xlane.f32.xlu0 %v1091_v0  ;;  %v2222_v0 = vor.u32 %v2461_v8, %v2221_v61 }
 0x4fe   :  { %v1064_v45 = vpop.xlane.xlu2 %1063 }
 0x4ff   :  { %v1076_v2 = vmul.f32 %v1064_v45, %v2920_v13  ;;  %v2223_v45 = vld [vmem:[#allocation11 + $0x90] sm:$0xf0]  ;;  %1448 = vmatpush.bf16.msra.mxu3 %v2222_v0  ;;  %v2157_v0 = vld [vmem:[#allocation11] sm:$0xf] }
 0x501   :  { %v3112_v1 = vsub.f32 %v3077_v35, %v1076_v2  ;;  %v2229_v2 = vld [vmem:[#allocation11 + $0x88] sm:$0xf] }
 0x503   :  { %v1092_v3 = vmul.f32 %v3112_v1, %v3112_v1 }
 0x505   :  { %1103 = vadd.xlane.f32.xlu1 %v1092_v3  ;;  %v2462_v3 = vld [vmem:[#allocation11 + $0x94] sm:$0xf0] }
 0x506   :  { %v1066_v18 = vpop.xlane.xlu0 %1065 }
 0x507   :  { %v1077_v4 = vmul.f32 %v1066_v18, %v2920_v13  ;;  %v2226_v18 = vor.u32 %v2459_v62, %v2223_v45  ;;  %v2186_v62 = vor.u32 %v2448_v58, %v2183_v36  ;;  %v2445_v45 = vld [vmem:[#allocation11 + $0xc] sm:$0xf0] }
 0x509   :  { %v3118_v59 = vsub.f32 %v3080_v40, %v1077_v4  ;;  %v2230_v4 = vor.u32 %v2462_v3, %v2229_v2  ;;  %1477 = vmatpush.bf16.msra.mxu0 %v2226_v18  ;;  %v2443_v2 = vld [vmem:[#allocation11 + $0x4] sm:$0xf] }
 0x50b   :  { %v1093_v5 = vmul.f32 %v3118_v59, %v3118_v59  ;;  %1506 = vmatpush.bf16.msra.mxu1 %v2230_v4  ;;  %v2158_v4 = vor.u32 %v2445_v45, %v2157_v0  ;;  %v3149_v0 = vld [vmem:[#allocation10] ss:$0 sm:$0xff] }
 0x50d   :  { %1105 = vadd.xlane.f32.xlu2 %v1093_v5  ;;  %v2460_v5 = vld [vmem:[#allocation11 + $0x8c] sm:$0xf]  ;;  %1478 = vmatpush.bf16.msra.mxu0 %v2210_v16 }
 0x50e   :  { %v1068_v6 = vpop.xlane.xlu1 %1067 }
 0x50f   :  { %v1078_v7 = vmul.f32 %v1068_v6, %v2920_v13  ;;  %v2231_v6 = vld [vmem:[#allocation11 + $0x98] sm:$0xf0]  ;;  %1507 = vmatpush.bf16.msra.mxu1 %v2214_v17 }
 0x511   :  { %v3124_v10 = vsub.f32 %v3083_v46, %v1078_v7  ;;  %v2234_v7 = vor.u32 %v2460_v5, %v2231_v6  ;;  %1479 = vmatpush.bf16.msra.mxu0 %v2194_v34  ;;  %v2159_v5 = vld [vmem:[#allocation11 + $0x10] sm:$0xf0]  ;;  %v2165_v6 = vld [vmem:[#allocation11 + $0x8] sm:$0xf] }
 0x513   :  { %v1094_v12 = vmul.f32 %v3124_v10, %v3124_v10  ;;  %1535 = vmatpush.bf16.msra.mxu2 %v2234_v7  ;;  %1508 = vmatpush.bf16.msra.mxu1 %v2198_v37  ;;  %v2162_v7 = vor.u32 %v2443_v2, %v2159_v5 }
 0x515   :  { %1107 = vadd.xlane.f32.xlu0 %v1094_v12  ;;  %v2205_v12 = vld [vmem:[#allocation11 + $0x60] sm:$0xf]  ;;  %1480 = vmatpush.bf16.msra.mxu0 %v2178_v28  ;;  %v3145_v28 = vld [vmem:[#allocation8] ss:$0 sm:$0xff] }
 0x516   :  { %v2206_v11 = vor.u32 %v2457_v14, %v2205_v12  ;;  %v2446_v12 = vld [vmem:[#allocation11 + $0x14] sm:$0xf0]  ;;  %v2444_v14 = vld [vmem:[#allocation11 + $0xc] sm:$0xf] }
 0x517   :  { %1536 = vmatpush.bf16.msra.mxu2 %v2218_v21  ;;  %1509 = vmatpush.bf16.msra.mxu1 %v2182_v56  ;;  %v2166_v9 = vor.u32 %v2446_v12, %v2165_v6  ;;  %v2170_v15 = vor.u32 %v2444_v14, %v2167_v33 }
 0x518   :  { %1449 = vmatpush.bf16.msra.mxu3 %v2206_v11 }
 0x519   :  { %1481 = vmatpush.bf16.msra.mxu0 %v2162_v7 }
 0x51b   :  { %1537 = vmatpush.bf16.msra.mxu2 %v2202_v42  ;;  %1510 = vmatpush.bf16.msra.mxu1 %v2166_v9 }
 0x51c   :  { %1450 = vmatpush.bf16.msra.mxu3 %v2190_v27 }
 0x51f   :  { %1538 = vmatpush.bf16.msra.mxu2 %v2186_v62 }
 0x520   :  { %1451 = vmatpush.bf16.msra.mxu3 %v2174_v48 }
 0x523   :  { %1539 = vmatpush.bf16.msra.mxu2 %v2170_v15 }
 0x524   :  { %1452 = vmatpush.bf16.msra.mxu3 %v2158_v4 }
 0x560   :  { %v1098_v54 = vpop.xlane.xlu2 %1097  ;;  %v1070_v55 = vpop.xlane.xlu1 %1069 }
 0x561   :  { %v1113_v61 = vmul.f32 %v1098_v54, %v2920_v13  ;;  %v1079_v8 = vmul.f32 %v1070_v55, %v2920_v13 }
 0x563   :  { %v1121_v3 = vadd.f32 1e-05, %v1113_v61  ;;  %v3131_v18 = vsub.f32 %v3090_v53, %v1079_v8 }
 0x565   :  { %2588 = vrsqrt.f32 %v1121_v3  ;;  %v1095_v11 = vmul.f32 %v3131_v18, %v3131_v18  ;;  %vm1135_vm13 = vweird.f32 %v1121_v3 }
 0x567   :  { %1109 = vadd.xlane.f32.xlu1 %v1095_v11 }
 0x568   :  { %v1072_v25 = vpop.xlane.xlu2 %1071  ;;  %v1100_v16 = vpop.xlane.xlu0 %1099 }
 0x569   :  { %v1080_v17 = vmul.f32 %v1072_v25, %v2920_v13  ;;  %v1114_v19 = vmul.f32 %v1100_v16, %v2920_v13 }
 0x56b   :  { %v2589_v20 = vpop.eup %2588  ;;  %v3138_v21 = vsub.f32 %v3099_v60, %v1080_v17  ;;  %v1122_v22 = vadd.f32 1e-05, %v1114_v19 }
 0x56c   :  { %v1130_v23 = vmul.f32 %v2589_v20, %v1121_v3  ;;  %vm1136_vm12 = vweird.f32 %v2589_v20 }
 0x56d   :  { %2590 = vrsqrt.f32 %v1122_v22  ;;  %v1096_v26 = vmul.f32 %v3138_v21, %v3138_v21  ;;  %vm1137_vm14 = vmor %vm1135_vm13, %vm1136_vm12  ;;  %vm1145_vm0 = vweird.f32 %v1122_v22 }
 0x56e   :  { %v1131_v27 = vmul.f32 %v2589_v20, %v1130_v23 }
 0x56f   :  { %1111 = vadd.xlane.f32.xlu2 %v1096_v26 }
 0x570   :  { %v1132_v29 = vmul.f32 0.5, %v1131_v27  ;;  %v1102_v31 = vpop.xlane.xlu0 %1101 }
 0x571   :  { %v1115_v32 = vmul.f32 %v1102_v31, %v2920_v13 }
 0x572   :  { %v1133_v34 = vsub.f32 1.5, %v1132_v29 }
 0x573   :  { %v2591_v37 = vpop.eup %2590  ;;  %v1123_v38 = vadd.f32 1e-05, %v1115_v32 }
 0x574   :  { %v1134_v39 = vmul.f32 %v2589_v20, %v1133_v34  ;;  %v1140_v42 = vmul.f32 %v2591_v37, %v1122_v22  ;;  %vm1146_vm15 = vweird.f32 %v2591_v37 }
 0x575   :  { %2592 = vrsqrt.f32 %v1123_v38  ;;  %vm1147_vm1 = vmor %vm1145_vm0, %vm1146_vm15  ;;  %vm1155_vm3 = vweird.f32 %v1123_v38 }
 0x576   :  { %v1141_v43 = vmul.f32 %v2591_v37, %v1140_v42  ;;  %v1138_v44 = vsel %vm1137_vm14, %v2589_v20, %v1134_v39 }
 0x577   :  { %v1209_v54 = vmul.f32 %v1138_v44, %v3088_v50 }
 0x578   :  { %v1142_v47 = vmul.f32 0.5, %v1141_v43  ;;  %v1104_v48 = vpop.xlane.xlu1 %1103 }
 0x579   :  { %v1116_v49 = vmul.f32 %v1104_v48, %v2920_v13  ;;  %v1220_v62 = vmul.f32 %v3145_v28, %v1209_v54 }
 0x57a   :  { %v1143_v51 = vsub.f32 1.5, %v1142_v47 }
 0x57b   :  { %v2593_v52 = vpop.eup %2592  ;;  %v1124_v55 = vadd.f32 1e-05, %v1116_v49  ;;  %v1231_v7 = vadd.f32 %v3149_v0, %v1220_v62 }
 0x57c   :  { %v1144_v56 = vmul.f32 %v2591_v37, %v1143_v51  ;;  %v1150_v58 = vmul.f32 %v2593_v52, %v1123_v38  ;;  %vm1156_vm2 = vweird.f32 %v2593_v52 }
 0x57d   :  { %2594 = vrsqrt.f32 %v1124_v55  ;;  %vm1157_vm4 = vmor %vm1155_vm3, %vm1156_vm2  ;;  %vm1165_vm6 = vweird.f32 %v1124_v55 }
 0x57e   :  { %v1148_v36 = vsel %vm1147_vm1, %v2591_v37, %v1144_v56  ;;  %v1151_v61 = vmul.f32 %v2593_v52, %v1150_v58 }
 0x57f   :  { %v1210_v8 = vmul.f32 %v1148_v36, %v3097_v57 }
 0x580   :  { %v1152_v45 = vmul.f32 0.5, %v1151_v61  ;;  %v1106_v2 = vpop.xlane.xlu2 %1105 }
 0x581   :  { %v1117_v50 = vmul.f32 %v1106_v2, %v2920_v13  ;;  %v1221_v3 = vmul.f32 %v3145_v28, %v1210_v8  ;;  %v2489_v2 = vld [vmem:[#allocation13 + $0x70] sm:$0xff] }
 0x582   :  { %v1153_v4 = vsub.f32 1.5, %v1152_v45  ;;  %v2498_v45 = vld [vmem:[#allocation13 + $0xb8] sm:$0xff] }
 0x583   :  { %v2595_v5 = vpop.eup %2594  ;;  %v1125_v6 = vadd.f32 1e-05, %v1117_v50  ;;  %v1232_v12 = vadd.f32 %v3149_v0, %v1221_v3  ;;  %1927 = vmatpush.bf16.msrb.mxu1 %v2498_v45  ;;  %v2497_v50 = vld [vmem:[#allocation13 + $0xb0] sm:$0xff]  ;;  %v3168_v3 = vld [vmem:[#allocation13 + $0xf8] sm:$0xff] }
 0x584   :  { %v1154_v14 = vmul.f32 %v2593_v52, %v1153_v4  ;;  %v1160_v57 = vmul.f32 %v2595_v5, %v1124_v55  ;;  %vm1166_vm5 = vweird.f32 %v2595_v5  ;;  %v2488_v4 = vld [vmem:[#allocation13 + $0x68] sm:$0xff]  ;;  %1956 = vmatpush.bf16.msrb.mxu2 %v3168_v3 }
 0x585   :  { %2596 = vrsqrt.f32 %v1125_v6  ;;  %v1239_v33 = vpack.c.bf16 %v1232_v12, %v1231_v7  ;;  %vm1167_vm7 = vmor %vm1165_vm6, %vm1166_vm5  ;;  %vm1175_vm9 = vweird.f32 %v1125_v6  ;;  %v2481_v12 = vld [vmem:[#allocation13 + $0x30] sm:$0xff] }
 0x586   :  { %v1161_v11 = vmul.f32 %v2595_v5, %v1160_v57  ;;  %v1158_v9 = vsel %vm1157_vm4, %v2593_v52, %v1154_v14  ;;  %v3172_v14 = vld [vmem:[#allocation13 + $0xf0] sm:$0xff] }
 0x587   :  { %1453 = vmatmul.bf16.vlgmr.msra.gmra.mxu3 %v1239_v33  ;;  %1482 = vmatmul.bf16.vlgmr.msra.gmra.mxu0 %v1239_v33  ;;  %v1211_v20 = vmul.f32 %v1158_v9, %v3106_v63  ;;  %v2480_v9 = vld [vmem:[#allocation13 + $0x28] sm:$0xff] }
 0x588   :  { %v1162_v15 = vmul.f32 0.5, %v1161_v11  ;;  %1511 = vmatmul.bf16.vlgmr.msra.gmra.mxu1 %v1239_v33  ;;  %1540 = vmatmul.bf16.vlgmr.msra.gmra.mxu2 %v1239_v33  ;;  %v1108_v25 = vpop.xlane.xlu0 %1107  ;;  %v2487_v33 = vld [vmem:[#allocation13 + $0x60] sm:$0xff] }
 0x589   :  { %v1118_v16 = vmul.f32 %v1108_v25, %v2920_v13  ;;  %v1222_v32 = vmul.f32 %v3145_v28, %v1211_v20  ;;  %1928 = vmatpush.bf16.msrb.mxu1 %v2497_v50  ;;  %v2495_v11 = vld [vmem:[#allocation13 + $0xa0] sm:$0xff]  ;;  %1957 = vmatpush.bf16.msrb.mxu2 %v3172_v14 }
 0x58a   :  { %v1163_v17 = vsub.f32 1.5, %v1162_v15  ;;  %v3175_v15 = vld [vmem:[#allocation13 + $0xe8] sm:$0xff] }
 0x58b   :  { %v2597_v19 = vpop.eup %2596  ;;  %v1126_v22 = vadd.f32 1e-05, %v1118_v16  ;;  %v1233_v42 = vadd.f32 %v3149_v0, %v1222_v32  ;;  %v2478_v32 = vld [vmem:[#allocation13 + $0x18] sm:$0xff] }
 0x58c   :  { %v1164_v23 = vmul.f32 %v2595_v5, %v1163_v17  ;;  %v1170_v26 = vmul.f32 %v2597_v19, %v1125_v6  ;;  %vm1176_vm8 = vweird.f32 %v2597_v19  ;;  %v2496_v6 = vld [vmem:[#allocation13 + $0xa8] sm:$0xff]  ;;  %v2486_v17 = vld [vmem:[#allocation13 + $0x58] sm:$0xff] }
 0x58d   :  { %2598 = vrsqrt.f32 %v1126_v22  ;;  %vm1177_vm10 = vmor %vm1175_vm9, %vm1176_vm8  ;;  %vm1185_vm12 = vweird.f32 %v1126_v22  ;;  %1929 = vmatpush.bf16.msrb.mxu1 %v2496_v6  ;;  %1958 = vmatpush.bf16.msrb.mxu2 %v3175_v15 }
 0x58e   :  { %v1168_v27 = vsel %vm1167_vm7, %v2595_v5, %v1164_v23  ;;  %v1171_v29 = vmul.f32 %v2597_v19, %v1170_v26  ;;  %v2479_v23 = vld [vmem:[#allocation13 + $0x20] sm:$0xff] }
 0x58f   :  { %v1212_v31 = vmul.f32 %v1168_v27, %v3112_v1  ;;  %v3179_v26 = vld [vmem:[#allocation13 + $0xe0] sm:$0xff] }
 0x590   :  { %v1172_v34 = vmul.f32 0.5, %v1171_v29  ;;  %v2485_v29 = vld [vmem:[#allocation13 + $0x50] sm:$0xff] }
 0x591   :  { %v1223_v37 = vmul.f32 %v3145_v28, %v1212_v31  ;;  %1930 = vmatpush.bf16.msrb.mxu1 %v2495_v11  ;;  %1959 = vmatpush.bf16.msrb.mxu2 %v3179_v26  ;;  %v2493_v31 = vld [vmem:[#allocation13 + $0x90] sm:$0xff] }
 0x592   :  { %v1173_v38 = vsub.f32 1.5, %v1172_v34  ;;  %v2502_v34 = vld [vmem:[#allocation13 + $0xd8] sm:$0xff] }
 0x593   :  { %v2599_v39 = vpop.eup %2598  ;;  %v1234_v63 = vadd.f32 %v3149_v0, %v1223_v37 }
 0x594   :  { %v1174_v43 = vmul.f32 %v2597_v19, %v1173_v38  ;;  %v1180_v44 = vmul.f32 %v2599_v39, %v1126_v22  ;;  %vm1186_vm11 = vweird.f32 %v2599_v39  ;;  %v2484_v38 = vld [vmem:[#allocation13 + $0x48] sm:$0xff] }
 0x595   :  { %v1240_v47 = vpack.c.bf16 %v1234_v63, %v1233_v42  ;;  %vm1187_vm13 = vmor %vm1185_vm12, %vm1186_vm11  ;;  %1960 = vmatpush.bf16.msrb.mxu2 %v2502_v34 }
 0x596   :  { %v1181_v48 = vmul.f32 %v2599_v39, %v1180_v44  ;;  %v1178_v1 = vsel %vm1177_vm10, %v2597_v19, %v1174_v43  ;;  %v2494_v19 = vld [vmem:[#allocation13 + $0x98] sm:$0xff]  ;;  %v2477_v43 = vld [vmem:[#allocation13 + $0x10] sm:$0xff] }
 0x597   :  { %1458 = vmatmul.bf16.gmra.mxu3 %v1240_v47  ;;  %1487 = vmatmul.bf16.gmra.mxu0 %v1240_v47  ;;  %v1213_v52 = vmul.f32 %v1178_v1, %v3118_v59  ;;  %v2490_v59 = vld [vmem:[#allocation13 + $0x78] sm:$0xff]  ;;  %v2501_v44 = vld [vmem:[#allocation13 + $0xd0] sm:$0xff]  ;;  %v2483_v1 = vld [vmem:[#allocation13 + $0x40] sm:$0xff] }
 0x598   :  { %v1182_v49 = vmul.f32 0.5, %v1181_v48  ;;  %1516 = vmatmul.bf16.gmra.mxu1 %v1240_v47  ;;  %1545 = vmatmul.bf16.gmra.mxu2 %v1240_v47 }
 0x599   :  { %v1224_v58 = vmul.f32 %v3145_v28, %v1213_v52  ;;  %1898 = vmatpush.bf16.msrb.mxu0 %v2490_v59  ;;  %1931 = vmatpush.bf16.msrb.mxu1 %v2494_v19  ;;  %v2476_v52 = vld [vmem:[#allocation13 + $0x8] sm:$0xff] }
 0x59a   :  { %v1183_v51 = vsub.f32 1.5, %v1182_v49  ;;  %1961 = vmatpush.bf16.msrb.mxu2 %v2501_v44  ;;  %v2491_v49 = vld [vmem:[#allocation13 + $0x80] sm:$0xff] }
 0x59b   :  { %v1235_v61 = vadd.f32 %v3149_v0, %v1224_v58 }
 0x59c   :  { %v1184_v54 = vmul.f32 %v2599_v39, %v1183_v51 }
 0x59d   :  { %1899 = vmatpush.bf16.msrb.mxu0 %v2489_v2  ;;  %1932 = vmatpush.bf16.msrb.mxu1 %v2493_v31 }
 0x59e   :  { %v1188_v55 = vsel %vm1187_vm13, %v2599_v39, %v1184_v54  ;;  %v2492_v39 = vld [vmem:[#allocation13 + $0x88] sm:$0xff] }
 0x59f   :  { %v1214_v56 = vmul.f32 %v1188_v55, %v3124_v10  ;;  %v2482_v10 = vld [vmem:[#allocation13 + $0x38] sm:$0xff]  ;;  %v2500_v54 = vld [vmem:[#allocation13 + $0xc8] sm:$0xff] }
 0x5a0   :  { %1869 = vmatpush.bf16.msrb.mxu3 %v2482_v10  ;;  %1962 = vmatpush.bf16.msrb.mxu2 %v2500_v54 }
 0x5a1   :  { %v1225_v36 = vmul.f32 %v3145_v28, %v1214_v56  ;;  %1900 = vmatpush.bf16.msrb.mxu0 %v2488_v4  ;;  %1933 = vmatpush.bf16.msrb.mxu1 %v2492_v39 }
 0x5a3   :  { %v1236_v8 = vadd.f32 %v3149_v0, %v1225_v36 }
 0x5a4   :  { %1870 = vmatpush.bf16.msrb.mxu3 %v2481_v12 }
 0x5a5   :  { %v1241_v62 = vpack.c.bf16 %v1236_v8, %v1235_v61  ;;  %1901 = vmatpush.bf16.msrb.mxu0 %v2487_v33  ;;  %1934 = vmatpush.bf16.msrb.mxu1 %v2491_v49  ;;  %v2475_v61 = vld [vmem:[#allocation13] sm:$0xff] }
 0x5a6   :  { %v2499_v8 = vld [vmem:[#allocation13 + $0xc0] sm:$0xff] }
 0x5a7   :  { %1463 = vmatmul.bf16.gmra.mxu3 %v1241_v62  ;;  %1492 = vmatmul.bf16.gmra.mxu0 %v1241_v62 }
 0x5a8   :  { %1521 = vmatmul.bf16.gmra.mxu1 %v1241_v62  ;;  %1550 = vmatmul.bf16.gmra.mxu2 %v1241_v62 }
 0x5a9   :  { %1871 = vmatpush.bf16.msrb.mxu3 %v2480_v9  ;;  %1902 = vmatpush.bf16.msrb.mxu0 %v2486_v17 }
 0x5aa   :  { %1963 = vmatpush.bf16.msrb.mxu2 %v2499_v8 }
 0x5ad   :  { %1872 = vmatpush.bf16.msrb.mxu3 %v2479_v23  ;;  %1903 = vmatpush.bf16.msrb.mxu0 %v2485_v29 }
 0x5b1   :  { %1873 = vmatpush.bf16.msrb.mxu3 %v2478_v32  ;;  %1904 = vmatpush.bf16.msrb.mxu0 %v2484_v38 }
 0x5b5   :  { %1874 = vmatpush.bf16.msrb.mxu3 %v2477_v43  ;;  %1905 = vmatpush.bf16.msrb.mxu0 %v2483_v1 }
 0x5b9   :  { %1875 = vmatpush.bf16.msrb.mxu3 %v2476_v52 }
 0x5bd   :  { %1876 = vmatpush.bf16.msrb.mxu3 %v2475_v61 }
 0x5c1   :  { %2507 = vmatpush.bf16.msra.mxu3 %v3168_v3 }
 0x5c5   :  { %2508 = vmatpush.bf16.msra.mxu3 %v3172_v14 }
 0x5c9   :  { %2509 = vmatpush.bf16.msra.mxu3 %v3175_v15 }
 0x5cd   :  { %2510 = vmatpush.bf16.msra.mxu3 %v3179_v26 }
 0x5d1   :  { %2511 = vmatpush.bf16.msra.mxu3 %v2502_v34 }
 0x5d5   :  { %2512 = vmatpush.bf16.msra.mxu3 %v2501_v44 }
 0x5d9   :  { %2513 = vmatpush.bf16.msra.mxu3 %v2500_v54 }
 0x5da   :  { %v1110_v5 = vpop.xlane.xlu1 %1109 }
 0x5db   :  { %v1119_v7 = vmul.f32 %v1110_v5, %v2920_v13 }
 0x5dd   :  { %v1127_v57 = vadd.f32 1e-05, %v1119_v7  ;;  %2514 = vmatpush.bf16.msra.mxu3 %v2499_v8 }
 0x5df   :  { %2600 = vrsqrt.f32 %v1127_v57  ;;  %vm1195_vm15 = vweird.f32 %v1127_v57 }
 0x5e2   :  { %v1112_v25 = vpop.xlane.xlu2 %1111 }
 0x5e3   :  { %v1120_v16 = vmul.f32 %v1112_v25, %v2920_v13 }
 0x5e5   :  { %v2601_v20 = vpop.eup %2600  ;;  %v1128_v22 = vadd.f32 1e-05, %v1120_v16 }
 0x5e6   :  { %v1190_v27 = vmul.f32 %v2601_v20, %v1127_v57  ;;  %vm1196_vm14 = vweird.f32 %v2601_v20 }
 0x5e7   :  { %2602 = vrsqrt.f32 %v1128_v22  ;;  %vm1197_vm0 = vmor %vm1195_vm15, %vm1196_vm14  ;;  %vm1205_vm2 = vweird.f32 %v1128_v22 }
 0x5e8   :  { %v1191_v13 = vmul.f32 %v2601_v20, %v1190_v27 }
 0x5ea   :  { %v1192_v37 = vmul.f32 0.5, %v1191_v13 }
 0x5ec   :  { %v1193_v42 = vsub.f32 1.5, %v1192_v37 }
 0x5ed   :  { %v2603_v63 = vpop.eup %2602 }
 0x5ee   :  { %v1194_v47 = vmul.f32 %v2601_v20, %v1193_v42  ;;  %v1200_v48 = vmul.f32 %v2603_v63, %v1128_v22  ;;  %vm1206_vm1 = vweird.f32 %v2603_v63 }
 0x5ef   :  { %vm1207_vm3 = vmor %vm1205_vm2, %vm1206_vm1 }
 0x5f0   :  { %v1201_v51 = vmul.f32 %v2603_v63, %v1200_v48  ;;  %v1198_v55 = vsel %vm1197_vm0, %v2601_v20, %v1194_v47 }
 0x5f1   :  { %v1215_v36 = vmul.f32 %v1198_v55, %v3131_v18 }
 0x5f2   :  { %v1202_v56 = vmul.f32 0.5, %v1201_v51 }
 0x5f3   :  { %v1226_v2 = vmul.f32 %v3145_v28, %v1215_v36 }
 0x5f4   :  { %v1203_v58 = vsub.f32 1.5, %v1202_v56 }
 0x5f5   :  { %v1237_v18 = vadd.f32 %v3149_v0, %v1226_v2 }
 0x5f6   :  { %v1204_v62 = vmul.f32 %v2603_v63, %v1203_v58 }
 0x5f8   :  { %v1208_v59 = vsel %vm1207_vm3, %v2603_v63, %v1204_v62 }
 0x5f9   :  { %v1216_v45 = vmul.f32 %v1208_v59, %v3138_v21  ;;  %v1275_v21 = vld [vmem:[%s3271_s9] sm:$0xf] }
 0x5fa   :  { %v3195_v5 = vperm.slane %v1275_v21, 1  ;;  %v3197_v6 = vperm.slane %v1275_v21, 2  ;;  %v3201_v33 = vperm.slane %v1275_v21, 0  ;;  %v3204_v15 = vperm.slane %v1275_v21, 3 }
 0x5fb   :  { %v1227_v50 = vmul.f32 %v3145_v28, %v1216_v45 }
 0x5fd   :  { %v1238_v10 = vadd.f32 %v3149_v0, %v1227_v50 }
 0x5ff   :  { %v1242_v4 = vpack.c.bf16 %v1238_v10, %v1237_v18 }
 0x601   :  { %1468 = vmatmul.bf16.gmra.mxu3 %v1242_v4  ;;  %1497 = vmatmul.bf16.gmra.mxu0 %v1242_v4 }
 0x602   :  { %1526 = vmatmul.bf16.gmra.mxu1 %v1242_v4  ;;  %1555 = vmatmul.bf16.gmra.mxu2 %v1242_v4 }
 0x604   :  { %v1483_v3 = vpop.f32.mrf.mxu0 }
 0x605   :  { %v1512_v28 = vpop.f32.mrf.mxu1  ;;  %v1484_v7 = vadd.f32 %v1483_v3, %v3195_v5 }
 0x606   :  { %v1513_v14 = vadd.f32 %v1512_v28, %v3197_v6 }
 0x607   :  { %v1562_v16 = vmax.f32 %v1484_v7, 0.0 }
 0x608   :  { %v1563_v19 = vmax.f32 %v1513_v14, 0.0 }
 0x60a   :  { %v1454_v0 = vpop.f32.mrf.mxu3 }
 0x60b   :  { %v1541_v12 = vpop.f32.mrf.mxu2  ;;  %v1455_v22 = vadd.f32 %v1454_v0, %v3201_v33 }
 0x60c   :  { %v1485_v57 = vpop.f32.mrf.mxu0  ;;  %v1542_v26 = vadd.f32 %v1541_v12, %v3204_v15 }
 0x60d   :  { %v1486_v11 = vadd.f32 %v1485_v57, %v3195_v5  ;;  %v1514_v9 = vpop.f32.mrf.mxu1  ;;  %v1561_v37 = vmax.f32 %v1455_v22, 0.0 }
 0x60e   :  { %v1515_v25 = vadd.f32 %v1514_v9, %v3197_v6  ;;  %v1564_v42 = vmax.f32 %v1542_v26, 0.0 }
 0x60f   :  { %v1566_v17 = vmax.f32 %v1486_v11, 0.0 }
 0x610   :  { %v1567_v20 = vmax.f32 %v1515_v25, 0.0 }
 0x611   :  { %v1594_v23 = vpack.c.bf16 %v1566_v17, %v1562_v16 }
 0x612   :  { %v1595_v27 = vpack.c.bf16 %v1567_v20, %v1563_v19  ;;  %v1456_v29 = vpop.f32.mrf.mxu3 }
 0x613   :  { %v1457_v31 = vadd.f32 %v1456_v29, %v3201_v33  ;;  %v1543_v13 = vpop.f32.mrf.mxu2  ;;  %1906 = vmatmul.bf16.vlgmr.msrb.gmra.mxu0 %v1594_v23 }
 0x614   :  { %v1544_v32 = vadd.f32 %v1543_v13, %v3204_v15  ;;  %1935 = vmatmul.bf16.vlgmr.msrb.gmra.mxu1 %v1595_v27  ;;  %v1488_v34 = vpop.f32.mrf.mxu0 }
 0x615   :  { %v1565_v38 = vmax.f32 %v1457_v31, 0.0  ;;  %v1517_v39 = vpop.f32.mrf.mxu1  ;;  %v1489_v48 = vadd.f32 %v1488_v34, %v3195_v5 }
 0x616   :  { %v1568_v63 = vmax.f32 %v1544_v32, 0.0  ;;  %v1518_v49 = vadd.f32 %v1517_v39, %v3197_v6 }
 0x617   :  { %v1593_v43 = vpack.c.bf16 %v1565_v38, %v1561_v37  ;;  %v1570_v56 = vmax.f32 %v1489_v48, 0.0 }
 0x618   :  { %v1596_v44 = vpack.c.bf16 %v1568_v63, %v1564_v42  ;;  %v1571_v36 = vmax.f32 %v1518_v49, 0.0 }
 0x619   :  { %1877 = vmatmul.bf16.vlgmr.msrb.gmra.mxu3 %v1593_v43 }
 0x61a   :  { %1964 = vmatmul.bf16.vlgmr.msrb.gmra.mxu2 %v1596_v44  ;;  %v1459_v47 = vpop.f32.mrf.mxu3 }
 0x61b   :  { %v1546_v1 = vpop.f32.mrf.mxu2  ;;  %v1460_v8 = vadd.f32 %v1459_v47, %v3201_v33 }
 0x61c   :  { %v1490_v51 = vpop.f32.mrf.mxu0  ;;  %v1547_v59 = vadd.f32 %v1546_v1, %v3204_v15 }
 0x61d   :  { %v1491_v52 = vadd.f32 %v1490_v51, %v3195_v5  ;;  %v1519_v54 = vpop.f32.mrf.mxu1  ;;  %v1569_v21 = vmax.f32 %v1460_v8, 0.0 }
 0x61e   :  { %v1520_v55 = vadd.f32 %v1519_v54, %v3197_v6  ;;  %v1572_v0 = vmax.f32 %v1547_v59, 0.0 }
 0x61f   :  { %v1574_v58 = vmax.f32 %v1491_v52, 0.0 }
 0x620   :  { %v1575_v61 = vmax.f32 %v1520_v55, 0.0 }
 0x621   :  { %v1598_v62 = vpack.c.bf16 %v1574_v58, %v1570_v56 }
 0x622   :  { %v1461_v45 = vpop.f32.mrf.mxu3  ;;  %v1599_v2 = vpack.c.bf16 %v1575_v61, %v1571_v36 }
 0x623   :  { %v1462_v50 = vadd.f32 %v1461_v45, %v3201_v33  ;;  %v1548_v18 = vpop.f32.mrf.mxu2  ;;  %1911 = vmatmul.bf16.gmra.mxu0 %v1598_v62 }
 0x624   :  { %v1549_v10 = vadd.f32 %v1548_v18, %v3204_v15  ;;  %1940 = vmatmul.bf16.gmra.mxu1 %v1599_v2  ;;  %v1493_v4 = vpop.f32.mrf.mxu0 }
 0x625   :  { %v1573_v3 = vmax.f32 %v1462_v50, 0.0  ;;  %v1522_v28 = vpop.f32.mrf.mxu1  ;;  %v1494_v11 = vadd.f32 %v1493_v4, %v3195_v5 }
 0x626   :  { %v1576_v7 = vmax.f32 %v1549_v10, 0.0  ;;  %v1523_v25 = vadd.f32 %v1522_v28, %v3197_v6 }
 0x627   :  { %v1597_v12 = vpack.c.bf16 %v1573_v3, %v1569_v21  ;;  %v1578_v22 = vmax.f32 %v1494_v11, 0.0 }
 0x628   :  { %v1600_v14 = vpack.c.bf16 %v1576_v7, %v1572_v0  ;;  %v1579_v26 = vmax.f32 %v1523_v25, 0.0 }
 0x629   :  { %1882 = vmatmul.bf16.gmra.mxu3 %v1597_v12  ;;  %v3237_v12 = vld [vmem:[%s3273_s11] ss:$0 sm:$0xff]  ;;  %s2830_s11 = smov [#allocation14]  }
 0x62a   :  { %1969 = vmatmul.bf16.gmra.mxu2 %v1600_v14  ;;  %v1464_v57 = vpop.f32.mrf.mxu3  ;;  %s2005_s8 = sshll.u32 %s2830_s11, 4  ;;  %s2006_s8 = int_to_ptr.vmem [resolvable:$true] %s2005_s8 }
 0x62b   :  { %v1551_v9 = vpop.f32.mrf.mxu2  ;;  %v1465_v29 = vadd.f32 %v1464_v57, %v3201_v33 }
 0x62c   :  { %v1495_v16 = vpop.f32.mrf.mxu0  ;;  %v1552_v13 = vadd.f32 %v1551_v9, %v3204_v15 }
 0x62d   :  { %v1496_v17 = vadd.f32 %v1495_v16, %v3195_v5  ;;  %v1524_v19 = vpop.f32.mrf.mxu1  ;;  %v1577_v42 = vmax.f32 %v1465_v29, 0.0 }
 0x62e   :  { %v1525_v20 = vadd.f32 %v1524_v19, %v3197_v6  ;;  %v1580_v43 = vmax.f32 %v1552_v13, 0.0 }
 0x62f   :  { %v1582_v23 = vmax.f32 %v1496_v17, 0.0 }
 0x630   :  { %v1583_v27 = vmax.f32 %v1525_v20, 0.0 }
 0x631   :  { %v1602_v31 = vpack.c.bf16 %v1582_v23, %v1578_v22 }
 0x632   :  { %v1466_v32 = vpop.f32.mrf.mxu3  ;;  %v1603_v34 = vpack.c.bf16 %v1583_v27, %v1579_v26 }
 0x633   :  { %v1467_v37 = vadd.f32 %v1466_v32, %v3201_v33  ;;  %v1553_v38 = vpop.f32.mrf.mxu2  ;;  %1916 = vmatmul.bf16.gmra.mxu0 %v1602_v31 }
 0x634   :  { %v1554_v39 = vadd.f32 %v1553_v38, %v3204_v15  ;;  %1945 = vmatmul.bf16.gmra.mxu1 %v1603_v34 }
 0x635   :  { %v1581_v63 = vmax.f32 %v1467_v37, 0.0 }
 0x636   :  { %v1584_v44 = vmax.f32 %v1554_v39, 0.0 }
 0x637   :  { %v1601_v47 = vpack.c.bf16 %v1581_v63, %v1577_v42 }
 0x638   :  { %v1604_v48 = vpack.c.bf16 %v1584_v44, %v1580_v43 }
 0x639   :  { %1887 = vmatmul.bf16.gmra.mxu3 %v1601_v47 }
 0x63a   :  { %1974 = vmatmul.bf16.gmra.mxu2 %v1604_v48 }
 0x67e   :  { %v1498_v1 = vpop.f32.mrf.mxu0 }
 0x67f   :  { %v1527_v49 = vpop.f32.mrf.mxu1  ;;  %v1499_v52 = vadd.f32 %v1498_v1, %v3195_v5 }
 0x680   :  { %v1528_v54 = vadd.f32 %v1527_v49, %v3197_v6 }
 0x681   :  { %v1586_v61 = vmax.f32 %v1499_v52, 0.0 }
 0x682   :  { %v1587_v62 = vmax.f32 %v1528_v54, 0.0 }
 0x684   :  { %v1469_v51 = vpop.f32.mrf.mxu3 }
 0x685   :  { %v1470_v45 = vadd.f32 %v1469_v51, %v3201_v33  ;;  %v1556_v2 = vpop.f32.mrf.mxu2 }
 0x686   :  { %v1500_v55 = vpop.f32.mrf.mxu0  ;;  %v1557_v14 = vadd.f32 %v1556_v2, %v3204_v15 }
 0x687   :  { %v1501_v56 = vadd.f32 %v1500_v55, %v3195_v5  ;;  %v1529_v58 = vpop.f32.mrf.mxu1  ;;  %v1585_v21 = vmax.f32 %v1470_v45, 0.0 }
 0x688   :  { %v1530_v36 = vadd.f32 %v1529_v58, %v3197_v6  ;;  %v1588_v16 = vmax.f32 %v1557_v14, 0.0 }
 0x689   :  { %v1590_v8 = vmax.f32 %v1501_v56, 0.0 }
 0x68a   :  { %v1591_v59 = vmax.f32 %v1530_v36, 0.0 }
 0x68b   :  { %v1606_v50 = vpack.c.bf16 %v1590_v8, %v1586_v61 }
 0x68c   :  { %v1607_v18 = vpack.c.bf16 %v1591_v59, %v1587_v62  ;;  %v1471_v10 = vpop.f32.mrf.mxu3 }
 0x68d   :  { %v1472_v4 = vadd.f32 %v1471_v10, %v3201_v33  ;;  %1921 = vmatmul.bf16.gmra.mxu0 %v1606_v50  ;;  %v1558_v6 = vpop.f32.mrf.mxu2 }
 0x68e   :  { %1950 = vmatmul.bf16.gmra.mxu1 %v1607_v18  ;;  %v1559_v7 = vadd.f32 %v1558_v6, %v3204_v15 }
 0x68f   :  { %v1589_v3 = vmax.f32 %v1472_v4, 0.0 }
 0x690   :  { %v1907_v28 = vpop.f32.mrf.mxu0  ;;  %v1592_v33 = vmax.f32 %v1559_v7, 0.0 }
 0x691   :  { %v1605_v5 = vpack.c.bf16 %v1589_v3, %v1585_v21  ;;  %v1936_v0 = vpop.f32.mrf.mxu1 }
 0x692   :  { %v1608_v20 = vpack.c.bf16 %v1592_v33, %v1588_v16 }
 0x693   :  { %1892 = vmatmul.bf16.gmra.mxu3 %v1605_v5 }
 0x698   :  { %v1909_v25 = vpop.f32.mrf.mxu0 }
 0x699   :  { %v1938_v19 = vpop.f32.mrf.mxu1 }
 0x69c   :  { %v1878_v57 = vpop.f32.mrf.mxu3 }
 0x69d   :  { %v1879_v11 = vadd.f32 %v3237_v12, %v1878_v57  ;;  %v1965_v9 = vpop.f32.mrf.mxu2 }
 0x69f   :  { %v1908_v17 = vadd.f32 %v1907_v28, %v1879_v11 }
 0x6a0   :  { %v1912_v13 = vpop.f32.mrf.mxu0 }
 0x6a1   :  { %v1937_v22 = vadd.f32 %v1936_v0, %v1908_v17  ;;  %v1941_v34 = vpop.f32.mrf.mxu1 }
 0x6a3   :  { %v1966_v23 = vadd.f32 %v1965_v9, %v1937_v22  ;;  %1979 = vmatmul.bf16.vlgmr.msra.gmra.mxu3 %v1608_v20 }
 0x6a4   :  { %v1880_v26 = vpop.f32.mrf.mxu3 }
 0x6a5   :  { %v1985_v27 = vadd.f32 %v1966_v23, %v3068_v30  ;;  %v1881_v29 = vadd.f32 %v3237_v12, %v1880_v26  ;;  %v1967_v31 = vpop.f32.mrf.mxu2 }
 0x6a7   :  { %1993 = vst [vmem:[#allocation14] sm:$0xff] %v1985_v27  ;;  %v1910_v15 = vadd.f32 %v1909_v25, %v1881_v29 }
 0x6a8   :  { %v1914_v47 = vpop.f32.mrf.mxu0 }
 0x6a9   :  { %v1939_v32 = vadd.f32 %v1938_v19, %v1910_v15  ;;  %v1943_v48 = vpop.f32.mrf.mxu1 }
 0x6ab   :  { %v1968_v37 = vadd.f32 %v1967_v31, %v1939_v32 }
 0x6ac   :  { %v1883_v38 = vpop.f32.mrf.mxu3 }
 0x6ad   :  { %v1986_v39 = vadd.f32 %v1968_v37, %v3071_v24  ;;  %v1884_v42 = vadd.f32 %v3237_v12, %v1883_v38  ;;  %v1970_v63 = vpop.f32.mrf.mxu2 }
 0x6af   :  { %1994 = vst [vmem:[#allocation14 + $0x8] sm:$0xff] %v1986_v39  ;;  %v1913_v43 = vadd.f32 %v1912_v13, %v1884_v42 }
 0x6b0   :  { %v1917_v24 = vpop.f32.mrf.mxu0 }
 0x6b1   :  { %v1942_v44 = vadd.f32 %v1941_v34, %v1913_v43  ;;  %v1946_v8 = vpop.f32.mrf.mxu1 }
 0x6b3   :  { %v1971_v30 = vadd.f32 %v1970_v63, %v1942_v44 }
 0x6b4   :  { %v1885_v1 = vpop.f32.mrf.mxu3 }
 0x6b5   :  { %v1987_v49 = vadd.f32 %v1971_v30, %v3074_v41  ;;  %v1886_v51 = vadd.f32 %v3237_v12, %v1885_v1  ;;  %v1972_v52 = vpop.f32.mrf.mxu2 }
 0x6b7   :  { %1995 = vst [vmem:[#allocation14 + $0x10] sm:$0xff] %v1987_v49  ;;  %v1915_v54 = vadd.f32 %v1914_v47, %v1886_v51 }
 0x6b8   :  { %v1919_v10 = vpop.f32.mrf.mxu0 }
 0x6b9   :  { %v1944_v55 = vadd.f32 %v1943_v48, %v1915_v54  ;;  %v1948_v21 = vpop.f32.mrf.mxu1 }
 0x6bb   :  { %v1973_v56 = vadd.f32 %v1972_v52, %v1944_v55 }
 0x6bc   :  { %v1888_v58 = vpop.f32.mrf.mxu3 }
 0x6bd   :  { %v1988_v36 = vadd.f32 %v1973_v56, %v3077_v35  ;;  %v1889_v61 = vadd.f32 %v3237_v12, %v1888_v58  ;;  %v1975_v59 = vpop.f32.mrf.mxu2 }
 0x6bf   :  { %1996 = vst [vmem:[#allocation14 + $0x18] sm:$0xff] %v1988_v36  ;;  %v1918_v62 = vadd.f32 %v1917_v24, %v1889_v61 }
 0x6c1   :  { %v1947_v45 = vadd.f32 %v1946_v8, %v1918_v62 }
 0x6c3   :  { %v1976_v2 = vadd.f32 %v1975_v59, %v1947_v45 }
 0x6c4   :  { %v1890_v41 = vpop.f32.mrf.mxu3 }
 0x6c5   :  { %v1989_v50 = vadd.f32 %v1976_v2, %v3080_v40  ;;  %v1891_v18 = vadd.f32 %v3237_v12, %v1890_v41  ;;  %v1977_v5 = vpop.f32.mrf.mxu2 }
 0x6c7   :  { %1997 = vst [vmem:[#allocation14 + $0x20] sm:$0xff] %v1989_v50  ;;  %v1920_v4 = vadd.f32 %v1919_v10, %v1891_v18 }
 0x6c9   :  { %v1949_v3 = vadd.f32 %v1948_v21, %v1920_v4 }
 0x6cb   :  { %v1978_v35 = vadd.f32 %v1977_v5, %v1949_v3 }
 0x6cd   :  { %v1990_v28 = vadd.f32 %v1978_v35, %v3083_v46 }
 0x6cf   :  { %1998 = vst [vmem:[#allocation14 + $0x28] sm:$0xff] %v1990_v28 }
 0x70a   :  { %v1922_v7 = vpop.f32.mrf.mxu0 }
 0x70b   :  { %v1951_v33 = vpop.f32.mrf.mxu1 }
 0x712   :  { %v1924_v16 = vpop.f32.mrf.mxu0 }
 0x713   :  { %v1953_v20 = vpop.f32.mrf.mxu1 }
 0x716   :  { %v1893_v6 = vpop.f32.mrf.mxu3 }
 0x717   :  { %v1894_v0 = vadd.f32 %v3237_v12, %v1893_v6 }
 0x719   :  { %v1923_v57 = vadd.f32 %v1922_v7, %v1894_v0 }
 0x71b   :  { %v1952_v11 = vadd.f32 %v1951_v33, %v1923_v57 }
 0x71e   :  { %v1895_v14 = vpop.f32.mrf.mxu3 }
 0x71f   :  { %v1896_v40 = vadd.f32 %v3237_v12, %v1895_v14 }
 0x721   :  { %v1925_v17 = vadd.f32 %v1924_v16, %v1896_v40 }
 0x723   :  { %v1954_v46 = vadd.f32 %v1953_v20, %v1925_v17 }
 0x726   :  { %v1980_v9 = vpop.f32.mrf.mxu3 }
 0x727   :  { %v1981_v25 = vadd.f32 %v1980_v9, %v1952_v11 }
 0x729   :  { %v1991_v19 = vadd.f32 %v1981_v25, %v3090_v53 }
 0x72b   :  { %1999 = vst [vmem:[#allocation14 + $0x30] sm:$0xff] %v1991_v19 }
 0x72e   :  { %v1982_v22 = vpop.f32.mrf.mxu3 }
 0x72f   :  { %v1983_v23 = vadd.f32 %v1982_v22, %v1954_v46 }
 0x731   :  { %v1992_v12 = vadd.f32 %v1983_v23, %v3099_v60 }
 0x733   :  { %2000 = vst [vmem:[#allocation14 + $0x38] sm:$0xff] %v1992_v12 }
 0x734   :  { %2013 = dma.vmem_to_hbm [thread:$0]  %s2006_s8, 1024, %s2008_s29, [#allocation4], %s2822_s25, %s2822_s25, %s2823_s26  }
 0x735   :  { %2812 = dma.done.wait [#allocation4], 1024  }
 0x736   :  { %2813 = vsyncadd [#allocation4], 4294966272 }
 0x737   :  { %2018 = vsyncpa [#allocation3], 1 }
 0x738   :  { %2019 = vsyncpa [#allocation6], 1 }
 0x739   :  { %2020 = vsyncpa [#allocation9], 1 }
 0x73a   :  { %2021 = vsyncpa [#allocation12], 1 }
 0x73b   :  { %2022 = vsyncpa [#allocation4], 1 }

</bundles_post_ra>
